<compile_context>
chip_gen: v7x
topology: tpu7x:2x2x1
jax: 0.10.0
libtpu: 0.0.40
codegen_flags: <defaults>
</compile_context>

<pallas_src>
import functools
import math

import numpy as np
import jax
import jax.numpy as jnp
from jax.experimental import pallas as pl
from jax.experimental.pallas import tpu as pltpu


_BLOCK_PARAM_ORDER = ("wq", "bq", "wk", "bk", "wv", "bv", "wo", "bo",
                      "g1", "b1", "g2", "b2", "w1", "c1", "w2", "c2")
_FF_TILE_MAX = 1024   # DFF chunk size inside the fused block kernel
# TODO(synk): for very large D/DFF on v7x (64 MiB VMEM/TC), stream w1/w2 in (D, ff_tile)
# slices via an extra DFF grid axis instead of whole-(D, DFF) double-buffered blocks.


def _vmem_limit_bytes():
    """Generation-aware scoped-VMEM limit (~80% of physical: v5e/v6e ~102 MiB, v7x ~51 MiB)."""
    try:
        cap = int(pltpu.get_tpu_info().vmem_capacity_bytes)
    except Exception:
        cap = 64 * 1024 * 1024
    return min(int(cap * 0.8), 112 * 1024 * 1024)


# ----------------------------------------------------------------------------
# Shared math (used inside the Pallas kernels AND by the pure-JAX reference)
# ----------------------------------------------------------------------------
def _layernorm(x, g, b, eps=1e-5):
    mu = jnp.mean(x, axis=-1, keepdims=True)
    var = jnp.mean((x - mu) ** 2, axis=-1, keepdims=True)
    return (x - mu) * jax.lax.rsqrt(var + eps) * g + b


def _fused_block_math(h, bt, seq, wq, bq, wk, bk, wv, bv, wo, bo,
                      g1, b1, g2, b2, w1s, c1, w2s, c2,
                      *, num_heads, is_causal, d_ff, ff_tile, recip):
    """One pre-LN transformer block on a flattened (bt*seq, D) f32 activation matrix.

    wq/bq already carry the 1/sqrt(head_dim) attention scale (folded at init time).
    `w1s(f0, f1)` / `w2s(f0, f1)` return the (D, f1-f0) / (f1-f0, D) FFN weight slices
    (ref slices inside the kernel, array slices in the pure-JAX reference).
    `recip` is pl.reciprocal(approx=True) in-kernel, exact 1/x in the reference.
    """
    m, d = h.shape
    hd = d // num_heads
    bf16 = jnp.bfloat16

    # ---- attention ----
    ln1 = _layernorm(h, g1, b1).astype(bf16)
    q = jnp.dot(ln1, wq, preferred_element_type=jnp.float32) + bq
    k = jnp.dot(ln1, wk, preferred_element_type=jnp.float32) + bk
    v = jnp.dot(ln1, wv, preferred_element_type=jnp.float32) + bv
    qb, kb, vb = q.astype(bf16), k.astype(bf16), v.astype(bf16)

    # Gather all heads into a single (bt*H, S, hd) batch (lane slices + major-only
    # reshapes + one concat along a major axis) so the score / context matmuls are
    # ONE pair of batched einsums instead of H tiny per-head matmuls.
    # TODO(synk): switch to a 2-batch-dim einsum ('bqhd,bkhd->bhqk') once Mosaic's
    # multi-batch-dim dot_general lowering is confirmed on the target jax version.
    def split_heads(x2d):
        parts = [x2d[:, hh * hd:(hh + 1) * hd].reshape(bt, 1, seq, hd)
                 for hh in range(num_heads)]
        return jnp.concatenate(parts, axis=1).reshape(bt * num_heads, seq, hd)

    qh, kh, vh = split_heads(qb), split_heads(kb), split_heads(vb)

    s = jnp.einsum("bqd,bkd->bqk", qh, kh,
                   preferred_element_type=jnp.float32)               # (bt*H, S, S)
    if is_causal:
        row = jax.lax.broadcasted_iota(jnp.int32, (seq, seq), 0)
        col = jax.lax.broadcasted_iota(jnp.int32, (seq, seq), 1)
        s = jnp.where((col <= row)[None], s, jnp.float32(-1e30))     # (1,S,S) broadcast
    s = s - jnp.max(s, axis=-1, keepdims=True)
    p = jnp.exp(s)
    p = p * recip(jnp.sum(p, axis=-1, keepdims=True))
    ctx = jnp.einsum("bqk,bkd->bqd", p.astype(bf16), vh,
                     preferred_element_type=jnp.float32)             # (bt*H, S, hd)
    ctx = ctx.reshape(bt, num_heads, seq, hd)

    # Output projection accumulated per head: no lane-misaligned concat back to (m, D).
    attn = None
    for hh in range(num_heads):
        ctx_h = ctx[:, hh].reshape(m, hd).astype(bf16)
        part = jnp.dot(ctx_h, wo[hh * hd:(hh + 1) * hd, :],
                       preferred_element_type=jnp.float32)
        attn = part if attn is None else attn + part
    h1 = h + attn + bo

    # ---- MLP (tiled along DFF; accumulator seeded by the first chunk) ----
    ln2 = _layernorm(h1, g2, b2).astype(bf16)
    acc = None
    for f0 in range(0, d_ff, ff_tile):
        f1 = min(f0 + ff_tile, d_ff)
        ffc = jnp.dot(ln2, w1s(f0, f1), preferred_element_type=jnp.float32) + c1[:, f0:f1]
        ffc = jax.nn.gelu(ffc).astype(bf16)
        part = jnp.dot(ffc, w2s(f0, f1), preferred_element_type=jnp.float32)
        acc = part if acc is None else acc + part
    return h1 + acc + c2


def _head_math(x, g, b, w, c):
    ln = _layernorm(x.astype(jnp.float32), g, b).astype(jnp.bfloat16)
    return jnp.dot(ln, w, preferred_element_type=jnp.float32) + c


# ----------------------------------------------------------------------------
# Pallas kernels
# ----------------------------------------------------------------------------
def _stage_kernel(x_ref, wq_ref, bq_ref, wk_ref, bk_ref, wv_ref, bv_ref,
                  wo_ref, bo_ref, g1_ref, b1_ref, g2_ref, b2_ref,
                  w1_ref, c1_ref, w2_ref, c2_ref, o_ref, h_ref,
                  *, num_heads, is_causal, ff_tile):
    l = pl.program_id(1)
    bt, seq, d = x_ref.shape
    d_ff = w1_ref.shape[-1]

    @pl.when(l == 0)
    def _():
        # Load this batch tile's activations once; carry them (f32) in VMEM across layers.
        h_ref[...] = x_ref[...].astype(jnp.float32).reshape(bt * seq, d)

    out = _fused_block_math(
        h_ref[...], bt, seq,
        wq_ref[0], bq_ref[0], wk_ref[0], bk_ref[0],
        wv_ref[0], bv_ref[0], wo_ref[0], bo_ref[0],
        g1_ref[0], b1_ref[0], g2_ref[0], b2_ref[0],
        lambda a, b: w1_ref[0, :, a:b], c1_ref[0],
        lambda a, b: w2_ref[0, a:b, :], c2_ref[0],
        num_heads=num_heads, is_causal=is_causal, d_ff=d_ff, ff_tile=ff_tile,
        recip=lambda t: pl.reciprocal(t, approx=True))
    h_ref[...] = out

    @pl.when(l == pl.num_programs(1) - 1)
    def _():
        # Inter-stage activation leaves the kernel in bf16 (halves HBM writeback + send).
        o_ref[...] = out.reshape(bt, seq, d).astype(o_ref.dtype)


def _head_kernel(x_ref, g_ref, b_ref, w_ref, c_ref, o_ref, ln_ref):
    bt, seq, d = x_ref.shape

    @pl.when(pl.program_id(1) == 0)
    def _():
        # LayerNorm computed once per batch tile, reused across all vocab tiles.
        x2d = x_ref[...].astype(jnp.float32).reshape(bt * seq, d)
        ln_ref[...] = _layernorm(x2d, g_ref[...], b_ref[...]).astype(ln_ref.dtype)

    out = jnp.dot(ln_ref[...], w_ref[...], preferred_element_type=jnp.float32) + c_ref[...]
    o_ref[...] = out.reshape(o_ref.shape).astype(o_ref.dtype)


# ----------------------------------------------------------------------------
# Wrappers
# ----------------------------------------------------------------------------
def _pick_block_batch(batch, seq, *, target_rows=512, min_tiles=1):
    """Largest divisor bt of `batch` with bt*seq <= target_rows and batch//bt >= min_tiles."""
    divisors = [d for d in range(1, batch + 1) if batch % d == 0]
    cands = [d for d in divisors if batch // d >= min_tiles] or divisors
    fitting = [d for d in cands if d * seq <= target_rows]
    return max(fitting) if fitting else min(cands)


def transformer_stack(x, blocks, *, num_heads, is_causal, out_dtype=jnp.bfloat16):
    """Run all transformer blocks of a stage in one fused pallas_call."""
    B, S, D = x.shape
    L = len(blocks)
    stacked = [jnp.stack([blk[n] for blk in blocks], axis=0) for n in _BLOCK_PARAM_ORDER]
    # Target >=256 flattened rows (256-wide MXU on v6e/v7x) but keep nb >= 2 so the
    # "parallel" batch-tile axis can shard across v7x's two TensorCores.
    bt = _pick_block_batch(B, S, target_rows=512, min_tiles=2)
    nb = B // bt
    d_ff = blocks[0]["w1"].shape[-1]
    ff_tile = min(d_ff, _FF_TILE_MAX)

    kernel = functools.partial(_stage_kernel, num_heads=num_heads,
                               is_causal=is_causal, ff_tile=ff_tile)
    in_specs = [pl.BlockSpec((bt, S, D), lambda b, l: (b, 0, 0))]
    # Per-layer weight blocks: re-fetched only nb (1-2) times per layer thanks to big bt.
    # TODO(synk): on v5e, if all L layers' bf16 weights fit VMEM, give them a full-L block
    # (index_map independent of l) so they are DMA'd exactly once per batch tile.
    in_specs += [pl.BlockSpec((1,) + w.shape[1:], lambda b, l: (l, 0, 0)) for w in stacked]

    return pl.pallas_call(
        kernel,
        out_shape=jax.ShapeDtypeStruct((B, S, D), out_dtype),
        grid=(nb, L),
        in_specs=in_specs,
        out_specs=pl.BlockSpec((bt, S, D), lambda b, l: (b, 0, 0)),
        scratch_shapes=[pltpu.VMEM((bt * S, D), jnp.float32)],
        compiler_params=pltpu.CompilerParams(
            dimension_semantics=("parallel", "arbitrary"),
            vmem_limit_bytes=_vmem_limit_bytes()),
    )(x, *stacked)


def final_head(x, p):
    """Final LayerNorm + vocab projection, tiled over V with lane-dense output blocks."""
    B, S, D = x.shape
    V = p["w_out"].shape[1]
    # nb -> 1 so w_out is streamed from HBM only once (biggest win on v5e).
    bt = _pick_block_batch(B, S, target_rows=512, min_tiles=1)
    nb = B // bt
    tv = next((t for t in (1024, 512, 256, 128) if V % t == 0), V)
    nv = V // tv
    in_specs = [
        pl.BlockSpec((bt, S, D), lambda b, v: (b, 0, 0)),
        pl.BlockSpec((1, D), lambda b, v: (0, 0)),
        pl.BlockSpec((1, D), lambda b, v: (0, 0)),
        pl.BlockSpec((D, tv), lambda b, v: (0, v)),
        pl.BlockSpec((1, tv), lambda b, v: (0, v)),
    ]
    return pl.pallas_call(
        _head_kernel,
        out_shape=jax.ShapeDtypeStruct((B, S, V), jnp.float32),
        grid=(nb, nv),
        in_specs=in_specs,
        out_specs=pl.BlockSpec((bt, S, tv), lambda b, v: (b, 0, v)),
        scratch_shapes=[pltpu.VMEM((bt * S, D), jnp.bfloat16)],
        compiler_params=pltpu.CompilerParams(
            dimension_semantics=("parallel", "arbitrary"),
            vmem_limit_bytes=_vmem_limit_bytes()),
    )(x, p["g"], p["b"], p["w_out"], p["c_out"])


# ----------------------------------------------------------------------------
# PipelineStage forward (mirrors the PyTorch branch structure on rank)
# ----------------------------------------------------------------------------
def pipeline_stage_forward(rank, world_size, x, params, *,
                           attn_mask=None, key_padding_mask=None, is_causal=True):
    # TODO(synk): explicit attn_mask / key_padding_mask tensors are not supported;
    # only is_causal masking is implemented (dropout is identity at inference).
    num_heads = params["num_heads"]
    if rank == 0:
        B, S = x.shape
        # layers[0]: token embedding, layers[1]: positional embedding (XLA gathers + add).
        tok_e = jnp.take(params["tok_emb"], x, axis=0)                        # (B, S, D)
        pos_e = jnp.take(params["pos_emb"], jnp.arange(S, dtype=jnp.int32), axis=0)
        h = tok_e + pos_e[None]
        # layers[2]: Dropout -> identity; layers[3:]: transformer blocks (fused).
        return transformer_stack(h, params["blocks"], num_heads=num_heads, is_causal=is_causal)
    elif rank == world_size - 1:
        h = transformer_stack(x, params["blocks"], num_heads=num_heads, is_causal=is_causal)
        return final_head(h, params["final"])                                 # layers[-2], [-1]
    else:
        return transformer_stack(x, params["blocks"], num_heads=num_heads, is_causal=is_causal)


# ----------------------------------------------------------------------------
# Pure-JAX reference (same math, same bf16 casts, exact reciprocal)
# ----------------------------------------------------------------------------
def ref_stage_forward(rank, world_size, x, params, *, is_causal=True):
    num_heads = params["num_heads"]

    def run_blocks(h):
        B, S, D = h.shape
        d_ff = params["blocks"][0]["w1"].shape[-1]
        ff_tile = min(d_ff, _FF_TILE_MAX)
        h2 = h.astype(jnp.float32).reshape(B * S, D)
        for blk in params["blocks"]:
            h2 = _fused_block_math(
                h2, B, S,
                blk["wq"], blk["bq"], blk["wk"], blk["bk"],
                blk["wv"], blk["bv"], blk["wo"], blk["bo"],
                blk["g1"], blk["b1"], blk["g2"], blk["b2"],
                lambda a, b, w=blk["w1"]: w[:, a:b], blk["c1"],
                lambda a, b, w=blk["w2"]: w[a:b, :], blk["c2"],
                num_heads=num_heads, is_causal=is_causal,
                d_ff=d_ff, ff_tile=ff_tile, recip=lambda t: 1.0 / t)
        # Stage output crosses the pipeline boundary in bf16 (matches the kernel).
        return h2.reshape(B, S, D).astype(jnp.bfloat16)

    if rank == 0:
        B, S = x.shape
        tok_e = jnp.take(params["tok_emb"], x, axis=0)
        pos_e = jnp.take(params["pos_emb"], jnp.arange(S, dtype=jnp.int32), axis=0)
        return run_blocks(tok_e + pos_e[None])
    elif rank == world_size - 1:
        h = run_blocks(x)
        B, S, D = h.shape
        f = params["final"]
        out = _head_math(h.reshape(B * S, D), f["g"], f["b"], f["w_out"], f["c_out"])
        return out.reshape(B, S, -1)
    else:
        return run_blocks(x)


# ----------------------------------------------------------------------------
# Deterministic parameter init (matmul weights bf16, biases / LN params f32).
# The 1/sqrt(head_dim) attention scale is folded into wq/bq at packing time.
# ----------------------------------------------------------------------------
def init_block_params(key, d_model, d_ff, num_heads):
    ks = jax.random.split(key, 6)
    s = 0.02
    f32, bf16 = jnp.float32, jnp.bfloat16
    scale = 1.0 / math.sqrt(d_model // num_heads)

    def w(k, shape, mult=1.0):
        return (jax.random.normal(k, shape, f32) * s * mult).astype(bf16)

    return dict(
        wq=w(ks[0], (d_model, d_model), scale), bq=jnp.zeros((1, d_model), f32),  # bq pre-scaled (zero)
        wk=w(ks[1], (d_model, d_model)), bk=jnp.zeros((1, d_model), f32),
        wv=w(ks[2], (d_model, d_model)), bv=jnp.zeros((1, d_model), f32),
        wo=w(ks[3], (d_model, d_model)), bo=jnp.zeros((1, d_model), f32),
        g1=jnp.ones((1, d_model), f32), b1=jnp.zeros((1, d_model), f32),
        g2=jnp.ones((1, d_model), f32), b2=jnp.zeros((1, d_model), f32),
        w1=w(ks[4], (d_model, d_ff)), c1=jnp.zeros((1, d_ff), f32),
        w2=w(ks[5], (d_ff, d_model)), c2=jnp.zeros((1, d_model), f32),
    )


if __name__ == "__main__":
    # Small but lane-aligned config: D, DFF, V multiples of 128; bt*S flattens to >=128 rows.
    B, S, D, H, DFF, V = 8, 32, 128, 4, 256, 256
    WORLD = 3
    f32 = jnp.float32

    root = jax.random.PRNGKey(0)
    (k_tok, k_emb, k_pos, k_b0a, k_b0b, k_b1a, k_b1b, k_b2a, k_b2b,
     k_out) = jax.random.split(root, 10)

    # Rank 0 stage: [Embedding, PositionalEmbedding, Dropout, Block, Block]
    params0 = dict(
        num_heads=H,
        tok_emb=jax.random.normal(k_emb, (V, D), f32) * 0.02,
        pos_emb=jax.random.normal(k_pos, (S, D), f32) * 0.02,
        blocks=[init_block_params(k_b0a, D, DFF, H), init_block_params(k_b0b, D, DFF, H)],
    )
    # Middle stage: [Block, Block]
    params1 = dict(num_heads=H,
                   blocks=[init_block_params(k_b1a, D, DFF, H),
                           init_block_params(k_b1b, D, DFF, H)])
    # Last stage: [Block, Block, LayerNorm, Linear(D -> V)]
    params2 = dict(
        num_heads=H,
        blocks=[init_block_params(k_b2a, D, DFF, H), init_block_params(k_b2b, D, DFF, H)],
        final=dict(
            g=jnp.ones((1, D), f32), b=jnp.zeros((1, D), f32),
            w_out=(jax.random.normal(k_out, (D, V), f32) * 0.02).astype(jnp.bfloat16),
            c_out=jnp.zeros((1, V), f32),
        ),
    )

    tokens = jax.random.randint(k_tok, (B, S), 0, V, dtype=jnp.int32)

    # Run the three pipeline stages end-to-end (Pallas).
    h0 = pipeline_stage_forward(0, WORLD, tokens, params0, is_causal=True)
    h1 = pipeline_stage_forward(1, WORLD, h0, params1, is_causal=True)
    logits = pipeline_stage_forward(2, WORLD, h1, params2, is_causal=True)
    logits = jax.block_until_ready(logits)

    # Pure-JAX reference (same math, exact softmax reciprocal).
    r0 = ref_stage_forward(0, WORLD, tokens, params0, is_causal=True)
    r1 = ref_stage_forward(1, WORLD, r0, params1, is_causal=True)
    r_logits = ref_stage_forward(2, WORLD, r1, params2, is_causal=True)

    assert h0.shape == (B, S, D)
    assert h1.shape == (B, S, D)
    assert logits.shape == (B, S, V)
    np.testing.assert_allclose(np.asarray(h0, np.float32), np.asarray(r0, np.float32),
                               rtol=2e-2, atol=2e-2)
    np.testing.assert_allclose(np.asarray(logits, np.float32), np.asarray(r_logits, np.float32),
                               rtol=2e-2, atol=2e-2)
    assert bool(jnp.all(jnp.isfinite(logits)))

    print("KERNEL_OK")
</pallas_src>

<mosaic_0001>
module attributes {stable_mosaic.version = 11 : i64} {
  func.func @_stage_kernel(%arg0: i32, %arg1: i32, %arg2: memref<4x32x128xf32, #tpu.memory_space<vmem>>, %arg3: memref<1x128x128xbf16, #tpu.memory_space<vmem>>, %arg4: memref<1x1x128xf32, #tpu.memory_space<vmem>>, %arg5: memref<1x128x128xbf16, #tpu.memory_space<vmem>>, %arg6: memref<1x1x128xf32, #tpu.memory_space<vmem>>, %arg7: memref<1x128x128xbf16, #tpu.memory_space<vmem>>, %arg8: memref<1x1x128xf32, #tpu.memory_space<vmem>>, %arg9: memref<1x128x128xbf16, #tpu.memory_space<vmem>>, %arg10: memref<1x1x128xf32, #tpu.memory_space<vmem>>, %arg11: memref<1x1x128xf32, #tpu.memory_space<vmem>>, %arg12: memref<1x1x128xf32, #tpu.memory_space<vmem>>, %arg13: memref<1x1x128xf32, #tpu.memory_space<vmem>>, %arg14: memref<1x1x128xf32, #tpu.memory_space<vmem>>, %arg15: memref<1x128x256xbf16, #tpu.memory_space<vmem>>, %arg16: memref<1x1x256xf32, #tpu.memory_space<vmem>>, %arg17: memref<1x256x128xbf16, #tpu.memory_space<vmem>>, %arg18: memref<1x1x128xf32, #tpu.memory_space<vmem>>, %arg19: memref<4x32x128xbf16, #tpu.memory_space<vmem>>, %arg20: memref<128x128xf32, #tpu.memory_space<vmem>>) attributes {dimension_semantics = [#tpu.dimension_semantics<parallel>, #tpu.dimension_semantics<arbitrary>], iteration_bounds = array<i64: 2, 2>, scalar_prefetch = 0 : i64, scratch_operands = 1 : i64, tpu.core_type = #tpu.core_type<tc>, window_params = [{transform_indices = @transform_0, window_bounds = array<i64: 4, 32, 128>}, {transform_indices = @transform_1, window_bounds = array<i64: 1, 128, 128>}, {transform_indices = @transform_2, window_bounds = array<i64: 1, 1, 128>}, {transform_indices = @transform_3, window_bounds = array<i64: 1, 128, 128>}, {transform_indices = @transform_4, window_bounds = array<i64: 1, 1, 128>}, {transform_indices = @transform_5, window_bounds = array<i64: 1, 128, 128>}, {transform_indices = @transform_6, window_bounds = array<i64: 1, 1, 128>}, {transform_indices = @transform_7, window_bounds = array<i64: 1, 128, 128>}, {transform_indices = @transform_8, window_bounds = array<i64: 1, 1, 128>}, {transform_indices = @transform_9, window_bounds = array<i64: 1, 1, 128>}, {transform_indices = @transform_10, window_bounds = array<i64: 1, 1, 128>}, {transform_indices = @transform_11, window_bounds = array<i64: 1, 1, 128>}, {transform_indices = @transform_12, window_bounds = array<i64: 1, 1, 128>}, {transform_indices = @transform_13, window_bounds = array<i64: 1, 128, 256>}, {transform_indices = @transform_14, window_bounds = array<i64: 1, 1, 256>}, {transform_indices = @transform_15, window_bounds = array<i64: 1, 256, 128>}, {transform_indices = @transform_16, window_bounds = array<i64: 1, 1, 128>}, {transform_indices = @transform_17, window_bounds = array<i64: 4, 32, 128>}]} {
    %c0_i32 = arith.constant 0 : i32
    %0 = arith.cmpi eq, %arg1, %c0_i32 : i32
    %1 = arith.extui %0 : i1 to i32
    %c0_i32_0 = arith.constant 0 : i32
    %2 = arith.cmpi ne, %1, %c0_i32_0 : i32
    scf.if %2 {
      %c0_80 = arith.constant 0 : index
      %c0_81 = arith.constant 0 : index
      %c0_82 = arith.constant 0 : index
      %201 = vector.load %arg2[%c0_80, %c0_81, %c0_82] : memref<4x32x128xf32, #tpu.memory_space<vmem>>, vector<4x32x128xf32>
      %202 = vector.shape_cast %201 : vector<4x32x128xf32> to vector<128x128xf32>
      %c0_83 = arith.constant 0 : index
      %c0_84 = arith.constant 0 : index
      %203 = vector.load %arg20[%c0_83, %c0_84] : memref<128x128xf32, #tpu.memory_space<vmem>>, vector<128x128xf32>
      tpu.vector_store %arg20[%c0_83, %c0_84], %202 {strides = array<i32>} : memref<128x128xf32, #tpu.memory_space<vmem>>, vector<128x128xf32>,
    } else {
    }
    %c0 = arith.constant 0 : index
    %c0_1 = arith.constant 0 : index
    %3 = vector.load %arg20[%c0, %c0_1] : memref<128x128xf32, #tpu.memory_space<vmem>>, vector<128x128xf32>
    %c0_2 = arith.constant 0 : index
    %c0_3 = arith.constant 0 : index
    %c0_4 = arith.constant 0 : index
    %4 = vector.load %arg3[%c0_2, %c0_3, %c0_4] : memref<1x128x128xbf16, #tpu.memory_space<vmem>>, vector<1x128x128xbf16>
    %5 = vector.shape_cast %4 : vector<1x128x128xbf16> to vector<128x128xbf16>
    %c0_5 = arith.constant 0 : index
    %c0_6 = arith.constant 0 : index
    %c0_7 = arith.constant 0 : index
    %6 = vector.load %arg4[%c0_5, %c0_6, %c0_7] : memref<1x1x128xf32, #tpu.memory_space<vmem>>, vector<1x1x128xf32>
    %7 = vector.shape_cast %6 : vector<1x1x128xf32> to vector<1x128xf32>
    %c0_8 = arith.constant 0 : index
    %c0_9 = arith.constant 0 : index
    %c0_10 = arith.constant 0 : index
    %8 = vector.load %arg5[%c0_8, %c0_9, %c0_10] : memref<1x128x128xbf16, #tpu.memory_space<vmem>>, vector<1x128x128xbf16>
    %9 = vector.shape_cast %8 : vector<1x128x128xbf16> to vector<128x128xbf16>
    %c0_11 = arith.constant 0 : index
    %c0_12 = arith.constant 0 : index
    %c0_13 = arith.constant 0 : index
    %10 = vector.load %arg6[%c0_11, %c0_12, %c0_13] : memref<1x1x128xf32, #tpu.memory_space<vmem>>, vector<1x1x128xf32>
    %11 = vector.shape_cast %10 : vector<1x1x128xf32> to vector<1x128xf32>
    %c0_14 = arith.constant 0 : index
    %c0_15 = arith.constant 0 : index
    %c0_16 = arith.constant 0 : index
    %12 = vector.load %arg7[%c0_14, %c0_15, %c0_16] : memref<1x128x128xbf16, #tpu.memory_space<vmem>>, vector<1x128x128xbf16>
    %13 = vector.shape_cast %12 : vector<1x128x128xbf16> to vector<128x128xbf16>
    %c0_17 = arith.constant 0 : index
    %c0_18 = arith.constant 0 : index
    %c0_19 = arith.constant 0 : index
    %14 = vector.load %arg8[%c0_17, %c0_18, %c0_19] : memref<1x1x128xf32, #tpu.memory_space<vmem>>, vector<1x1x128xf32>
    %15 = vector.shape_cast %14 : vector<1x1x128xf32> to vector<1x128xf32>
    %c0_20 = arith.constant 0 : index
    %c0_21 = arith.constant 0 : index
    %c0_22 = arith.constant 0 : index
    %16 = vector.load %arg9[%c0_20, %c0_21, %c0_22] : memref<1x128x128xbf16, #tpu.memory_space<vmem>>, vector<1x128x128xbf16>
    %17 = vector.shape_cast %16 : vector<1x128x128xbf16> to vector<128x128xbf16>
    %c0_23 = arith.constant 0 : index
    %c0_24 = arith.constant 0 : index
    %c0_25 = arith.constant 0 : index
    %18 = vector.load %arg10[%c0_23, %c0_24, %c0_25] : memref<1x1x128xf32, #tpu.memory_space<vmem>>, vector<1x1x128xf32>
    %19 = vector.shape_cast %18 : vector<1x1x128xf32> to vector<1x128xf32>
    %c0_26 = arith.constant 0 : index
    %c0_27 = arith.constant 0 : index
    %c0_28 = arith.constant 0 : index
    %20 = vector.load %arg11[%c0_26, %c0_27, %c0_28] : memref<1x1x128xf32, #tpu.memory_space<vmem>>, vector<1x1x128xf32>
    %21 = vector.shape_cast %20 : vector<1x1x128xf32> to vector<1x128xf32>
    %c0_29 = arith.constant 0 : index
    %c0_30 = arith.constant 0 : index
    %c0_31 = arith.constant 0 : index
    %22 = vector.load %arg12[%c0_29, %c0_30, %c0_31] : memref<1x1x128xf32, #tpu.memory_space<vmem>>, vector<1x1x128xf32>
    %23 = vector.shape_cast %22 : vector<1x1x128xf32> to vector<1x128xf32>
    %c0_32 = arith.constant 0 : index
    %c0_33 = arith.constant 0 : index
    %c0_34 = arith.constant 0 : index
    %24 = vector.load %arg13[%c0_32, %c0_33, %c0_34] : memref<1x1x128xf32, #tpu.memory_space<vmem>>, vector<1x1x128xf32>
    %25 = vector.shape_cast %24 : vector<1x1x128xf32> to vector<1x128xf32>
    %c0_35 = arith.constant 0 : index
    %c0_36 = arith.constant 0 : index
    %c0_37 = arith.constant 0 : index
    %26 = vector.load %arg14[%c0_35, %c0_36, %c0_37] : memref<1x1x128xf32, #tpu.memory_space<vmem>>, vector<1x1x128xf32>
    %27 = vector.shape_cast %26 : vector<1x1x128xf32> to vector<1x128xf32>
    %c0_38 = arith.constant 0 : index
    %c0_39 = arith.constant 0 : index
    %c0_40 = arith.constant 0 : index
    %28 = vector.load %arg16[%c0_38, %c0_39, %c0_40] : memref<1x1x256xf32, #tpu.memory_space<vmem>>, vector<1x1x256xf32>
    %29 = vector.shape_cast %28 : vector<1x1x256xf32> to vector<1x256xf32>
    %c0_41 = arith.constant 0 : index
    %c0_42 = arith.constant 0 : index
    %c0_43 = arith.constant 0 : index
    %30 = vector.load %arg18[%c0_41, %c0_42, %c0_43] : memref<1x1x128xf32, #tpu.memory_space<vmem>>, vector<1x1x128xf32>
    %31 = vector.shape_cast %30 : vector<1x1x128xf32> to vector<1x128xf32>
    %cst = arith.constant dense<0.000000e+00> : vector<128xf32>
    %32 = vector.multi_reduction <add>, %3, %cst [1] : vector<128x128xf32> to vector<128xf32>
    %33 = vector.shape_cast %32 : vector<128xf32> to vector<128x1xf32>
    %cst_44 = arith.constant 1.280000e+02 : f32
    %34 = vector.broadcast %cst_44 : f32 to vector<128x1xf32>
    %35 = arith.divf %33, %34 : vector<128x1xf32>
    %36 = vector.broadcast %35 : vector<128x1xf32> to vector<128x128xf32>
    %37 = arith.subf %3, %36 : vector<128x128xf32>
    %38 = arith.mulf %37, %37 : vector<128x128xf32>
    %cst_45 = arith.constant dense<0.000000e+00> : vector<128xf32>
    %39 = vector.multi_reduction <add>, %38, %cst_45 [1] : vector<128x128xf32> to vector<128xf32>
    %40 = vector.shape_cast %39 : vector<128xf32> to vector<128x1xf32>
    %cst_46 = arith.constant 1.280000e+02 : f32
    %41 = vector.broadcast %cst_46 : f32 to vector<128x1xf32>
    %42 = arith.divf %40, %41 : vector<128x1xf32>
    %43 = vector.broadcast %35 : vector<128x1xf32> to vector<128x128xf32>
    %44 = arith.subf %3, %43 : vector<128x128xf32>
    %cst_47 = arith.constant 9.99999974E-6 : f32
    %45 = vector.broadcast %cst_47 : f32 to vector<128x1xf32>
    %46 = arith.addf %42, %45 : vector<128x1xf32>
    %47 = math.rsqrt %46 : vector<128x1xf32>
    %48 = vector.broadcast %47 : vector<128x1xf32> to vector<128x128xf32>
    %49 = arith.mulf %44, %48 : vector<128x128xf32>
    %50 = vector.broadcast %21 : vector<1x128xf32> to vector<128x128xf32>
    %51 = arith.mulf %49, %50 : vector<128x128xf32>
    %52 = vector.broadcast %23 : vector<1x128xf32> to vector<128x128xf32>
    %53 = arith.addf %51, %52 : vector<128x128xf32>
    %54 = arith.truncf %53 : vector<128x128xf32> to vector<128x128xbf16>
    %cst_48 = arith.constant dense<0.000000e+00> : vector<128x128xf32>
    %55 = tpu.matmul %54, %5, %cst_48 {dimension_numbers = #tpu.dot_dimension_numbers<[1], [0], [0], [1], [0, 0, 1, 1], [], []>} : vector<128x128xbf16>, vector<128x128xbf16>, vector<128x128xf32> -> vector<128x128xf32>
    %56 = vector.broadcast %7 : vector<1x128xf32> to vector<128x128xf32>
    %57 = arith.addf %55, %56 : vector<128x128xf32>
    %cst_49 = arith.constant dense<0.000000e+00> : vector<128x128xf32>
    %58 = tpu.matmul %54, %9, %cst_49 {dimension_numbers = #tpu.dot_dimension_numbers<[1], [0], [0], [1], [0, 0, 1, 1], [], []>} : vector<128x128xbf16>, vector<128x128xbf16>, vector<128x128xf32> -> vector<128x128xf32>
    %59 = vector.broadcast %11 : vector<1x128xf32> to vector<128x128xf32>
    %60 = arith.addf %58, %59 : vector<128x128xf32>
    %cst_50 = arith.constant dense<0.000000e+00> : vector<128x128xf32>
    %61 = tpu.matmul %54, %13, %cst_50 {dimension_numbers = #tpu.dot_dimension_numbers<[1], [0], [0], [1], [0, 0, 1, 1], [], []>} : vector<128x128xbf16>, vector<128x128xbf16>, vector<128x128xf32> -> vector<128x128xf32>
    %62 = vector.broadcast %15 : vector<1x128xf32> to vector<128x128xf32>
    %63 = arith.addf %61, %62 : vector<128x128xf32>
    %64 = arith.truncf %57 : vector<128x128xf32> to vector<128x128xbf16>
    %65 = arith.truncf %60 : vector<128x128xf32> to vector<128x128xbf16>
    %66 = arith.truncf %63 : vector<128x128xf32> to vector<128x128xbf16>
    %67 = vector.extract_strided_slice %64 {offsets = [0, 0], sizes = [128, 32], strides = [1, 1]} : vector<128x128xbf16> to vector<128x32xbf16>
    %68 = vector.shape_cast %67 : vector<128x32xbf16> to vector<4x1x32x32xbf16>
    %69 = vector.extract_strided_slice %64 {offsets = [0, 32], sizes = [128, 32], strides = [1, 1]} : vector<128x128xbf16> to vector<128x32xbf16>
    %70 = vector.shape_cast %69 : vector<128x32xbf16> to vector<4x1x32x32xbf16>
    %71 = vector.extract_strided_slice %64 {offsets = [0, 64], sizes = [128, 32], strides = [1, 1]} : vector<128x128xbf16> to vector<128x32xbf16>
    %72 = vector.shape_cast %71 : vector<128x32xbf16> to vector<4x1x32x32xbf16>
    %73 = vector.extract_strided_slice %64 {offsets = [0, 96], sizes = [128, 32], strides = [1, 1]} : vector<128x128xbf16> to vector<128x32xbf16>
    %74 = vector.shape_cast %73 : vector<128x32xbf16> to vector<4x1x32x32xbf16>
    %75 = tpu.concatenate %68, %70, %72, %74 in 1 : vector<4x1x32x32xbf16>, vector<4x1x32x32xbf16>, vector<4x1x32x32xbf16>, vector<4x1x32x32xbf16> -> vector<4x4x32x32xbf16>
    %76 = vector.shape_cast %75 : vector<4x4x32x32xbf16> to vector<16x32x32xbf16>
    %77 = vector.extract_strided_slice %65 {offsets = [0, 0], sizes = [128, 32], strides = [1, 1]} : vector<128x128xbf16> to vector<128x32xbf16>
    %78 = vector.shape_cast %77 : vector<128x32xbf16> to vector<4x1x32x32xbf16>
    %79 = vector.extract_strided_slice %65 {offsets = [0, 32], sizes = [128, 32], strides = [1, 1]} : vector<128x128xbf16> to vector<128x32xbf16>
    %80 = vector.shape_cast %79 : vector<128x32xbf16> to vector<4x1x32x32xbf16>
    %81 = vector.extract_strided_slice %65 {offsets = [0, 64], sizes = [128, 32], strides = [1, 1]} : vector<128x128xbf16> to vector<128x32xbf16>
    %82 = vector.shape_cast %81 : vector<128x32xbf16> to vector<4x1x32x32xbf16>
    %83 = vector.extract_strided_slice %65 {offsets = [0, 96], sizes = [128, 32], strides = [1, 1]} : vector<128x128xbf16> to vector<128x32xbf16>
    %84 = vector.shape_cast %83 : vector<128x32xbf16> to vector<4x1x32x32xbf16>
    %85 = tpu.concatenate %78, %80, %82, %84 in 1 : vector<4x1x32x32xbf16>, vector<4x1x32x32xbf16>, vector<4x1x32x32xbf16>, vector<4x1x32x32xbf16> -> vector<4x4x32x32xbf16>
    %86 = vector.shape_cast %85 : vector<4x4x32x32xbf16> to vector<16x32x32xbf16>
    %87 = vector.extract_strided_slice %66 {offsets = [0, 0], sizes = [128, 32], strides = [1, 1]} : vector<128x128xbf16> to vector<128x32xbf16>
    %88 = vector.shape_cast %87 : vector<128x32xbf16> to vector<4x1x32x32xbf16>
    %89 = vector.extract_strided_slice %66 {offsets = [0, 32], sizes = [128, 32], strides = [1, 1]} : vector<128x128xbf16> to vector<128x32xbf16>
    %90 = vector.shape_cast %89 : vector<128x32xbf16> to vector<4x1x32x32xbf16>
    %91 = vector.extract_strided_slice %66 {offsets = [0, 64], sizes = [128, 32], strides = [1, 1]} : vector<128x128xbf16> to vector<128x32xbf16>
    %92 = vector.shape_cast %91 : vector<128x32xbf16> to vector<4x1x32x32xbf16>
    %93 = vector.extract_strided_slice %66 {offsets = [0, 96], sizes = [128, 32], strides = [1, 1]} : vector<128x128xbf16> to vector<128x32xbf16>
    %94 = vector.shape_cast %93 : vector<128x32xbf16> to vector<4x1x32x32xbf16>
    %95 = tpu.concatenate %88, %90, %92, %94 in 1 : vector<4x1x32x32xbf16>, vector<4x1x32x32xbf16>, vector<4x1x32x32xbf16>, vector<4x1x32x32xbf16> -> vector<4x4x32x32xbf16>
    %96 = vector.shape_cast %95 : vector<4x4x32x32xbf16> to vector<16x32x32xbf16>
    "tpu.trace_start"() <{level = 10 : i32, message = "bqd,bkd->bqk"}> : () -> ()
    %cst_51 = arith.constant dense<0.000000e+00> : vector<16x32x32xf32>
    %97 = tpu.matmul %76, %86, %cst_51 {dimension_numbers = #tpu.dot_dimension_numbers<[2], [2], [1], [1], [0, 0, 0, 1, 1, 1], [0], [0]>} : vector<16x32x32xbf16>, vector<16x32x32xbf16>, vector<16x32x32xf32> -> vector<16x32x32xf32>
    "tpu.trace_stop"() : () -> ()
    %98 = tpu.iota {dimensions = array<i32: 0>} : vector<32x32xi32>
    %99 = tpu.iota {dimensions = array<i32: 1>} : vector<32x32xi32>
    %100 = arith.cmpi sle, %99, %98 : vector<32x32xi32>
    %101 = vector.shape_cast %100 : vector<32x32xi1> to vector<1x32x32xi1>
    %cst_52 = arith.constant -1.000000e+30 : f32
    %102 = vector.shape_cast %101 : vector<1x32x32xi1> to vector<1x32x32xi1>
    %103 = vector.broadcast %102 : vector<1x32x32xi1> to vector<16x32x32xi1>
    %104 = vector.broadcast %cst_52 : f32 to vector<16x32x32xf32>
    %105 = arith.select %103, %97, %104 : vector<16x32x32xi1>, vector<16x32x32xf32>
    %cst_53 = arith.constant dense<0xFF800000> : vector<16x32xf32>
    %106 = vector.multi_reduction <maximumf>, %105, %cst_53 [2] : vector<16x32x32xf32> to vector<16x32xf32>
    %107 = vector.shape_cast %106 : vector<16x32xf32> to vector<16x32x1xf32>
    %108 = vector.broadcast %107 : vector<16x32x1xf32> to vector<16x32x32xf32>
    %109 = arith.subf %105, %108 : vector<16x32x32xf32>
    %110 = math.exp %109 : vector<16x32x32xf32>
    %cst_54 = arith.constant dense<0.000000e+00> : vector<16x32xf32>
    %111 = vector.multi_reduction <add>, %110, %cst_54 [2] : vector<16x32x32xf32> to vector<16x32xf32>
    %112 = vector.shape_cast %111 : vector<16x32xf32> to vector<16x32x1xf32>
    %113 = tpu.reciprocal %112 {approx = true} : vector<16x32x1xf32> -> vector<16x32x1xf32>
    %114 = vector.broadcast %113 : vector<16x32x1xf32> to vector<16x32x32xf32>
    %115 = arith.mulf %110, %114 : vector<16x32x32xf32>
    %116 = arith.truncf %115 : vector<16x32x32xf32> to vector<16x32x32xbf16>
    "tpu.trace_start"() <{level = 10 : i32, message = "bqk,bkd->bqd"}> : () -> ()
    %cst_55 = arith.constant dense<0.000000e+00> : vector<16x32x32xf32>
    %117 = tpu.matmul %116, %96, %cst_55 {dimension_numbers = #tpu.dot_dimension_numbers<[2], [1], [1], [2], [0, 0, 0, 1, 1, 2], [0], [0]>} : vector<16x32x32xbf16>, vector<16x32x32xbf16>, vector<16x32x32xf32> -> vector<16x32x32xf32>
    "tpu.trace_stop"() : () -> ()
    %118 = vector.shape_cast %117 : vector<16x32x32xf32> to vector<4x4x32x32xf32>
    %119 = vector.extract_strided_slice %118 {offsets = [0, 0, 0, 0], sizes = [4, 1, 32, 32], strides = [1, 1, 1, 1]} : vector<4x4x32x32xf32> to vector<4x1x32x32xf32>
    %120 = vector.shape_cast %119 : vector<4x1x32x32xf32> to vector<4x32x32xf32>
    %121 = vector.shape_cast %120 : vector<4x32x32xf32> to vector<128x32xf32>
    %122 = arith.truncf %121 : vector<128x32xf32> to vector<128x32xbf16>
    %123 = vector.extract_strided_slice %17 {offsets = [0, 0], sizes = [32, 128], strides = [1, 1]} : vector<128x128xbf16> to vector<32x128xbf16>
    %cst_56 = arith.constant dense<0.000000e+00> : vector<128x128xf32>
    %124 = tpu.matmul %122, %123, %cst_56 {dimension_numbers = #tpu.dot_dimension_numbers<[1], [0], [0], [1], [0, 0, 1, 1], [], []>} : vector<128x32xbf16>, vector<32x128xbf16>, vector<128x128xf32> -> vector<128x128xf32>
    %125 = vector.extract_strided_slice %118 {offsets = [0, 1, 0, 0], sizes = [4, 1, 32, 32], strides = [1, 1, 1, 1]} : vector<4x4x32x32xf32> to vector<4x1x32x32xf32>
    %126 = vector.shape_cast %125 : vector<4x1x32x32xf32> to vector<4x32x32xf32>
    %127 = vector.shape_cast %126 : vector<4x32x32xf32> to vector<128x32xf32>
    %128 = arith.truncf %127 : vector<128x32xf32> to vector<128x32xbf16>
    %129 = vector.extract_strided_slice %17 {offsets = [32, 0], sizes = [32, 128], strides = [1, 1]} : vector<128x128xbf16> to vector<32x128xbf16>
    %cst_57 = arith.constant dense<0.000000e+00> : vector<128x128xf32>
    %130 = tpu.matmul %128, %129, %cst_57 {dimension_numbers = #tpu.dot_dimension_numbers<[1], [0], [0], [1], [0, 0, 1, 1], [], []>} : vector<128x32xbf16>, vector<32x128xbf16>, vector<128x128xf32> -> vector<128x128xf32>
    %131 = arith.addf %124, %130 : vector<128x128xf32>
    %132 = vector.extract_strided_slice %118 {offsets = [0, 2, 0, 0], sizes = [4, 1, 32, 32], strides = [1, 1, 1, 1]} : vector<4x4x32x32xf32> to vector<4x1x32x32xf32>
    %133 = vector.shape_cast %132 : vector<4x1x32x32xf32> to vector<4x32x32xf32>
    %134 = vector.shape_cast %133 : vector<4x32x32xf32> to vector<128x32xf32>
    %135 = arith.truncf %134 : vector<128x32xf32> to vector<128x32xbf16>
    %136 = vector.extract_strided_slice %17 {offsets = [64, 0], sizes = [32, 128], strides = [1, 1]} : vector<128x128xbf16> to vector<32x128xbf16>
    %cst_58 = arith.constant dense<0.000000e+00> : vector<128x128xf32>
    %137 = tpu.matmul %135, %136, %cst_58 {dimension_numbers = #tpu.dot_dimension_numbers<[1], [0], [0], [1], [0, 0, 1, 1], [], []>} : vector<128x32xbf16>, vector<32x128xbf16>, vector<128x128xf32> -> vector<128x128xf32>
    %138 = arith.addf %131, %137 : vector<128x128xf32>
    %139 = vector.extract_strided_slice %118 {offsets = [0, 3, 0, 0], sizes = [4, 1, 32, 32], strides = [1, 1, 1, 1]} : vector<4x4x32x32xf32> to vector<4x1x32x32xf32>
    %140 = vector.shape_cast %139 : vector<4x1x32x32xf32> to vector<4x32x32xf32>
    %141 = vector.shape_cast %140 : vector<4x32x32xf32> to vector<128x32xf32>
    %142 = arith.truncf %141 : vector<128x32xf32> to vector<128x32xbf16>
    %143 = vector.extract_strided_slice %17 {offsets = [96, 0], sizes = [32, 128], strides = [1, 1]} : vector<128x128xbf16> to vector<32x128xbf16>
    %cst_59 = arith.constant dense<0.000000e+00> : vector<128x128xf32>
    %144 = tpu.matmul %142, %143, %cst_59 {dimension_numbers = #tpu.dot_dimension_numbers<[1], [0], [0], [1], [0, 0, 1, 1], [], []>} : vector<128x32xbf16>, vector<32x128xbf16>, vector<128x128xf32> -> vector<128x128xf32>
    %145 = arith.addf %138, %144 : vector<128x128xf32>
    %146 = arith.addf %3, %145 : vector<128x128xf32>
    %147 = vector.broadcast %19 : vector<1x128xf32> to vector<128x128xf32>
    %148 = arith.addf %146, %147 : vector<128x128xf32>
    %cst_60 = arith.constant dense<0.000000e+00> : vector<128xf32>
    %149 = vector.multi_reduction <add>, %148, %cst_60 [1] : vector<128x128xf32> to vector<128xf32>
    %150 = vector.shape_cast %149 : vector<128xf32> to vector<128x1xf32>
    %cst_61 = arith.constant 1.280000e+02 : f32
    %151 = vector.broadcast %cst_61 : f32 to vector<128x1xf32>
    %152 = arith.divf %150, %151 : vector<128x1xf32>
    %153 = vector.broadcast %152 : vector<128x1xf32> to vector<128x128xf32>
    %154 = arith.subf %148, %153 : vector<128x128xf32>
    %155 = arith.mulf %154, %154 : vector<128x128xf32>
    %cst_62 = arith.constant dense<0.000000e+00> : vector<128xf32>
    %156 = vector.multi_reduction <add>, %155, %cst_62 [1] : vector<128x128xf32> to vector<128xf32>
    %157 = vector.shape_cast %156 : vector<128xf32> to vector<128x1xf32>
    %cst_63 = arith.constant 1.280000e+02 : f32
    %158 = vector.broadcast %cst_63 : f32 to vector<128x1xf32>
    %159 = arith.divf %157, %158 : vector<128x1xf32>
    %160 = vector.broadcast %152 : vector<128x1xf32> to vector<128x128xf32>
    %161 = arith.subf %148, %160 : vector<128x128xf32>
    %cst_64 = arith.constant 9.99999974E-6 : f32
    %162 = vector.broadcast %cst_64 : f32 to vector<128x1xf32>
    %163 = arith.addf %159, %162 : vector<128x1xf32>
    %164 = math.rsqrt %163 : vector<128x1xf32>
    %165 = vector.broadcast %164 : vector<128x1xf32> to vector<128x128xf32>
    %166 = arith.mulf %161, %165 : vector<128x128xf32>
    %167 = vector.broadcast %25 : vector<1x128xf32> to vector<128x128xf32>
    %168 = arith.mulf %166, %167 : vector<128x128xf32>
    %169 = vector.broadcast %27 : vector<1x128xf32> to vector<128x128xf32>
    %170 = arith.addf %168, %169 : vector<128x128xf32>
    %171 = arith.truncf %170 : vector<128x128xf32> to vector<128x128xbf16>
    %c0_65 = arith.constant 0 : index
    %c0_66 = arith.constant 0 : index
    %c0_67 = arith.constant 0 : index
    %172 = vector.load %arg15[%c0_65, %c0_66, %c0_67] : memref<1x128x256xbf16, #tpu.memory_space<vmem>>, vector<1x128x256xbf16>
    %173 = vector.shape_cast %172 : vector<1x128x256xbf16> to vector<128x256xbf16>
    %cst_68 = arith.constant dense<0.000000e+00> : vector<128x256xf32>
    %174 = tpu.matmul %171, %173, %cst_68 {dimension_numbers = #tpu.dot_dimension_numbers<[1], [0], [0], [1], [0, 0, 1, 1], [], []>} : vector<128x128xbf16>, vector<128x256xbf16>, vector<128x256xf32> -> vector<128x256xf32>
    %175 = vector.broadcast %29 : vector<1x256xf32> to vector<128x256xf32>
    %176 = arith.addf %174, %175 : vector<128x256xf32>
    %177 = arith.mulf %176, %176 : vector<128x256xf32>
    %178 = arith.mulf %176, %177 : vector<128x256xf32>
    %cst_69 = arith.constant 4.471500e-02 : f32
    %179 = vector.broadcast %cst_69 : f32 to vector<128x256xf32>
    %180 = arith.mulf %179, %178 : vector<128x256xf32>
    %181 = arith.addf %176, %180 : vector<128x256xf32>
    %cst_70 = arith.constant 0.797884583 : f32
    %182 = vector.broadcast %cst_70 : f32 to vector<128x256xf32>
    %183 = arith.mulf %182, %181 : vector<128x256xf32>
    %184 = math.tanh %183 : vector<128x256xf32>
    %cst_71 = arith.constant 1.000000e+00 : f32
    %185 = vector.broadcast %cst_71 : f32 to vector<128x256xf32>
    %186 = arith.addf %185, %184 : vector<128x256xf32>
    %cst_72 = arith.constant 5.000000e-01 : f32
    %187 = vector.broadcast %cst_72 : f32 to vector<128x256xf32>
    %188 = arith.mulf %187, %186 : vector<128x256xf32>
    %189 = arith.mulf %176, %188 : vector<128x256xf32>
    %190 = arith.truncf %189 : vector<128x256xf32> to vector<128x256xbf16>
    %c0_73 = arith.constant 0 : index
    %c0_74 = arith.constant 0 : index
    %c0_75 = arith.constant 0 : index
    %191 = vector.load %arg17[%c0_73, %c0_74, %c0_75] : memref<1x256x128xbf16, #tpu.memory_space<vmem>>, vector<1x256x128xbf16>
    %192 = vector.shape_cast %191 : vector<1x256x128xbf16> to vector<256x128xbf16>
    %cst_76 = arith.constant dense<0.000000e+00> : vector<128x128xf32>
    %193 = tpu.matmul %190, %192, %cst_76 {dimension_numbers = #tpu.dot_dimension_numbers<[1], [0], [0], [1], [0, 0, 1, 1], [], []>} : vector<128x256xbf16>, vector<256x128xbf16>, vector<128x128xf32> -> vector<128x128xf32>
    %194 = arith.addf %148, %193 : vector<128x128xf32>
    %195 = vector.broadcast %31 : vector<1x128xf32> to vector<128x128xf32>
    %196 = arith.addf %194, %195 : vector<128x128xf32>
    %c0_77 = arith.constant 0 : index
    %c0_78 = arith.constant 0 : index
    %197 = vector.load %arg20[%c0_77, %c0_78] : memref<128x128xf32, #tpu.memory_space<vmem>>, vector<128x128xf32>
    tpu.vector_store %arg20[%c0_77, %c0_78], %196 {strides = array<i32>} : memref<128x128xf32, #tpu.memory_space<vmem>>, vector<128x128xf32>,
    %c1_i32 = arith.constant 1 : i32
    %198 = arith.cmpi eq, %arg1, %c1_i32 : i32
    %199 = arith.extui %198 : i1 to i32
    %c0_i32_79 = arith.constant 0 : i32
    %200 = arith.cmpi ne, %199, %c0_i32_79 : i32
    scf.if %200 {
      %201 = vector.shape_cast %196 : vector<128x128xf32> to vector<4x32x128xf32>
      %202 = arith.truncf %201 : vector<4x32x128xf32> to vector<4x32x128xbf16>
      %c0_80 = arith.constant 0 : index
      %c0_81 = arith.constant 0 : index
      %c0_82 = arith.constant 0 : index
      %203 = vector.load %arg19[%c0_80, %c0_81, %c0_82] : memref<4x32x128xbf16, #tpu.memory_space<vmem>>, vector<4x32x128xbf16>
      tpu.vector_store %arg19[%c0_80, %c0_81, %c0_82], %202 {strides = array<i32>} : memref<4x32x128xbf16, #tpu.memory_space<vmem>>, vector<4x32x128xbf16>,
    } else {
    }
    return
  }
  func.func @transform_0(%arg0: i32, %arg1: i32) -> (i32, i32, i32) {
    %c0_i32 = arith.constant 0 : i32
    %c0_i32_0 = arith.constant 0 : i32
    %c0_i32_1 = arith.constant 0 : i32
    return %arg0, %c0_i32, %c0_i32_0 : i32, i32, i32
  }
  func.func @transform_1(%arg0: i32, %arg1: i32) -> (i32, i32, i32) {
    %c0_i32 = arith.constant 0 : i32
    %c0_i32_0 = arith.constant 0 : i32
    %c0_i32_1 = arith.constant 0 : i32
    return %arg1, %c0_i32, %c0_i32_0 : i32, i32, i32
  }
  func.func @transform_2(%arg0: i32, %arg1: i32) -> (i32, i32, i32) {
    %c0_i32 = arith.constant 0 : i32
    %c0_i32_0 = arith.constant 0 : i32
    %c0_i32_1 = arith.constant 0 : i32
    return %arg1, %c0_i32, %c0_i32_0 : i32, i32, i32
  }
  func.func @transform_3(%arg0: i32, %arg1: i32) -> (i32, i32, i32) {
    %c0_i32 = arith.constant 0 : i32
    %c0_i32_0 = arith.constant 0 : i32
    %c0_i32_1 = arith.constant 0 : i32
    return %arg1, %c0_i32, %c0_i32_0 : i32, i32, i32
  }
  func.func @transform_4(%arg0: i32, %arg1: i32) -> (i32, i32, i32) {
    %c0_i32 = arith.constant 0 : i32
    %c0_i32_0 = arith.constant 0 : i32
    %c0_i32_1 = arith.constant 0 : i32
    return %arg1, %c0_i32, %c0_i32_0 : i32, i32, i32
  }
  func.func @transform_5(%arg0: i32, %arg1: i32) -> (i32, i32, i32) {
    %c0_i32 = arith.constant 0 : i32
    %c0_i32_0 = arith.constant 0 : i32
    %c0_i32_1 = arith.constant 0 : i32
    return %arg1, %c0_i32, %c0_i32_0 : i32, i32, i32
  }
  func.func @transform_6(%arg0: i32, %arg1: i32) -> (i32, i32, i32) {
    %c0_i32 = arith.constant 0 : i32
    %c0_i32_0 = arith.constant 0 : i32
    %c0_i32_1 = arith.constant 0 : i32
    return %arg1, %c0_i32, %c0_i32_0 : i32, i32, i32
  }
  func.func @transform_7(%arg0: i32, %arg1: i32) -> (i32, i32, i32) {
    %c0_i32 = arith.constant 0 : i32
    %c0_i32_0 = arith.constant 0 : i32
    %c0_i32_1 = arith.constant 0 : i32
    return %arg1, %c0_i32, %c0_i32_0 : i32, i32, i32
  }
  func.func @transform_8(%arg0: i32, %arg1: i32) -> (i32, i32, i32) {
    %c0_i32 = arith.constant 0 : i32
    %c0_i32_0 = arith.constant 0 : i32
    %c0_i32_1 = arith.constant 0 : i32
    return %arg1, %c0_i32, %c0_i32_0 : i32, i32, i32
  }
  func.func @transform_9(%arg0: i32, %arg1: i32) -> (i32, i32, i32) {
    %c0_i32 = arith.constant 0 : i32
    %c0_i32_0 = arith.constant 0 : i32
    %c0_i32_1 = arith.constant 0 : i32
    return %arg1, %c0_i32, %c0_i32_0 : i32, i32, i32
  }
  func.func @transform_10(%arg0: i32, %arg1: i32) -> (i32, i32, i32) {
    %c0_i32 = arith.constant 0 : i32
    %c0_i32_0 = arith.constant 0 : i32
    %c0_i32_1 = arith.constant 0 : i32
    return %arg1, %c0_i32, %c0_i32_0 : i32, i32, i32
  }
  func.func @transform_11(%arg0: i32, %arg1: i32) -> (i32, i32, i32) {
    %c0_i32 = arith.constant 0 : i32
    %c0_i32_0 = arith.constant 0 : i32
    %c0_i32_1 = arith.constant 0 : i32
    return %arg1, %c0_i32, %c0_i32_0 : i32, i32, i32
  }
  func.func @transform_12(%arg0: i32, %arg1: i32) -> (i32, i32, i32) {
    %c0_i32 = arith.constant 0 : i32
    %c0_i32_0 = arith.constant 0 : i32
    %c0_i32_1 = arith.constant 0 : i32
    return %arg1, %c0_i32, %c0_i32_0 : i32, i32, i32
  }
  func.func @transform_13(%arg0: i32, %arg1: i32) -> (i32, i32, i32) {
    %c0_i32 = arith.constant 0 : i32
    %c0_i32_0 = arith.constant 0 : i32
    %c0_i32_1 = arith.constant 0 : i32
    return %arg1, %c0_i32, %c0_i32_0 : i32, i32, i32
  }
  func.func @transform_14(%arg0: i32, %arg1: i32) -> (i32, i32, i32) {
    %c0_i32 = arith.constant 0 : i32
    %c0_i32_0 = arith.constant 0 : i32
    %c0_i32_1 = arith.constant 0 : i32
    return %arg1, %c0_i32, %c0_i32_0 : i32, i32, i32
  }
  func.func @transform_15(%arg0: i32, %arg1: i32) -> (i32, i32, i32) {
    %c0_i32 = arith.constant 0 : i32
    %c0_i32_0 = arith.constant 0 : i32
    %c0_i32_1 = arith.constant 0 : i32
    return %arg1, %c0_i32, %c0_i32_0 : i32, i32, i32
  }
  func.func @transform_16(%arg0: i32, %arg1: i32) -> (i32, i32, i32) {
    %c0_i32 = arith.constant 0 : i32
    %c0_i32_0 = arith.constant 0 : i32
    %c0_i32_1 = arith.constant 0 : i32
    return %arg1, %c0_i32, %c0_i32_0 : i32, i32, i32
  }
  func.func @transform_17(%arg0: i32, %arg1: i32) -> (i32, i32, i32) {
    %c0_i32 = arith.constant 0 : i32
    %c0_i32_0 = arith.constant 0 : i32
    %c0_i32_1 = arith.constant 0 : i32
    return %arg0, %c0_i32, %c0_i32_0 : i32, i32, i32
  }
}

</mosaic_0001>

<bundles_post_ra>
// kernel: tpu_custom_call.1
= control target key start
LH: loop header
LB: loop body
LE: loop exit
PB: predicated region body
PF: predicated region fallthrough
CT: control target
= control target key end

     0   :  { %s12005_s0 = inlined_call_operand.hbm [shape: f32[8,32,128], index: 0, kind: input, shape index: {}]   ;;  %s12006_s1 = inlined_call_operand.hbm [shape: bf16[2,128,128], index: 1, kind: input, shape index: {}]   ;;  %s12007_s2 = inlined_call_operand.vmem [shape: f32[2,1,128], index: 2, kind: input, shape index: {}]   ;;  %s12008_s3 = inlined_call_operand.hbm [shape: bf16[2,128,128], index: 3, kind: input, shape index: {}]   ;;  %s12009_s4 = inlined_call_operand.vmem [shape: f32[2,1,128], index: 4, kind: input, shape index: {}]   ;;  %s12010_s5 = inlined_call_operand.hbm [shape: bf16[2,128,128], index: 5, kind: input, shape index: {}]   ;;  %s12011_s6 = inlined_call_operand.vmem [shape: f32[2,1,128], index: 6, kind: input, shape index: {}]   ;;  %s12012_s7 = inlined_call_operand.hbm [shape: bf16[2,128,128], index: 7, kind: input, shape index: {}]   ;;  %s12013_s8 = inlined_call_operand.vmem [shape: f32[2,1,128], index: 8, kind: input, shape index: {}]   ;;  %s12014_s9 = inlined_call_operand.vmem [shape: f32[2,1,128], index: 9, kind: input, shape index: {}]   ;;  %s12015_s10 = inlined_call_operand.vmem [shape: f32[2,1,128], index: 10, kind: input, shape index: {}]   ;;  %s12016_s11 = inlined_call_operand.vmem [shape: f32[2,1,128], index: 11, kind: input, shape index: {}]   ;;  %s12017_s12 = inlined_call_operand.vmem [shape: f32[2,1,128], index: 12, kind: input, shape index: {}]   ;;  %s12018_s13 = inlined_call_operand.hbm [shape: bf16[2,128,256], index: 13, kind: input, shape index: {}]   ;;  %s12019_s14 = inlined_call_operand.vmem [shape: f32[2,1,256], index: 14, kind: input, shape index: {}]   ;;  %s12020_s15 = inlined_call_operand.hbm [shape: bf16[2,256,128], index: 15, kind: input, shape index: {}]   ;;  %s12021_s16 = inlined_call_operand.vmem [shape: f32[2,1,128], index: 16, kind: input, shape index: {}]   ;;  %s12022_s17 = inlined_call_operand.hbm [shape: bf16[8,32,128], index: 17, kind: output, shape index: {}]  }
   0x1   :  { %12156 = sst [smem:[#allocation94_spill]] %s12005_s0 }
   0x2   :  { %12157 = sst [smem:[#allocation95_spill]] %s12006_s1 }
   0x3   :  { %12158 = sst [smem:[#allocation96_spill]] %s12007_s2 }
   0x4   :  { %12159 = sst [smem:[#allocation97_spill]] %s12008_s3 }
   0x5   :  { %12160 = sst [smem:[#allocation98_spill]] %s12009_s4 }
   0x6   :  { %12161 = sst [smem:[#allocation99_spill]] %s12010_s5 }
   0x7   :  { %12162 = sst [smem:[#allocation100_spill]] %s12011_s6 }
   0x8   :  { %12163 = sst [smem:[#allocation101_spill]] %s12012_s7 }
   0x9   :  { %12164 = sst [smem:[#allocation102_spill]] %s12013_s8 }
   0xa   :  { %12165 = sst [smem:[#allocation103_spill]] %s12014_s9 }
   0xb   :  { %12166 = sst [smem:[#allocation104_spill]] %s12015_s10 }
   0xc   :  { %12167 = sst [smem:[#allocation105_spill]] %s12016_s11 }
   0xd   :  { %12168 = sst [smem:[#allocation106_spill]] %s12017_s12 }
   0xe   :  { %12169 = sst [smem:[#allocation107_spill]] %s12018_s13 }
   0xf   :  { %12170 = sst [smem:[#allocation108_spill]] %s12019_s14 }
  0x10   :  { %12171 = sst [smem:[#allocation109_spill]] %s12020_s15 }
  0x11   :  { %12172 = sst [smem:[#allocation110_spill]] %s12021_s16 }
  0x12   :  { %12173 = sst [smem:[#allocation111_spill]] %s12022_s17 }
  0x13   :  { %22 = vsyncpa [#allocation4], 0 }
  0x14   :  { %24 = vsyncpa [#allocation4 + $0x1], 0 }
  0x15   :  { %25 = vsyncpa [#allocation7], 0 }
  0x16   :  { %27 = vsyncpa [#allocation7 + $0x1], 0 }
  0x17   :  { %28 = vsyncpa [#allocation10], 0 }
  0x18   :  { %30 = vsyncpa [#allocation10 + $0x1], 0 }
  0x19   :  { %31 = vsyncpa [#allocation13], 0 }
  0x1a   :  { %33 = vsyncpa [#allocation13 + $0x1], 0 }
  0x1b   :  { %34 = vsyncpa [#allocation5], 0 }
  0x1c   :  { %36 = vsyncpa [#allocation5 + $0x1], 0  ;;  %s8887_s24 = smov 0   ;;  %s8889_s25 = smov 0  }
  0x1d   :  { %s8891_s26 = smov 0   ;;  %s8893_s27 = smov 0  }
  0x1e   :  { %s8895_s28 = smov 0   ;;  %s8897_s29 = smov 0  }
  0x1f   :  { %s8899_s0 = smov 0   ;;  %s8901_s30 = smov 0  }
  0x20   :  { %s8903_s18 = smov 0   ;;  %s8905_s19 = smov 0  }
  0x21   :  { %s8907_s1 = smov 0  }
  0x22 LB: > { %12174 = sst [smem:[#allocation21_spill]] %s8742_s25  ;;  %s51_s20 = sadd.s32 1, %s8770_s18  ;;  %s8778_s1 = sphi %s8907_s1, %s42_s1   ;;  %s8774_s19 = sphi %s8905_s19, %s12449_s19   ;;  %s8770_s18 = sphi %s8903_s18, %s12448_s18   ;;  %s8766_s30 = sphi %s8901_s30, %s12447_s30   ;;  %s8762_s0 = sphi %s8899_s0, %s12446_s0   ;;  %s8758_s29 = sphi %s8897_s29, %s12445_s29   ;;  %s8754_s28 = sphi %s8895_s28, %s12444_s28   ;;  %s8750_s27 = sphi %s8893_s27, %s12443_s27   ;;  %s8746_s26 = sphi %s8891_s26, %s12442_s26   ;;  %s8742_s25 = sphi %s8889_s25, %s12441_s25   ;;  %s8738_s24 = sphi %s8887_s24, %s12440_s24  }
  0x23   : > { %12175 = sst [smem:[#allocation22_spill]] %s8746_s26  ;;  %p12029_p0 = scmp.eq.s32.totalorder %s8778_s1, 0 }
  0x24   : > { %12176 = sst [smem:[#allocation23_spill]] %s8750_s27  ;;  %p8944_p1 = scmp.ge.s32.totalorder %s51_s20, 2 }
  0x25   : > { %12177 = sst [smem:[#allocation24_spill]] %s8754_s28  ;;  %s87_s22 = sadd.s32 1, %s8746_s26 }
  0x26   : > { %12178 = sst [smem:[#allocation25_spill]] %s8758_s29  ;;  %p94_p2 = scmp.ne.s32.totalorder %s8746_s26, %s8742_s25 }
  0x27   : > { %12179 = sst [smem:[#allocation26_spill]] %s8762_s0  ;;  %s12451_s20 = smov (%p8944_p1, %s51_s20), 0 }
  0x28   : > { %12180 = sst [smem:[#allocation27_spill]] %s8766_s30  ;;  %p96_p3 = por %p94_p2, %p12029_p0 }
  0x29   : > { %12181 = sst [smem:[#allocation28_spill]] %s8770_s18  ;;  %s84_s23 = ssub.s32 %s8770_s18, %s12451_s20 }
  0x2a   : > { %12182 = sst [smem:[#allocation29_spill]] %s8774_s19  ;;  %p12028_p4 = scmp.lt.s32.totalorder %s8778_s1, 4 }
  0x2b   : > { %12183 = sst [smem:[#allocation30_spill]] %s8778_s1  ;;  %p85_p5 = scmp.eq.s32.totalorder %s84_s23, 0 }
  0x2c   : > { %s12184_s21 = scalar_select %p8944_p1, 1, 0 }
  0x2d   : > { %12185 = sst [smem:[#allocation31_spill]] %s12451_s20  ;;  %s8961_s17 = sand.u32 1, %s8778_s1  }
  0x2e   : > { %s12027_s30 = sand.u32 1, %s8746_s26   ;;  %s8972_s12 = sshll.u32 %s8770_s18, 10 }
  0x2f   : > { %s8965_s14 = scalar_select %p85_p5, %s8746_s26, %s87_s22  }
  0x30   : > { %s8969_s16 = sshll.u32 %s12027_s30, 6  ;;  %s12187_s9 = sld [smem:[#allocation95_spill]] }
  0x31   : > { %12186 = sst [smem:[#allocation32_spill]] %s8965_s14  ;;  %s566_s23 = scalar_lea.vmem [#allocation6], %s8969_s16 }
  0x32   : > { %s573_s20 = sshll.u32 %s566_s23, 4  ;;  %p8983_p6 = pnand %p12028_p4, %p96_p3  ;;  %s8987_s20 = int_to_ptr.vmem [resolvable:$true] %s573_s20 }
  0x34   : > { %s12188_s22 = scalar_select %p8983_p6, 1, 0 }
  0x35   : > { %p8994_p8 = pneg %p8983_p6 }
  0x36   : > { %s8978_s8 = scalar_lea.hbm %s12187_s9, %s8972_s12  ;;  %s8439_s6 = scalar_lea.hbm %s12187_s9, 2048 }
  0x37   : > { %s8434_s14 = scalar_lea.hbm %s8978_s8, 1024  ;;  %p8440_p11 = scmp.lt.u32.totalorder %s8978_s8, %s12187_s9 }
  0x38   : > { %p8435_p7 = scmp.ne.s32.totalorder %s8978_s8, %s8434_s14  ;;  %p8441_p12 = scmp.lt.u32.totalorder %s8439_s6, %s8434_s14 }
  0x39   : > { %p8443_p2 = scmp.lt.u32.totalorder %s8434_s14, %s8978_s8 }
  0x3a   : > { %p8437_p9 = pnand %p8994_p8, %p8435_p7  ;;  %p8442_p13 = por %p8441_p12, %p8440_p11 }
  0x3c   : > { %p8438_p10 = pneg %p8437_p9  ;;  %p8444_p3 = por %p8443_p2, %p8442_p13 }
  0x3e   : > { %p8445_p5 = pnand %p8444_p3, %p8438_p10 }
  0x40   : > { %8448 = shalt.err (!%p8445_p5)
}
  0x41   : > { %s8449_s30 = scalar_lea.vmem %s8987_s20, 1024  ;;  %s8780_s11 = smov [#allocation6]  }
  0x42   : > { %p8450_p7 = scmp.ne.s32.totalorder %s8987_s20, %s8449_s30  ;;  %s8454_s23 = sshll.u32 %s8780_s11, 4  ;;  %s8455_s23 = int_to_ptr.vmem [resolvable:$false] %s8454_s23 }
  0x43   : > { %s8456_s2 = scalar_lea.vmem %s8455_s23, 2048  ;;  %p8457_p0 = scmp.lt.s32.totalorder %s8987_s20, %s8455_s23 }
  0x44   : > { %p8452_p9 = pnand %p8450_p7, %p8994_p8  ;;  %p8458_p1 = scmp.lt.s32.totalorder %s8456_s2, %s8449_s30 }
  0x46   : > { %p8453_p4 = pneg %p8452_p9  ;;  %p8459_p11 = por %p8458_p1, %p8457_p0 }
  0x48   : > { %p8460_p12 = pnand %p8459_p11, %p8453_p4 }
  0x4a   : > { %8463 = shalt.err (!%p8460_p12)
}
  0x4b   : > { %s12033_s4 = smov 64   ;;  %s12035_s6 = smov 4  }
  0x4c   : > { %s12190_s14 = scalar_lea.sflag [#allocation7], %s8961_s17  ;;  %p6753_p0 = scmp.ge.s32.totalorder %s8778_s1, 1 }
  0x4d   : > { %7843 = dma.hbm_to_vmem [thread:$0]  (!%p8983_p6), %s8978_s8, 1024, %s8987_s20, %s12190_s14, %s12033_s4, %s12033_s4, %s12035_s6  }
  0x4e   : > { %p747_p1 = scmp.lt.s32.totalorder %s8778_s1, 5  ;;  %s12193_s5 = sld [smem:[#allocation99_spill]] }
  0x4f   : > { %s620_s9 = scalar_lea.vmem [#allocation9], %s8969_s16  ;;  %s12039_s8 = scalar_lea.sflag [#allocation10], %s8961_s17 }
  0x50   : > { %p9024_p4 = pnand %p6753_p0, %p747_p1  ;;  %s627_s0 = sshll.u32 %s620_s9, 4  ;;  %s9035_s0 = int_to_ptr.vmem [resolvable:$true] %s627_s0 }
  0x52   : > { %s12191_s30 = scalar_select %p9024_p4, 1, 0 }
  0x54   : > { %12192 = sst [smem:[#allocation33_spill]] %s12191_s30  ;;  %s9032_s2 = scalar_lea.hbm %s12193_s5, %s8972_s12 }
  0x55   : > { %s8464_s20 = scalar_lea.hbm %s9032_s2, 1024  ;;  %s8469_s11 = scalar_lea.hbm %s12193_s5, 2048 }
  0x56   : > { %p8465_p10 = scmp.ne.s32.totalorder %s9032_s2, %s8464_s20  ;;  %p8470_p3 = scmp.lt.u32.totalorder %s9032_s2, %s12193_s5 }
  0x57   : > { %p8471_p5 = scmp.lt.u32.totalorder %s8469_s11, %s8464_s20  ;;  %p8473_p9 = scmp.lt.u32.totalorder %s8464_s20, %s9032_s2 }
  0x58   : > { %p8467_p13 = pnand %p8465_p10, %p8994_p8 }
  0x59   : > { %p8472_p7 = por %p8471_p5, %p8470_p3 }
  0x5a   : > { %p8468_p2 = pneg %p8467_p13 }
  0x5b   : > { %p8474_p11 = por %p8473_p9, %p8472_p7 }
  0x5d   : > { %p8475_p12 = pnand %p8474_p11, %p8468_p2 }
  0x5f   : > { %8478 = shalt.err (!%p8475_p12)
}
  0x60   : > { %s8479_s9 = scalar_lea.vmem %s9035_s0, 1024  ;;  %s8783_s4 = smov [#allocation9]  }
  0x61   : > { %p8480_p0 = scmp.ne.s32.totalorder %s9035_s0, %s8479_s9  ;;  %s8484_s14 = sshll.u32 %s8783_s4, 4  ;;  %s8485_s14 = int_to_ptr.vmem [resolvable:$false] %s8484_s14 }
  0x62   : > { %s8486_s6 = scalar_lea.vmem %s8485_s14, 2048  ;;  %p8487_p13 = scmp.lt.s32.totalorder %s9035_s0, %s8485_s14 }
  0x63   : > { %p8482_p1 = pnand %p8480_p0, %p8994_p8  ;;  %p8488_p4 = scmp.lt.s32.totalorder %s8486_s6, %s8479_s9 }
  0x65   : > { %p8483_p10 = pneg %p8482_p1  ;;  %p8489_p3 = por %p8488_p4, %p8487_p13 }
  0x67   : > { %p8490_p5 = pnand %p8489_p3, %p8483_p10 }
  0x69   : > { %8493 = shalt.err (!%p8490_p5)
}
  0x6a   : > { %s12194_s20 = smov 4   ;;  %s12195_s11 = smov 64  }
  0x6b   : > { %7849 = dma.hbm_to_vmem [thread:$0]  (!%p8983_p6), %s9032_s2, 1024, %s9035_s0, %s12039_s8, %s12195_s11, %s12195_s11, %s12194_s20  }
  0x6c   : > { %s12196_s23 = sand.u32 1, %s8746_s26   ;;  %s12040_s4 = sshll.u32 %s8770_s18, 11 }
  0x6d   : > { %s9066_s9 = sshll.u32 %s12196_s23, 7  ;;  %s12197_s13 = sld [smem:[#allocation107_spill]] }
  0x6e   : > { %s698_s30 = scalar_lea.vmem [#allocation12], %s9066_s9  ;;  %s12042_s0 = scalar_lea.sflag [#allocation13], %s8961_s17 }
  0x6f   : > { %s705_s7 = sshll.u32 %s698_s30, 4  ;;  %s9077_s7 = int_to_ptr.vmem [resolvable:$true] %s705_s7 }
  0x73   : > { %s9074_s5 = scalar_lea.hbm %s12197_s13, %s12040_s4  ;;  %s8499_s14 = scalar_lea.hbm %s12197_s13, 4096 }
  0x74   : > { %s8494_s2 = scalar_lea.hbm %s9074_s5, 2048  ;;  %p8500_p9 = scmp.lt.u32.totalorder %s9074_s5, %s12197_s13 }
  0x75   : > { %p8495_p4 = scmp.ne.s32.totalorder %s9074_s5, %s8494_s2  ;;  %p8501_p11 = scmp.lt.u32.totalorder %s8499_s14, %s8494_s2 }
  0x76   : > { %p8503_p0 = scmp.lt.u32.totalorder %s8494_s2, %s9074_s5 }
  0x77   : > { %p8497_p2 = pnand %p8495_p4, %p8994_p8  ;;  %p8502_p12 = por %p8501_p11, %p8500_p9 }
  0x79   : > { %p8498_p7 = pneg %p8497_p2  ;;  %p8504_p1 = por %p8503_p0, %p8502_p12 }
  0x7b   : > { %p8505_p10 = pnand %p8504_p1, %p8498_p7 }
  0x7d   : > { %8508 = shalt.err (!%p8505_p10)
}
  0x7e   : > { %s8509_s30 = scalar_lea.vmem %s9077_s7, 2048  ;;  %s8784_s8 = smov [#allocation12]  }
  0x7f   : > { %p8510_p13 = scmp.ne.s32.totalorder %s9077_s7, %s8509_s30  ;;  %s8514_s23 = sshll.u32 %s8784_s8, 4  ;;  %s8515_s23 = int_to_ptr.vmem [resolvable:$false] %s8514_s23 }
  0x80   : > { %s8516_s4 = scalar_lea.vmem %s8515_s23, 4096  ;;  %p8517_p4 = scmp.lt.s32.totalorder %s9077_s7, %s8515_s23 }
  0x81   : > { %p8512_p3 = pnand %p8510_p13, %p8994_p8  ;;  %p8518_p2 = scmp.lt.s32.totalorder %s8516_s4, %s8509_s30 }
  0x83   : > { %p8513_p5 = pneg %p8512_p3  ;;  %p8519_p9 = por %p8518_p2, %p8517_p4 }
  0x85   : > { %p8520_p11 = pnand %p8519_p9, %p8513_p5 }
  0x87   : > { %8523 = shalt.err (!%p8520_p11)
}
  0x88   : > { %s12043_s2 = smov 128   ;;  %s12044_s14 = smov 8  }
  0x89   : > { %7855 = dma.hbm_to_vmem [thread:$0]  (!%p8983_p6), %s9074_s5, 2048, %s9077_s7, %s12042_s0, %s12043_s2, %s12043_s2, %s12044_s14  }
  0x8a   : > { %p100_p7 = scmp.ne.s32.totalorder %s8742_s25, %s8738_s24  ;;  %s12198_s6 = sshll.u32 %s8770_s18, 11 }
  0x8b   : > { %s12199_s15 = sld [smem:[#allocation109_spill]]  ;;  %s726_s4 = scalar_lea.vmem [#allocation14], %s9066_s9 }
  0x8c   : > { %s9116_s13 = sshll.u32 %s726_s4, 4  ;;  %s9119_s26 = sadd.s32 4294967295, %s8778_s1   ;;  %s9261_s13 = int_to_ptr.vmem [resolvable:$true] %s9116_s13 }
  0x8d   : > { %12200 = sst [smem:[#allocation34_spill]] %s9119_s26  ;;  %s6728_s5 = sadd.s32 4294967294, %s8778_s1  }
  0x8e   : > { %s54_s7 = sadd.s32 1, %s8774_s19  ;;  %p12201_p12 = scmp.ne.s32.totalorder %s12184_s21, 0 }
  0x8f   : > { %s61_s0 = sadd.s32 1, %s8758_s29  ;;  %p68_p0 = scmp.ne.s32.totalorder %s8758_s29, %s8754_s28 }
  0x90   : > { %s12453_s7 = smov (!%p12201_p12, %s54_s7), %s8774_s19  ;;  %p74_p10 = scmp.ne.s32.totalorder %s8754_s28, %s8750_s27 }
  0x91   : > { %s9113_s23 = scalar_lea.hbm %s12199_s15, %s12198_s6  ;;  %p56_p1 = scmp.ge.s32.totalorder %s12453_s7, 2 }
  0x92   : > { %p12202_p13 = scmp.eq.s32.totalorder %s8778_s1, 0  ;;  %p75_p5 = scmp.eq.s32.totalorder %s9119_s26, 0 }
  0x93   : > { %s12455_s7 = smov (%p56_p1, %s12453_s7), 0  ;;  %p514_p9 = scmp.eq.s32.totalorder %s9119_s26, 3 }
  0x94   : > { %p9133_p3 = por %p12202_p13, %p68_p0  ;;  %12204 = sst [smem:[#allocation35_spill]] %s12455_s7 }
  0x95   : > { %p9143_p4 = por %p75_p5, %p74_p10  ;;  %p9150_p2 = por %p100_p7, %p75_p5 }
  0x96   : > { %s58_s30 = ssub.s32 %s8774_s19, %s12455_s7  ;;  %p520_p12 = scmp.eq.s32.totalorder %s6728_s5, 3 }
  0x97   : > { %s12205_s21 = scalar_select %p9143_p4, 1, 0 }
  0x98   : > { %s12206_s6 = scalar_select %p9150_p2, 1, 0 }
  0x99   : > { %p59_p11 = scmp.eq.s32.totalorder %s58_s30, 0  ;;  %p9157_p1 = por %p514_p9, %p68_p0 }
  0x9a   : > { %12207 = sst [smem:[#allocation36_spill]] %s12206_s6  ;;  %s540_s4 = sand.u32 1, %s8758_s29  }
  0x9b   : > { %s12208_s8 = scalar_select %p9157_p1, 1, 0 }
  0x9c   : > { %s9163_s2 = scalar_select %p59_p11, %s8758_s29, %s61_s0  }
  0x9d   : > { %12209 = sst [smem:[#allocation37_spill]] %s12208_s8  ;;  %p9168_p13 = por %p520_p12, %p74_p10 }
  0x9e   : > { %12210 = sst [smem:[#allocation38_spill]] %s9163_s2  ;;  %s6731_s24 = sshll.u32 %s540_s4, 7 }
  0x9f   : > { %s12211_s14 = scalar_select %p9168_p13, 1, 0 }
  0xa0   : > { %s6957_s18 = sshll.u32 %s8774_s19, 11  ;;  %s12213_s7 = sld [smem:[#allocation94_spill]] }
  0xa1   : > { %12212 = sst [smem:[#allocation39_spill]] %s12211_s14  ;;  %s544_s5 = scalar_lea.vmem [#allocation3], %s6731_s24 }
  0xa2   : > { %s552_s30 = sshll.u32 %s544_s5, 4  ;;  %p12214_p7 = scmp.lt.s32.totalorder %s8778_s1, 4  ;;  %s9186_s30 = int_to_ptr.vmem [resolvable:$true] %s552_s30 }
  0xa3   : > { %s12216_s3 = sld [smem:[#allocation97_spill]]  ;;  %s9194_s6 = scalar_lea.sflag [#allocation4], %s540_s4 }
  0xa4   : > { %p9182_p0 = pnand %p12214_p7, %p9133_p3 }
  0xa6   : > { %s9176_s26 = scalar_lea.hbm %s12213_s7, %s6957_s18  ;;  %p8526_p5 = pneg %p9182_p0 }
  0xa7   : > { %s8524_s2 = scalar_lea.hbm %s9176_s26, 2048  ;;  %s8529_s5 = scalar_lea.hbm %s12213_s7, 4096 }
  0xa8   : > { %p8525_p10 = scmp.ne.s32.totalorder %s9176_s26, %s8524_s2  ;;  %p8530_p11 = scmp.lt.u32.totalorder %s9176_s26, %s12213_s7 }
  0xa9   : > { %s9192_s18 = scalar_lea.hbm %s12216_s3, %s8972_s12  ;;  %p8531_p12 = scmp.lt.u32.totalorder %s8529_s5, %s8524_s2 }
  0xaa   : > { %p8527_p3 = pnand %p8526_p5, %p8525_p10  ;;  %p8533_p13 = scmp.lt.u32.totalorder %s8524_s2, %s9176_s26 }
  0xab   : > { %p8532_p7 = por %p8531_p12, %p8530_p11 }
  0xac   : > { %p8528_p9 = pneg %p8527_p3 }
  0xad   : > { %p8534_p1 = por %p8533_p13, %p8532_p7 }
  0xaf   : > { %p8535_p2 = pnand %p8534_p1, %p8528_p9 }
  0xb1   : > { %8538 = shalt.err (!%p8535_p2)
}
  0xb2   : > { %s8539_s19 = scalar_lea.vmem %s9186_s30, 2048  ;;  %s8787_s4 = smov [#allocation3]  }
  0xb3   : > { %p8540_p10 = scmp.ne.s32.totalorder %s9186_s30, %s8539_s19  ;;  %s8544_s25 = sshll.u32 %s8787_s4, 4  ;;  %s8545_s25 = int_to_ptr.vmem [resolvable:$false] %s8544_s25 }
  0xb4   : > { %s8546_s29 = scalar_lea.vmem %s8545_s25, 4096  ;;  %p8547_p6 = scmp.lt.s32.totalorder %s9186_s30, %s8545_s25 }
  0xb5   : > { %p8542_p3 = pnand %p8540_p10, %p8526_p5  ;;  %p8548_p11 = scmp.lt.s32.totalorder %s8546_s29, %s8539_s19 }
  0xb7   : > { %p8543_p4 = pneg %p8542_p3  ;;  %p8549_p12 = por %p8548_p11, %p8547_p6 }
  0xb9   : > { %p8550_p13 = pnand %p8549_p12, %p8543_p4 }
  0xbb   : > { %8553 = shalt.err (!%p8550_p13)
}
  0xbc   : > { %s12217_s2 = smov 8   ;;  %s12218_s14 = smov 128  }
  0xbd   : > { %7840 = dma.hbm_to_vmem [thread:$0]  (!%p9182_p0), %s9176_s26, 2048, %s9186_s30, %s9194_s6, %s12218_s14, %s12218_s14, %s12217_s2  }
  0xbe   : > { %s593_s9 = scalar_lea.vmem [#allocation8], %s8969_s16  ;;  %s12219_s19 = sld [smem:[#allocation101_spill]] }
  0xbf   : > { %s600_s24 = sshll.u32 %s593_s9, 4  ;;  %s8554_s29 = scalar_lea.hbm %s9192_s18, 1024  ;;  %s9226_s24 = int_to_ptr.vmem [resolvable:$true] %s600_s24 }
  0xc0   : > { %p8555_p6 = scmp.ne.s32.totalorder %s9192_s18, %s8554_s29  ;;  %s8559_s1 = scalar_lea.hbm %s12216_s3, 2048 }
  0xc1   : > { %p8560_p1 = scmp.lt.u32.totalorder %s9192_s18, %s12216_s3  ;;  %p8561_p0 = scmp.lt.u32.totalorder %s8559_s1, %s8554_s29 }
  0xc2   : > { %p8557_p4 = pnand %p8555_p6, %p8994_p8  ;;  %p8563_p9 = scmp.lt.u32.totalorder %s8554_s29, %s9192_s18 }
  0xc3   : > { %p8562_p5 = por %p8561_p0, %p8560_p1 }
  0xc4   : > { %s12220_s4 = smov %s12219_s19  ;;  %s9232_s25 = scalar_lea.hbm %s12219_s19, %s8972_s12 }
  0xc5   : > { %p8558_p2 = pneg %p8557_p4  ;;  %p8564_p7 = por %p8563_p9, %p8562_p5 }
  0xc7   : > { %p8565_p10 = pnand %p8564_p7, %p8558_p2 }
  0xc9   : > { %8568 = shalt.err (!%p8565_p10)
}
  0xca   : > { %s8569_s12 = scalar_lea.vmem %s9226_s24, 1024  ;;  %s8788_s27 = smov [#allocation8]  }
  0xcb   : > { %p8570_p3 = scmp.ne.s32.totalorder %s9226_s24, %s8569_s12  ;;  %s8574_s7 = sshll.u32 %s8788_s27, 4  ;;  %s8575_s7 = int_to_ptr.vmem [resolvable:$false] %s8574_s7 }
  0xcc   : > { %s8576_s8 = scalar_lea.vmem %s8575_s7, 2048  ;;  %p8577_p13 = scmp.lt.s32.totalorder %s9226_s24, %s8575_s7 }
  0xcd   : > { %p8572_p11 = pnand %p8570_p3, %p8994_p8  ;;  %p8578_p6 = scmp.lt.s32.totalorder %s8576_s8, %s8569_s12 }
  0xcf   : > { %p8573_p12 = pneg %p8572_p11  ;;  %p8579_p4 = por %p8578_p6, %p8577_p13 }
  0xd1   : > { %p8580_p1 = pnand %p8579_p4, %p8573_p12 }
  0xd3   : > { %8583 = shalt.err (!%p8580_p1)
}
  0xd4   : > { %p12221_p2 = scmp.ne.s32.totalorder %s12188_s22, 0  ;;  %s12222_s1 = scalar_lea.sflag [#allocation7], %s8961_s17 }
  0xd5   : > { %s647_s30 = scalar_lea.vmem [#allocation11], %s8969_s16  ;;  %s8584_s2 = scalar_lea.hbm %s9232_s25, 1024 }
  0xd6   : > { %7846 = dma.hbm_to_vmem [thread:$0]  (!%p12221_p2), %s9192_s18, 1024, %s9226_s24, %s12222_s1, %s12195_s11, %s12195_s11, %s12194_s20  }
  0xd7   : > { %s654_s6 = sshll.u32 %s647_s30, 4  ;;  %p8585_p0 = scmp.ne.s32.totalorder %s9232_s25, %s8584_s2  ;;  %s9264_s6 = int_to_ptr.vmem [resolvable:$true] %s654_s6 }
  0xd8   : > { %s8589_s5 = scalar_lea.hbm %s12220_s4, 2048  ;;  %p8590_p7 = scmp.lt.u32.totalorder %s9232_s25, %s12220_s4 }
  0xd9   : > { %p8587_p5 = pnand %p8585_p0, %p8994_p8  ;;  %p8591_p10 = scmp.lt.u32.totalorder %s8589_s5, %s8584_s2 }
  0xda   : > { %p8593_p11 = scmp.lt.u32.totalorder %s8584_s2, %s9232_s25 }
  0xdb   : > { %p8588_p9 = pneg %p8587_p5  ;;  %p8592_p3 = por %p8591_p10, %p8590_p7 }
  0xdd   : > { %p8594_p12 = por %p8593_p11, %p8592_p3 }
  0xdf   : > { %p8595_p13 = pnand %p8594_p12, %p8588_p9 }
  0xe1   : > { %8598 = shalt.err (!%p8595_p13)
}
  0xe2   : > { %s8599_s16 = scalar_lea.vmem %s9264_s6, 1024  ;;  %s8789_s18 = smov [#allocation11]  }
  0xe3   : > { %p8600_p6 = scmp.ne.s32.totalorder %s9264_s6, %s8599_s16  ;;  %s8604_s24 = sshll.u32 %s8789_s18, 4  ;;  %s8605_s24 = int_to_ptr.vmem [resolvable:$false] %s8604_s24 }
  0xe4   : > { %s8606_s29 = scalar_lea.vmem %s8605_s24, 2048  ;;  %p8607_p0 = scmp.lt.s32.totalorder %s9264_s6, %s8605_s24 }
  0xe5   : > { %p8602_p4 = pnand %p8600_p6, %p8994_p8  ;;  %p8608_p5 = scmp.lt.s32.totalorder %s8606_s29, %s8599_s16 }
  0xe7   : > { %p8603_p1 = pneg %p8602_p4  ;;  %p8609_p7 = por %p8608_p5, %p8607_p0 }
  0xe9   : > { %p8610_p10 = pnand %p8609_p7, %p8603_p1 }
  0xeb   : > { %8613 = shalt.err (!%p8610_p10)
}
  0xec   : > { %s12223_s26 = scalar_lea.sflag [#allocation10], %s8961_s17  ;;  %s8614_s12 = scalar_lea.hbm %s9113_s23, 2048 }
  0xed   : > { %7852 = dma.hbm_to_vmem [thread:$0]  (!%p12221_p2), %s9232_s25, 1024, %s9264_s6, %s12223_s26, %s12195_s11, %s12195_s11, %s12194_s20  }
  0xee   : > { %p8615_p9 = scmp.ne.s32.totalorder %s9113_s23, %s8614_s12  ;;  %s8619_s8 = scalar_lea.hbm %s12199_s15, 4096 }
  0xef   : > { %p8620_p12 = scmp.lt.u32.totalorder %s9113_s23, %s12199_s15  ;;  %p8621_p13 = scmp.lt.u32.totalorder %s8619_s8, %s8614_s12 }
  0xf0   : > { %p8617_p3 = pnand %p8615_p9, %p8994_p8  ;;  %p8623_p4 = scmp.lt.u32.totalorder %s8614_s12, %s9113_s23 }
  0xf1   : > { %p8622_p6 = por %p8621_p13, %p8620_p12 }
  0xf2   : > { %p8618_p11 = pneg %p8617_p3 }
  0xf3   : > { %p8624_p1 = por %p8623_p4, %p8622_p6 }
  0xf5   : > { %p8625_p0 = pnand %p8624_p1, %p8618_p11 }
  0xf7   : > { %8628 = shalt.err (!%p8625_p0)
}
  0xf8   : > { %s8629_s25 = scalar_lea.vmem %s9261_s13, 2048  ;;  %s8790_s6 = smov [#allocation14]  }
  0xf9   : > { %p8630_p5 = scmp.ne.s32.totalorder %s9261_s13, %s8629_s25  ;;  %s8634_s2 = sshll.u32 %s8790_s6, 4  ;;  %s8635_s2 = int_to_ptr.vmem [resolvable:$false] %s8634_s2 }
  0xfa   : > { %s8636_s14 = scalar_lea.vmem %s8635_s2, 4096  ;;  %p8637_p9 = scmp.lt.s32.totalorder %s9261_s13, %s8635_s2 }
  0xfb   : > { %p8632_p7 = pnand %p8630_p5, %p8994_p8  ;;  %p8638_p3 = scmp.lt.s32.totalorder %s8636_s14, %s8629_s25 }
  0xfd   : > { %p8633_p10 = pneg %p8632_p7  ;;  %p8639_p12 = por %p8638_p3, %p8637_p9 }
  0xff   : > { %p8640_p13 = pnand %p8639_p12, %p8633_p10 }
 0x101   : > { %8643 = shalt.err (!%p8640_p13)
}
 0x102   : > { %s12224_s9 = scalar_lea.sflag [#allocation13], %s8961_s17  ;;  %s12225_s10 = sld [smem:[#allocation33_spill]] }
 0x103   : > { %7858 = dma.hbm_to_vmem [thread:$0]  (!%p12221_p2), %s9113_s23, 2048, %s9261_s13, %s12224_s9, %s12195_s11, %s12195_s11, %s12194_s20  }
 0x108   : > { %p12226_p8 = scmp.ne.s32.totalorder %s12225_s10, 0 }
 0x10a   : > { %751 = sbr.rel (%p12226_p8) target bundleno = 3132 (0xc3c), region = 88 }
 0x111   : > { %s9321_s5 = sand.u32 1, %s8754_s28   ;;  %p12228_p11 = scmp.ne.s32.totalorder %s12205_s21, 0 }
 0x112   : > { %12227 = sst [smem:[#allocation40_spill]] %s9321_s5  ;;  %s6754_s0 = sshll.u32 %s9321_s5, 7 }
 0x113   : > { %s754_s19 = scalar_lea.sflag [#allocation4], %s9321_s5  ;;  %s9325_s22 = scalar_lea.vmem [#allocation3], %s6754_s0 }
 0x114   : > { %8717 = dma.done.wait (%p12228_p11), %s754_s19, 2048  }
 0x115   : > { %8719 = vsyncadd (%p12228_p11), %s754_s19, 4294965248  ;;  %s12229_s17 = sld [smem:[#allocation34_spill]]  ;;  %s12230_s13 = sld [smem:[#allocation21_spill]] }
 0x116   : > { %s12231_s20 = sld [smem:[#allocation36_spill]] }
 0x11b   : > { %s762_s11 = sand.u32 1, %s12229_s17   ;;  %s764_s23 = sand.u32 1, %s12230_s13  }
 0x11c   : > { %s6755_s16 = sshll.u32 %s764_s23, 6  ;;  %s763_s18 = scalar_lea.sflag [#allocation7], %s762_s11 }
 0x11d   : > { %s9333_s24 = scalar_lea.vmem [#allocation6], %s6755_s16  ;;  %p12232_p2 = scmp.ne.s32.totalorder %s12231_s20, 0 }
 0x11f   : > { %8721 = dma.done.wait (%p12232_p2), %s763_s18, 2048  }
 0x120   : > { %8723 = vsyncadd (%p12232_p2), %s763_s18, 4294965248  ;;  %s9339_s29 = scalar_lea.vmem [#allocation8], %s6755_s16  ;;  %s781_s26 = scalar_lea.sflag [#allocation10], %s762_s11 }
 0x121   : > { %s9341_s21 = scalar_lea.vmem [#allocation9], %s6755_s16 }
 0x122   : > { %8725 = dma.done.wait (%p12232_p2), %s781_s26, 2048  }
 0x123   : > { %8727 = vsyncadd (%p12232_p2), %s781_s26, 4294965248  ;;  %s6759_s12 = sshll.u32 %s764_s23, 7  ;;  %s9347_s27 = scalar_lea.vmem [#allocation11], %s6755_s16 }
 0x124   : > { %s799_s7 = scalar_lea.sflag [#allocation13], %s762_s11  ;;  %s9349_s8 = scalar_lea.vmem [#allocation12], %s6759_s12 }
 0x125   : > { %12233 = sst [smem:[#allocation41_spill]] %s9349_s8 }
 0x126   : > { %8729 = dma.done.wait (%p12232_p2), %s799_s7, 4096  }
 0x127   : > { %8731 = vsyncadd (%p12232_p2), %s799_s7, 4294963200  ;;  %s12234_s1 = sld [smem:[#allocation26_spill]]  ;;  %s6761_s30 = sshll.u32 %s9321_s5, 6 }
 0x128   : > { %s12239_s3 = sld [smem:[#allocation103_spill]]  ;;  %s12240_s5 = sld [smem:[#allocation104_spill]] }
 0x129   : > { %s12241_s10 = sld [smem:[#allocation105_spill]]  ;;  %s12242_s13 = sld [smem:[#allocation106_spill]] }
 0x12a   : > { %s12243_s18 = sld [smem:[#allocation110_spill]]  ;;  %s9402_s15 = scalar_lea.vmem [#allocation14], %s6759_s12 }
 0x12b   : > { %s9404_s28 = scalar_lea.vmem [#allocation15], %s6761_s30 }
 0x12d   : > { %p924_p6 = scmp.lt.s32.totalorder %s12234_s1, 1  ;;  %p6763_p4 = scmp.ne.s32.totalorder %s12234_s1, 0 }
 0x12e   : > { %v961_v0 = vld [vmem:[%s9325_s22] sm:$0xff] (!%p6763_p4)  ;;  %v962_v1 = vld [vmem:[%s9325_s22 + $0x8] sm:$0xff] (!%p6763_p4)  ;;  %v963_v2 = vld [vmem:[%s9325_s22 + $0x10] sm:$0xff] (!%p6763_p4) }
 0x12f   : > { %s9358_s25 = scalar_select %p924_p6, %s12234_s1, 1 }
 0x130   : > { %977 = vst [vmem:[#allocation2] sm:$0xff] (!%p6763_p4), %v961_v0  ;;  %978 = vst [vmem:[#allocation2 + $0x8] sm:$0xff] (!%p6763_p4), %v962_v1  ;;  %v964_v3 = vld [vmem:[%s9325_s22 + $0x18] sm:$0xff] (!%p6763_p4)  ;;  %v965_v4 = vld [vmem:[%s9325_s22 + $0x20] sm:$0xff] (!%p6763_p4) }
 0x131   : > { %s938_s4 = scalar_lea.vmem %s12239_s3, %s9358_s25  ;;  %s941_s14 = scalar_lea.vmem %s12240_s5, %s9358_s25  ;;  %979 = vst [vmem:[#allocation2 + $0x10] sm:$0xff] (!%p6763_p4), %v963_v2  ;;  %v966_v5 = vld [vmem:[%s9325_s22 + $0x28] sm:$0xff] (!%p6763_p4)  ;;  %980 = vst [vmem:[#allocation2 + $0x18] sm:$0xff] (!%p6763_p4), %v964_v3  ;;  %v967_v6 = vld [vmem:[%s9325_s22 + $0x30] sm:$0xff] (!%p6763_p4) }
 0x132   : > { %s944_s0 = scalar_lea.vmem %s12241_s10, %s9358_s25  ;;  %s947_s20 = scalar_lea.vmem %s12242_s13, %s9358_s25  ;;  %981 = vst [vmem:[#allocation2 + $0x20] sm:$0xff] (!%p6763_p4), %v965_v4  ;;  %982 = vst [vmem:[#allocation2 + $0x28] sm:$0xff] (!%p6763_p4), %v966_v5  ;;  %v968_v7 = vld [vmem:[%s9325_s22 + $0x38] sm:$0xff] (!%p6763_p4)  ;;  %v969_v8 = vld [vmem:[%s9325_s22 + $0x40] sm:$0xff] (!%p6763_p4) }
 0x133   : > { %s6762_s11 = sshll.u32 %s9358_s25, 1  ;;  %s954_s26 = scalar_lea.vmem %s12243_s18, %s9358_s25  ;;  %983 = vst [vmem:[#allocation2 + $0x30] sm:$0xff] (!%p6763_p4), %v967_v6  ;;  %984 = vst [vmem:[#allocation2 + $0x38] sm:$0xff] (!%p6763_p4), %v968_v7  ;;  %v970_v9 = vld [vmem:[%s9325_s22 + $0x48] sm:$0xff] (!%p6763_p4)  ;;  %v971_v10 = vld [vmem:[%s9325_s22 + $0x50] sm:$0xff] (!%p6763_p4) }
 0x134   : > { %s12244_s3 = sld [smem:[#allocation108_spill]]  ;;  %960 = sbr.rel (%p6763_p4) target bundleno = 315 (0x13b), region = 120  ;;  %985 = vst [vmem:[#allocation2 + $0x40] sm:$0xff] (!%p6763_p4), %v969_v8  ;;  %v972_v11 = vld [vmem:[%s9325_s22 + $0x58] sm:$0xff] (!%p6763_p4)  ;;  %986 = vst [vmem:[#allocation2 + $0x48] sm:$0xff] (!%p6763_p4), %v970_v9  ;;  %v973_v12 = vld [vmem:[%s9325_s22 + $0x60] sm:$0xff] (!%p6763_p4) }
 0x135   : > { %987 = vst [vmem:[#allocation2 + $0x50] sm:$0xff] (!%p6763_p4), %v971_v10  ;;  %988 = vst [vmem:[#allocation2 + $0x58] sm:$0xff] (!%p6763_p4), %v972_v11  ;;  %v974_v13 = vld [vmem:[%s9325_s22 + $0x68] sm:$0xff] (!%p6763_p4)  ;;  %v975_v14 = vld [vmem:[%s9325_s22 + $0x70] sm:$0xff] (!%p6763_p4) }
 0x136   : > { %989 = vst [vmem:[#allocation2 + $0x60] sm:$0xff] (!%p6763_p4), %v973_v12  ;;  %990 = vst [vmem:[#allocation2 + $0x68] sm:$0xff] (!%p6763_p4), %v974_v13  ;;  %v976_v15 = vld [vmem:[%s9325_s22 + $0x78] sm:$0xff] (!%p6763_p4) }
 0x137   : > { %991 = vst [vmem:[#allocation2 + $0x70] sm:$0xff] (!%p6763_p4), %v975_v14  ;;  %992 = vst [vmem:[#allocation2 + $0x78] sm:$0xff] (!%p6763_p4), %v976_v15 }
 0x13a   : > { %s9400_s2 = scalar_lea.vmem %s12244_s3, %s6762_s11 }
 0x13b PF: > { %v993_v16 = vld [vmem:[#allocation2] sm:$0xff]  ;;  %v995_v17 = vld [vmem:[#allocation2 + $0x10] sm:$0xff]  ;;  %v994_v18 = vld [vmem:[#allocation2 + $0x8] sm:$0xff]  ;;  %s12247_s1 = sld [smem:[#allocation96_spill]]  ;;  %s12249_s23 = sld [smem:[#allocation98_spill]]  ;;  %vm1981_vm0 = vcmask 261120  }
 0x13c   : > { %1083 = vadd.xlane.f32.xlu0 %v993_v16  ;;  %1087 = vadd.xlane.f32.xlu1 %v995_v17  ;;  %v996_v19 = vld [vmem:[#allocation2 + $0x18] sm:$0xff]  ;;  %v997_v20 = vld [vmem:[#allocation2 + $0x20] sm:$0xff]  ;;  %v998_v21 = vld [vmem:[#allocation2 + $0x28] sm:$0xff]  ;;  %s8792_s10 = smov 32   ;;  %s8793_s19 = smov 64  }
 0x13d   : > { %v999_v22 = vld [vmem:[#allocation2 + $0x30] sm:$0xff]  ;;  %v9423_v23 = vld [vmem:[#allocation2 + $0x38] sm:$0xff]  ;;  %v9425_v24 = vld [vmem:[#allocation2 + $0x40] sm:$0xff]  ;;  %s12251_s16 = sld [smem:[#allocation100_spill]]  ;;  %s12408_s3 = sld [smem:[#allocation102_spill]] }
 0x13e   : > { %v9427_v25 = vld [vmem:[#allocation2 + $0x48] sm:$0xff]  ;;  %v9430_v26 = vld [vmem:[#allocation2 + $0x50] sm:$0xff]  ;;  %v9432_v27 = vld [vmem:[#allocation2 + $0x58] sm:$0xff]  ;;  %s12413_s22 = sld [smem:[#allocation41_spill]] }
 0x13f   : > { %v7962_v28 = vld [vmem:[%s9333_s24] sm:$0xff]   ;;  %v9461_v55 = vld [vmem:[#allocation2 + $0x70] sm:$0xff]  ;;  %v9463_v56 = vld [vmem:[#allocation2 + $0x68] sm:$0xff] }
 0x140   : > { %1085 = vadd.xlane.f32.xlu0 %v994_v18  ;;  %1089 = vadd.xlane.f32.xlu1 %v996_v19  ;;  %v7963_v29 = vld [vmem:[%s9339_s29] sm:$0xff]   ;;  %v9473_v0 = vld [vmem:[#allocation2 + $0x78] sm:$0xff]  ;;  %v7964_v4 = vld [vmem:[%s9333_s24 + $0x8] sm:$0xff]  }
 0x141   : > { %7309 = vmatprep.subr.bf16.mxu0 %v7962_v28  ;;  %7341 = vmatprep.subr.bf16.mxu1 %v7963_v29  ;;  %v9456_v49 = vld [vmem:[#allocation2 + $0x60] sm:$0xff]  ;;  %v7965_v5 = vld [vmem:[%s9339_s29 + $0x8] sm:$0xff]   ;;  %s12248_s30 = scalar_lea.vmem %s12247_s1, %s9358_s25  ;;  %s12250_s7 = scalar_lea.vmem %s12249_s23, %s9358_s25 }
 0x142   : > { %7310 = vmatpush3.bf16.msra.mxu0 %v7962_v28  ;;  %7342 = vmatpush3.bf16.msra.mxu1 %v7963_v29  ;;  %v7974_v28 = vld [vmem:[%s9333_s24 + $0x30] sm:$0xff]  }
 0x143   : > { %7311 = vmatprep.subr.bf16.mxu0 %v7964_v4  ;;  %7343 = vmatprep.subr.bf16.mxu1 %v7965_v5  ;;  %v7975_v29 = vld [vmem:[%s9339_s29 + $0x30] sm:$0xff]   ;;  %s12252_s18 = scalar_lea.vmem %s12251_s16, %s9358_s25  ;;  %s12409_s5 = scalar_lea.vmem %s12408_s3, %s9358_s25 }
 0x144   : > { %1091 = vadd.xlane.f32.xlu0 %v997_v20  ;;  %1093 = vadd.xlane.f32.xlu1 %v998_v21  ;;  %s12430_s25 = sld [smem:[#allocation26_spill]] }
 0x146   : > { %7312 = vmatpush3.bf16.msra.mxu0 %v7964_v4  ;;  %7344 = vmatpush3.bf16.msra.mxu1 %v7965_v5 }
 0x148   : > { %1095 = vadd.xlane.f32.xlu0 %v999_v22  ;;  %1097 = vadd.xlane.f32.xlu1 %v9423_v23 }
 0x14a   : > { %p6933_p1 = scmp.ne.s32.totalorder %s12430_s25, 1 }
 0x14c   : > { %1099 = vadd.xlane.f32.xlu0 %v9425_v24  ;;  %1101 = vadd.xlane.f32.xlu1 %v9427_v25 }
 0x150   : > { %1103 = vadd.xlane.f32.xlu0 %v9430_v26  ;;  %1105 = vadd.xlane.f32.xlu1 %v9432_v27 }
 0x1c9   : > { %v1084_v30 = vpop.xlane.xlu0 %1083  ;;  %v1088_v31 = vpop.xlane.xlu1 %1087 }
 0x1ca   : > { %v1116_v32 = vmul.f32 0.0078125, %v1084_v30  ;;  %v1118_v33 = vmul.f32 0.0078125, %v1088_v31  ;;  %v7976_v30 = vld [vmem:[%s9333_s24 + $0x38] sm:$0xff]  }
 0x1cb   : > { %v7977_v31 = vld [vmem:[%s9339_s29 + $0x38] sm:$0xff]  }
 0x1cc   : > { %v9440_v34 = vsub.f32 %v993_v16, %v1116_v32  ;;  %v9442_v35 = vsub.f32 %v995_v17, %v1118_v33  ;;  %v7966_v16 = vld [vmem:[%s9333_s24 + $0x10] sm:$0xff]  }
 0x1cd   : > { %v1086_v36 = vpop.xlane.xlu0 %1085  ;;  %v1090_v37 = vpop.xlane.xlu1 %1089  ;;  %v7967_v17 = vld [vmem:[%s9339_s29 + $0x10] sm:$0xff]   ;;  %7313 = vmatprep.subr.bf16.mxu0 %v7966_v16 }
 0x1ce   : > { %v1117_v38 = vmul.f32 0.0078125, %v1086_v36  ;;  %v1148_v39 = vmul.f32 %v9440_v34, %v9440_v34  ;;  %v1119_v40 = vmul.f32 0.0078125, %v1090_v37  ;;  %v1150_v41 = vmul.f32 %v9442_v35, %v9442_v35  ;;  %7345 = vmatprep.subr.bf16.mxu1 %v7967_v17  ;;  %7314 = vmatpush3.bf16.msra.mxu0 %v7966_v16 }
 0x1cf   : > { %7346 = vmatpush3.bf16.msra.mxu1 %v7967_v17 }
 0x1d0   : > { %1164 = vadd.xlane.f32.xlu0 %v1148_v39  ;;  %v9448_v42 = vsub.f32 %v994_v18, %v1117_v38  ;;  %v9450_v43 = vsub.f32 %v996_v19, %v1119_v40 }
 0x1d1   : > { %v1092_v44 = vpop.xlane.xlu0 %1091  ;;  %v1094_v45 = vpop.xlane.xlu1 %1093 }
 0x1d2   : > { %v1149_v46 = vmul.f32 %v9448_v42, %v9448_v42  ;;  %v1151_v47 = vmul.f32 %v9450_v43, %v9450_v43  ;;  %v1120_v48 = vmul.f32 0.0078125, %v1092_v44  ;;  %v1121_v52 = vmul.f32 0.0078125, %v1094_v45 }
 0x1d4   : > { %1168 = vadd.xlane.f32.xlu0 %v1150_v41  ;;  %1166 = vadd.xlane.f32.xlu1 %v1149_v46  ;;  %v9459_v54 = vsub.f32 %v997_v20, %v1120_v48  ;;  %v9465_v59 = vsub.f32 %v998_v21, %v1121_v52  ;;  %v7968_v21 = vld [vmem:[%s9333_s24 + $0x18] sm:$0xff]  }
 0x1d5   : > { %v1096_v50 = vpop.xlane.xlu0 %1095  ;;  %v1098_v51 = vpop.xlane.xlu1 %1097  ;;  %7315 = vmatprep.subr.bf16.mxu0 %v7968_v21 }
 0x1d6   : > { %v1122_v53 = vmul.f32 0.0078125, %v1096_v50  ;;  %v1123_v58 = vmul.f32 0.0078125, %v1098_v51  ;;  %v1152_v61 = vmul.f32 %v9459_v54, %v9459_v54  ;;  %v1153_v2 = vmul.f32 %v9465_v59, %v9465_v59  ;;  %7316 = vmatpush3.bf16.msra.mxu0 %v7968_v21 }
 0x1d8   : > { %1107 = vadd.xlane.f32.xlu0 %v9456_v49  ;;  %1170 = vadd.xlane.f32.xlu1 %v1151_v47  ;;  %v9471_v63 = vsub.f32 %v999_v22, %v1122_v53  ;;  %v9478_v3 = vsub.f32 %v9423_v23, %v1123_v58  ;;  %v7969_v22 = vld [vmem:[%s9339_s29 + $0x18] sm:$0xff]  }
 0x1d9   : > { %v1100_v57 = vpop.xlane.xlu0 %1099  ;;  %v1102_v60 = vpop.xlane.xlu1 %1101  ;;  %7347 = vmatprep.subr.bf16.mxu1 %v7969_v22 }
 0x1da   : > { %v1124_v62 = vmul.f32 0.0078125, %v1100_v57  ;;  %v1154_v6 = vmul.f32 %v9471_v63, %v9471_v63  ;;  %v1125_v7 = vmul.f32 0.0078125, %v1102_v60  ;;  %v1155_v11 = vmul.f32 %v9478_v3, %v9478_v3  ;;  %7348 = vmatpush3.bf16.msra.mxu1 %v7969_v22  ;;  %v9554_v22 = vld [vmem:[%s941_s14] ss:$0 sm:$0xff]  ;;  %s8791_s14 = smov 96  }
 0x1dc   : > { %1111 = vadd.xlane.f32.xlu0 %v9461_v55  ;;  %1109 = vadd.xlane.f32.xlu1 %v9463_v56  ;;  %v9486_v9 = vsub.f32 %v9425_v24, %v1124_v62  ;;  %v9493_v14 = vsub.f32 %v9427_v25, %v1125_v7  ;;  %v7970_v24 = vld [vmem:[%s9333_s24 + $0x20] sm:$0xff]  }
 0x1dd   : > { %v1104_v1 = vpop.xlane.xlu0 %1103  ;;  %v1106_v10 = vpop.xlane.xlu1 %1105  ;;  %v7971_v25 = vld [vmem:[%s9339_s29 + $0x20] sm:$0xff]   ;;  %7317 = vmatprep.subr.bf16.mxu0 %v7970_v24 }
 0x1de   : > { %v1126_v8 = vmul.f32 0.0078125, %v1104_v1  ;;  %v1156_v12 = vmul.f32 %v9486_v9, %v9486_v9  ;;  %v1127_v13 = vmul.f32 0.0078125, %v1106_v10  ;;  %v1157_v18 = vmul.f32 %v9493_v14, %v9493_v14  ;;  %7349 = vmatprep.subr.bf16.mxu1 %v7971_v25  ;;  %7318 = vmatpush3.bf16.msra.mxu0 %v7970_v24 }
 0x1df   : > { %7350 = vmatpush3.bf16.msra.mxu1 %v7971_v25 }
 0x1e0   : > { %1113 = vadd.xlane.f32.xlu1 %v9473_v0  ;;  %1172 = vadd.xlane.f32.xlu0 %v1152_v61  ;;  %v9496_v15 = vsub.f32 %v9430_v26, %v1126_v8  ;;  %v9505_v20 = vsub.f32 %v9432_v27, %v1127_v13  ;;  %v7972_v26 = vld [vmem:[%s9333_s24 + $0x28] sm:$0xff]  }
 0x1e1   : > { %v7973_v27 = vld [vmem:[%s9339_s29 + $0x28] sm:$0xff]   ;;  %7319 = vmatprep.subr.bf16.mxu0 %v7972_v26 }
 0x1e2   : > { %v1158_v19 = vmul.f32 %v9496_v15, %v9496_v15  ;;  %v1159_v23 = vmul.f32 %v9505_v20, %v9505_v20  ;;  %7351 = vmatprep.subr.bf16.mxu1 %v7973_v27  ;;  %7320 = vmatpush3.bf16.msra.mxu0 %v7972_v26 }
 0x1e3   : > { %7352 = vmatpush3.bf16.msra.mxu1 %v7973_v27  ;;  %7321 = vmatprep.subr.bf16.mxu0 %v7974_v28 }
 0x1e4   : > { %1174 = vadd.xlane.f32.xlu1 %v1153_v2  ;;  %1176 = vadd.xlane.f32.xlu0 %v1154_v6 }
 0x1e5   : > { %7353 = vmatprep.subr.bf16.mxu1 %v7975_v29 }
 0x1e6   : > { %7322 = vmatpush3.bf16.msra.mxu0 %v7974_v28 }
 0x1e7   : > { %7354 = vmatpush3.bf16.msra.mxu1 %v7975_v29  ;;  %7323 = vmatprep.subr.bf16.mxu0 %v7976_v30 }
 0x1e8   : > { %1178 = vadd.xlane.f32.xlu1 %v1155_v11  ;;  %1180 = vadd.xlane.f32.xlu0 %v1156_v12 }
 0x1e9   : > { %7355 = vmatprep.subr.bf16.mxu1 %v7977_v31 }
 0x1ea   : > { %7324 = vmatpush3.bf16.msra.mxu0 %v7976_v30 }
 0x1eb   : > { %7356 = vmatpush3.bf16.msra.mxu1 %v7977_v31 }
 0x1ec   : > { %1182 = vadd.xlane.f32.xlu1 %v1157_v18  ;;  %1184 = vadd.xlane.f32.xlu0 %v1158_v19 }
 0x1f0   : > { %1186 = vadd.xlane.f32.xlu1 %v1159_v23 }
 0x25d   : > { %v1165_v32 = vpop.xlane.xlu0 %1164 }
 0x25e   : > { %v1196_v33 = vmul.f32 0.0078125, %v1165_v32 }
 0x260   : > { %v1212_v36 = vadd.f32 1e-05, %v1196_v33 }
 0x261   : > { %v1167_v37 = vpop.xlane.xlu1 %1166  ;;  %v1169_v38 = vpop.xlane.xlu0 %1168 }
 0x262   : > { %8034 = vrsqrt.f32 %v1212_v36  ;;  %v1197_v39 = vmul.f32 0.0078125, %v1167_v37  ;;  %v1198_v40 = vmul.f32 0.0078125, %v1169_v38 }
 0x264   : > { %v1213_v41 = vadd.f32 1e-05, %v1197_v39  ;;  %v1214_v44 = vadd.f32 1e-05, %v1198_v40 }
 0x265   : > { %v1171_v45 = vpop.xlane.xlu1 %1170  ;;  %v1108_v46 = vpop.xlane.xlu0 %1107 }
 0x266   : > { %8036 = vrsqrt.f32 %v1213_v41  ;;  %v1199_v47 = vmul.f32 0.0078125, %v1171_v45  ;;  %v1128_v48 = vmul.f32 0.0078125, %v1108_v46 }
 0x267   : > { %8038 = vrsqrt.f32 %v1214_v44 }
 0x268   : > { %v1215_v50 = vadd.f32 1e-05, %v1199_v47  ;;  %v9520_v51 = vsub.f32 %v9456_v49, %v1128_v48 }
 0x269   : > { %v1110_v52 = vpop.xlane.xlu1 %1109  ;;  %v1112_v53 = vpop.xlane.xlu0 %1111 }
 0x26a   : > { %8040 = vrsqrt.f32 %v1215_v50  ;;  %v1129_v57 = vmul.f32 0.0078125, %v1110_v52  ;;  %v1130_v58 = vmul.f32 0.0078125, %v1112_v53  ;;  %v1160_v60 = vmul.f32 %v9520_v51, %v9520_v51 }
 0x26c   : > { %v8035_v61 = vpop.eup %8034  ;;  %1188 = vadd.xlane.f32.xlu0 %v1160_v60  ;;  %v9525_v62 = vsub.f32 %v9463_v56, %v1129_v57  ;;  %v9528_v1 = vsub.f32 %v9461_v55, %v1130_v58  ;;  %v9540_v56 = vld [vmem:[%s938_s4] ss:$0 sm:$0xff] }
 0x26d   : > { %v1114_v2 = vpop.xlane.xlu1 %1113  ;;  %v1173_v49 = vpop.xlane.xlu0 %1172  ;;  %v1244_v4 = vmul.f32 %v8035_v61, %v9440_v34 }
 0x26e   : > { %v1131_v5 = vmul.f32 0.0078125, %v1114_v2  ;;  %v1200_v6 = vmul.f32 0.0078125, %v1173_v49  ;;  %v1161_v7 = vmul.f32 %v9525_v62, %v9525_v62  ;;  %v1162_v8 = vmul.f32 %v9528_v1, %v9528_v1 }
 0x26f   : > { %v1266_v17 = vmul.f32 %v9540_v56, %v1244_v4  ;;  %v7978_v4 = vld [vmem:[%s9341_s21] sm:$0xff]  }
 0x270   : > { %v8037_v55 = vpop.eup %8036  ;;  %v1216_v10 = vadd.f32 1e-05, %v1200_v6  ;;  %1190 = vadd.xlane.f32.xlu1 %v1161_v7  ;;  %1192 = vadd.xlane.f32.xlu0 %v1162_v8  ;;  %v9543_v34 = vsub.f32 %v9473_v0, %v1131_v5 }
 0x271   : > { %v8039_v11 = vpop.eup %8038  ;;  %v1175_v12 = vpop.xlane.xlu1 %1174  ;;  %v1245_v16 = vmul.f32 %v8037_v55, %v9448_v42  ;;  %v1288_v28 = vadd.f32 %v9554_v22, %v1266_v17  ;;  %7373 = vmatprep.subr.bf16.mxu0 %v7978_v4 }
 0x272   : > { %v1177_v13 = vpop.xlane.xlu0 %1176  ;;  %8042 = vrsqrt.f32 %v1216_v10  ;;  %v1201_v18 = vmul.f32 0.0078125, %v1175_v12  ;;  %v1163_v21 = vmul.f32 %v9543_v34, %v9543_v34  ;;  %v1246_v23 = vmul.f32 %v8039_v11, %v9442_v35  ;;  %v7979_v11 = vld [vmem:[%s9341_s21 + $0x8] sm:$0xff]  }
 0x273   : > { %v1202_v19 = vmul.f32 0.0078125, %v1177_v13  ;;  %v1267_v0 = vmul.f32 %v9540_v56, %v1245_v16  ;;  %v7980_v13 = vld [vmem:[%s9341_s21 + $0x10] sm:$0xff]  }
 0x274   : > { %v8041_v24 = vpop.eup %8040  ;;  %v1217_v42 = vadd.f32 1e-05, %v1201_v18  ;;  %1194 = vadd.xlane.f32.xlu1 %v1163_v21  ;;  %v1268_v31 = vmul.f32 %v9540_v56, %v1246_v23  ;;  %v7981_v23 = vld [vmem:[%s9341_s21 + $0x18] sm:$0xff]  }
 0x275   : > { %v1218_v25 = vadd.f32 1e-05, %v1202_v19  ;;  %v1179_v26 = vpop.xlane.xlu1 %1178  ;;  %v1289_v29 = vadd.f32 %v9554_v22, %v1267_v0  ;;  %v1247_v30 = vmul.f32 %v8041_v24, %v9450_v43 }
 0x276   : > { %v1181_v27 = vpop.xlane.xlu0 %1180  ;;  %8044 = vrsqrt.f32 %v1217_v42  ;;  %v1203_v32 = vmul.f32 0.0078125, %v1179_v26  ;;  %v1290_v43 = vadd.f32 %v9554_v22, %v1268_v31 }
 0x277   : > { %v1204_v33 = vmul.f32 0.0078125, %v1181_v27  ;;  %8046 = vrsqrt.f32 %v1218_v25  ;;  %v9562_v36 = vpack.c.bf16 %v1289_v29, %v1288_v28  ;;  %v1269_v35 = vmul.f32 %v9540_v56, %v1247_v30  ;;  %v7982_v28 = vld [vmem:[%s9341_s21 + $0x20] sm:$0xff]  }
 0x278   : > { %v1219_v37 = vadd.f32 1e-05, %v1203_v32 }
 0x279   : > { %v1220_v38 = vadd.f32 1e-05, %v1204_v33  ;;  %v1183_v39 = vpop.xlane.xlu1 %1182  ;;  %7325 = vmatprep.mubr.bf16.mxu0 %v9562_v36  ;;  %7357 = vmatprep.mubr.bf16.mxu1 %v9562_v36  ;;  %v1291_v41 = vadd.f32 %v9554_v22, %v1269_v35  ;;  %v7984_v35 = vld [vmem:[%s9341_s21 + $0x30] sm:$0xff]  }
 0x27a   : > { %v1185_v40 = vpop.xlane.xlu0 %1184  ;;  %8048 = vrsqrt.f32 %v1219_v37  ;;  %v1205_v44 = vmul.f32 0.0078125, %v1183_v39  ;;  %v7985_v37 = vld [vmem:[%s9341_s21 + $0x38] sm:$0xff]  }
 0x27b   : > { %v1206_v45 = vmul.f32 0.0078125, %v1185_v40  ;;  %8050 = vrsqrt.f32 %v1220_v38  ;;  %v9569_v46 = vpack.c.bf16 %v1291_v41, %v1290_v43 }
 0x27c   : > { %v8043_v47 = vpop.eup %8042  ;;  %v1221_v48 = vadd.f32 1e-05, %v1205_v44 }
 0x27d   : > { %v1222_v50 = vadd.f32 1e-05, %v1206_v45  ;;  %v1187_v52 = vpop.xlane.xlu1 %1186  ;;  %7326 = vmatmul.mubr.bf16.vlgmr.msra.gmra.mrb[0].mxu0 %v9569_v46  ;;  %7358 = vmatmul.mubr.bf16.vlgmr.msra.gmra.mrb[0].mxu1 %v9569_v46  ;;  %v1248_v53 = vmul.f32 %v8043_v47, %v9459_v54 }
 0x27e   : > { %8052 = vrsqrt.f32 %v1221_v48  ;;  %v1207_v57 = vmul.f32 0.0078125, %v1187_v52  ;;  %7374 = vmatpush3.bf16.msra.mxu0 %v7978_v4 }
 0x27f   : > { %8054 = vrsqrt.f32 %v1222_v50  ;;  %v1270_v49 = vmul.f32 %v9540_v56, %v1248_v53  ;;  %7375 = vmatprep.subr.bf16.mxu0 %v7979_v11 }
 0x280   : > { %v8045_v58 = vpop.eup %8044  ;;  %v1223_v60 = vadd.f32 1e-05, %v1207_v57 }
 0x281   : > { %v8047_v61 = vpop.eup %8046  ;;  %v1249_v2 = vmul.f32 %v8045_v58, %v9465_v59  ;;  %v1292_v8 = vadd.f32 %v9554_v22, %v1270_v49 }
 0x282   : > { %8056 = vrsqrt.f32 %v1223_v60  ;;  %v1250_v5 = vmul.f32 %v8047_v61, %v9471_v63  ;;  %7376 = vmatpush3.bf16.msra.mxu0 %v7979_v11 }
 0x283   : > { %v1271_v6 = vmul.f32 %v9540_v56, %v1249_v2  ;;  %7377 = vmatprep.subr.bf16.mxu0 %v7980_v13 }
 0x284   : > { %v8049_v54 = vpop.eup %8048  ;;  %v1272_v59 = vmul.f32 %v9540_v56, %v1250_v5 }
 0x285   : > { %v8051_v7 = vpop.eup %8050  ;;  %v1293_v55 = vadd.f32 %v9554_v22, %v1271_v6  ;;  %v1251_v10 = vmul.f32 %v8049_v54, %v9478_v3 }
 0x286   : > { %v1252_v12 = vmul.f32 %v8051_v7, %v9486_v9  ;;  %v1294_v3 = vadd.f32 %v9554_v22, %v1272_v59  ;;  %7378 = vmatpush3.bf16.msra.mxu0 %v7980_v13 }
 0x287   : > { %v9586_v63 = vpack.c.bf16 %v1293_v55, %v1292_v8  ;;  %v1273_v16 = vmul.f32 %v9540_v56, %v1251_v10  ;;  %7379 = vmatprep.subr.bf16.mxu0 %v7981_v23 }
 0x288   : > { %v8053_v17 = vpop.eup %8052  ;;  %v1274_v18 = vmul.f32 %v9540_v56, %v1252_v12 }
 0x289   : > { %v8055_v19 = vpop.eup %8054  ;;  %7329 = vmatprep.mubr.bf16.mxu0 %v9586_v63  ;;  %7361 = vmatprep.mubr.bf16.mxu1 %v9586_v63  ;;  %v1295_v9 = vadd.f32 %v9554_v22, %v1273_v16  ;;  %v1253_v21 = vmul.f32 %v8053_v17, %v9493_v14 }
 0x28a   : > { %v1254_v0 = vmul.f32 %v8055_v19, %v9496_v15  ;;  %v1296_v26 = vadd.f32 %v9554_v22, %v1274_v18  ;;  %7380 = vmatpush3.bf16.msra.mxu0 %v7981_v23 }
 0x28b   : > { %v9597_v24 = vpack.c.bf16 %v1295_v9, %v1294_v3  ;;  %v1275_v42 = vmul.f32 %v9540_v56, %v1253_v21  ;;  %7381 = vmatprep.subr.bf16.mxu0 %v7982_v28 }
 0x28c   : > { %v8057_v25 = vpop.eup %8056  ;;  %v1276_v15 = vmul.f32 %v9540_v56, %v1254_v0 }
 0x28d   : > { %7330 = vmatmul.mubr.bf16.gmra.mrb[4].mxu0 %v9597_v24  ;;  %7362 = vmatmul.mubr.bf16.gmra.mrb[4].mxu1 %v9597_v24  ;;  %v1297_v27 = vadd.f32 %v9554_v22, %v1275_v42  ;;  %v1255_v14 = vmul.f32 %v8057_v25, %v9505_v20  ;;  %v7983_v20 = vld [vmem:[%s9341_s21 + $0x28] sm:$0xff]  }
 0x28e   : > { %v1298_v31 = vadd.f32 %v9554_v22, %v1276_v15  ;;  %7382 = vmatpush3.bf16.msra.mxu0 %v7982_v28 }
 0x28f   : > { %v1308_v29 = vpack.c.bf16 %v1297_v27, %v1296_v26  ;;  %v1277_v30 = vmul.f32 %v9540_v56, %v1255_v14  ;;  %7383 = vmatprep.subr.bf16.mxu0 %v7983_v20 }
 0x291   : > { %7333 = vmatprep.mubr.bf16.mxu0 %v1308_v29  ;;  %7365 = vmatprep.mubr.bf16.mxu1 %v1308_v29  ;;  %v1299_v32 = vadd.f32 %v9554_v22, %v1277_v30 }
 0x292   : > { %7384 = vmatpush3.bf16.msra.mxu0 %v7983_v20 }
 0x293   : > { %v1309_v33 = vpack.c.bf16 %v1299_v32, %v1298_v31  ;;  %7385 = vmatprep.subr.bf16.mxu0 %v7984_v35 }
 0x295   : > { %7334 = vmatmul.mubr.bf16.gmra.mrb[8].mxu0 %v1309_v33  ;;  %7366 = vmatmul.mubr.bf16.gmra.mrb[8].mxu1 %v1309_v33 }
 0x296   : > { %7386 = vmatpush3.bf16.msra.mxu0 %v7984_v35 }
 0x297   : > { %7387 = vmatprep.subr.bf16.mxu0 %v7985_v37 }
 0x29a   : > { %7388 = vmatpush3.bf16.msra.mxu0 %v7985_v37 }
 0x2f9   : > { %v1189_v38 = vpop.xlane.xlu0 %1188 }
 0x2fa   : > { %v1208_v39 = vmul.f32 0.0078125, %v1189_v38 }
 0x2fc   : > { %v1224_v40 = vadd.f32 1e-05, %v1208_v39 }
 0x2fd   : > { %v1191_v43 = vpop.xlane.xlu1 %1190  ;;  %v1193_v41 = vpop.xlane.xlu0 %1192 }
 0x2fe   : > { %8058 = vrsqrt.f32 %v1224_v40  ;;  %v1209_v44 = vmul.f32 0.0078125, %v1191_v43  ;;  %v1210_v45 = vmul.f32 0.0078125, %v1193_v41 }
 0x300   : > { %v1225_v47 = vadd.f32 1e-05, %v1209_v44  ;;  %v1226_v48 = vadd.f32 1e-05, %v1210_v45 }
 0x301   : > { %v1195_v50 = vpop.xlane.xlu1 %1194 }
 0x302   : > { %8060 = vrsqrt.f32 %v1225_v47  ;;  %v1211_v52 = vmul.f32 0.0078125, %v1195_v50 }
 0x303   : > { %8062 = vrsqrt.f32 %v1226_v48 }
 0x304   : > { %v1227_v53 = vadd.f32 1e-05, %v1211_v52 }
 0x306   : > { %8064 = vrsqrt.f32 %v1227_v53 }
 0x308   : > { %v8059_v57 = vpop.eup %8058 }
 0x309   : > { %v1256_v58 = vmul.f32 %v8059_v57, %v9520_v51 }
 0x30b   : > { %v1278_v49 = vmul.f32 %v9540_v56, %v1256_v58 }
 0x30c   : > { %v8061_v60 = vpop.eup %8060 }
 0x30d   : > { %v8063_v61 = vpop.eup %8062  ;;  %v1257_v2 = vmul.f32 %v8061_v60, %v9525_v62  ;;  %v1300_v54 = vadd.f32 %v9554_v22, %v1278_v49 }
 0x30e   : > { %v1258_v4 = vmul.f32 %v8063_v61, %v9528_v1 }
 0x30f   : > { %v1279_v5 = vmul.f32 %v9540_v56, %v1257_v2 }
 0x310   : > { %v8065_v6 = vpop.eup %8064  ;;  %v1280_v55 = vmul.f32 %v9540_v56, %v1258_v4 }
 0x311   : > { %v1301_v7 = vadd.f32 %v9554_v22, %v1279_v5  ;;  %v1259_v8 = vmul.f32 %v8065_v6, %v9543_v34  ;;  %v9634_v34 = vld [vmem:[%s12248_s30] ss:$0 sm:$0xff] }
 0x312   : > { %v1302_v62 = vadd.f32 %v9554_v22, %v1280_v55 }
 0x313   : > { %v1310_v51 = vpack.c.bf16 %v1301_v7, %v1300_v54  ;;  %v1281_v10 = vmul.f32 %v9540_v56, %v1259_v8 }
 0x315   : > { %7337 = vmatprep.mubr.bf16.mxu0 %v1310_v51  ;;  %7369 = vmatprep.mubr.bf16.mxu1 %v1310_v51  ;;  %v1303_v1 = vadd.f32 %v9554_v22, %v1281_v10 }
 0x317   : > { %v1311_v59 = vpack.c.bf16 %v1303_v1, %v1302_v62 }
 0x319   : > { %7338 = vmatmul.mubr.bf16.gmra.mrb[12].mxu0 %v1311_v59  ;;  %7370 = vmatmul.mubr.bf16.gmra.mrb[12].mxu1 %v1311_v59 }
 0x31a   : > { %7389 = vmatprep.mubr.bf16.mxu0 %v9562_v36  ;;  %v9641_v36 = vld [vmem:[%s12250_s7] ss:$0 sm:$0xff] }
 0x321   : > { %7390 = vmatmul.mubr.bf16.vlgmr.msra.gmra.mrb[16].mxu0 %v9569_v46 }
 0x322   : > { %7393 = vmatprep.mubr.bf16.mxu0 %v9586_v63 }
 0x329   : > { %7394 = vmatmul.mubr.bf16.gmra.mrb[20].mxu0 %v9597_v24 }
 0x32a   : > { %7397 = vmatprep.mubr.bf16.mxu0 %v1308_v29 }
 0x331   : > { %7398 = vmatmul.mubr.bf16.gmra.mrb[24].mxu0 %v1309_v33 }
 0x332   : > { %7401 = vmatprep.mubr.bf16.mxu0 %v1310_v51 }
 0x339   : > { %7402 = vmatmul.mubr.bf16.gmra.mrb[28].mxu0 %v1311_v59 }
 0x350   : > { %v7327_v56 = vpop.f32.mrb[0].mxu0  ;;  %v7359_v22 = vpop.f32.mrb[0].mxu1 }
 0x351   : > { %v1400_v46 = vpop.f32.mrb[1].mxu0  ;;  %v1551_v11 = vpop.f32.mrb[1].mxu1  ;;  %v1409_v63 = vadd.f32 %v7327_v56, %v9634_v34  ;;  %v1560_v16 = vadd.f32 %v7359_v22, %v9641_v36 }
 0x352   : > { %v7328_v12 = vpop.f32.mrb[2].mxu0  ;;  %v7360_v13 = vpop.f32.mrb[2].mxu1  ;;  %v1401_v9 = vadd.f32 %v9634_v34, %v1400_v46  ;;  %v1552_v21 = vadd.f32 %v9641_v36, %v1551_v11 }
 0x353   : > { %v1412_v17 = vadd.f32 %v7328_v12, %v9634_v34  ;;  %v1563_v18 = vadd.f32 %v7360_v13, %v9641_v36  ;;  %v1403_v19 = vpop.f32.mrb[3].mxu0  ;;  %v1554_v3 = vpop.f32.mrb[3].mxu1 }
 0x354   : > { %v1404_v0 = vadd.f32 %v9634_v34, %v1403_v19  ;;  %v1555_v23 = vadd.f32 %v9641_v36, %v1554_v3 }
 0x355   : > { %v9651_v24 = vpack.c.bf16 %v1412_v17, %v1409_v63  ;;  %v9653_v42 = vpack.c.bf16 %v1563_v18, %v1560_v16 }
 0x356   : > { %v9655_v25 = vpack.c.bf16 %v1404_v0, %v1401_v9  ;;  %v9657_v26 = vpack.c.bf16 %v1555_v23, %v1552_v21 }
 0x357   : > { %1855 = vrot.lane.b32.xlu1 %v9653_v42, %s8791_s14  ;;  %v1992_v28 = vsel %vm1981_vm0, %v9653_v42, 0 }
 0x358   : > { %7789 = vmatprep.subr.msk.bf16.mxu0 %vm1981_vm0, %v9657_v26  ;;  %1853 = vrot.lane.b32.xlu0 %v9657_v26, %s8791_s14  ;;  %v1989_v27 = vsel %vm1981_vm0, %v9657_v26, 0 }
 0x359   : > { %7409 = vmatprep.mubr.msk.bf16.mxu0 %vm1981_vm0, %v9655_v25  ;;  %7406 = vmatpush3.bf16.xpose.msra.mxu0 %v1989_v27 }
 0x35a   : > { %7790 = vmatprep.subr.msk.bf16.mxu0 %vm1981_vm0, %v9653_v42 }
 0x35b   : > { %1797 = vrot.lane.b32.xlu1 %v9655_v25, %s8791_s14 }
 0x35c   : > { %1799 = vrot.lane.b32.xlu0 %v9651_v24, %s8791_s14 }
 0x35f   : > { %1885 = vrot.lane.b32.xlu1 %v9657_v26, %s8792_s10 }
 0x360   : > { %1829 = vrot.lane.b32.xlu0 %v9655_v25, %s8792_s10  ;;  %v7331_v14 = vpop.f32.mrb[4].mxu0  ;;  %v7363_v15 = vpop.f32.mrb[4].mxu1 }
 0x361   : > { %v1416_v29 = vpop.f32.mrb[5].mxu0  ;;  %v1567_v30 = vpop.f32.mrb[5].mxu1  ;;  %7408 = vmatpush3.bf16.xpose.msra.mxu0 %v1992_v28  ;;  %v1425_v33 = vadd.f32 %v7331_v14, %v9634_v34  ;;  %v1576_v20 = vadd.f32 %v7363_v15, %v9641_v36 }
 0x362   : > { %v7332_v31 = vpop.f32.mrb[6].mxu0  ;;  %v7364_v32 = vpop.f32.mrb[6].mxu1  ;;  %v1417_v40 = vadd.f32 %v9634_v34, %v1416_v29  ;;  %v1568_v43 = vadd.f32 %v9641_v36, %v1567_v30 }
 0x363   : > { %v1428_v35 = vadd.f32 %v7332_v31, %v9634_v34  ;;  %v1579_v37 = vadd.f32 %v7364_v32, %v9641_v36  ;;  %1887 = vrot.lane.b32.xlu1 %v9653_v42, %s8792_s10  ;;  %v1419_v38 = vpop.f32.mrb[7].mxu0  ;;  %v1570_v39 = vpop.f32.mrb[7].mxu1 }
 0x364   : > { %v1420_v41 = vadd.f32 %v9634_v34, %v1419_v38  ;;  %v1571_v44 = vadd.f32 %v9641_v36, %v1570_v39  ;;  %1831 = vrot.lane.b32.xlu0 %v9651_v24, %s8792_s10 }
 0x365   : > { %v9693_v45 = vpack.c.bf16 %v1428_v35, %v1425_v33  ;;  %v9695_v47 = vpack.c.bf16 %v1579_v37, %v1576_v20 }
 0x366   : > { %v9697_v48 = vpack.c.bf16 %v1420_v41, %v1417_v40  ;;  %v9699_v50 = vpack.c.bf16 %v1571_v44, %v1568_v43 }
 0x368   : > { %1857 = vrot.lane.b32.xlu1 %v9699_v50, %s8791_s14  ;;  %1801 = vrot.lane.b32.xlu0 %v9697_v48, %s8791_s14  ;;  %v7335_v52 = vpop.f32.mrb[8].mxu0  ;;  %v7367_v53 = vpop.f32.mrb[8].mxu1 }
 0x369   : > { %7410 = vmatmul.mubr.msk.bf16.vlgmr.msra.gmra.mrb[32].mxu0 %vm1981_vm0, %v9651_v24  ;;  %v1432_v57 = vpop.f32.mrb[9].mxu0  ;;  %v1583_v58 = vpop.f32.mrb[9].mxu1  ;;  %v1441_v60 = vadd.f32 %v7335_v52, %v9634_v34  ;;  %v1592_v49 = vadd.f32 %v7367_v53, %v9641_v36 }
 0x36a   : > { %v7336_v61 = vpop.f32.mrb[10].mxu0  ;;  %v7368_v2 = vpop.f32.mrb[10].mxu1  ;;  %v1433_v4 = vadd.f32 %v9634_v34, %v1432_v57  ;;  %v1584_v8 = vadd.f32 %v9641_v36, %v1583_v58 }
 0x36b   : > { %v1444_v5 = vadd.f32 %v7336_v61, %v9634_v34  ;;  %v1595_v6 = vadd.f32 %v7368_v2, %v9641_v36  ;;  %v1435_v54 = vpop.f32.mrb[11].mxu0  ;;  %v1586_v7 = vpop.f32.mrb[11].mxu1 }
 0x36c   : > { %v1436_v55 = vadd.f32 %v9634_v34, %v1435_v54  ;;  %v1587_v51 = vadd.f32 %v9641_v36, %v1586_v7  ;;  %1859 = vrot.lane.b32.xlu1 %v9695_v47, %s8791_s14  ;;  %1889 = vrot.lane.b32.xlu0 %v9699_v50, %s8792_s10  ;;  %v2233_v54 = vsel %vm1981_vm0, %v9699_v50, 0 }
 0x36d   : > { %v9719_v10 = vpack.c.bf16 %v1444_v5, %v1441_v60  ;;  %v9721_v62 = vpack.c.bf16 %v1595_v6, %v1592_v49 }
 0x36e   : > { %v9723_v1 = vpack.c.bf16 %v1436_v55, %v1433_v4  ;;  %v9725_v59 = vpack.c.bf16 %v1587_v51, %v1584_v8 }
 0x370   : > { %1869 = vrot.lane.b32.xlu1 %v9657_v26, %s8793_s19  ;;  %1871 = vrot.lane.b32.xlu0 %v9653_v42, %s8793_s19 }
 0x374   : > { %1803 = vrot.lane.b32.xlu1 %v9693_v45, %s8791_s14  ;;  %1813 = vrot.lane.b32.xlu0 %v9655_v25, %s8793_s19 }
 0x378   : > { %1891 = vrot.lane.b32.xlu1 %v9695_v47, %s8792_s10  ;;  %1861 = vrot.lane.b32.xlu0 %v9725_v59, %s8791_s14 }
 0x37c   : > { %1833 = vrot.lane.b32.xlu1 %v9697_v48, %s8792_s10  ;;  %1835 = vrot.lane.b32.xlu0 %v9693_v45, %s8792_s10 }
 0x380   : > { %1815 = vrot.lane.b32.xlu1 %v9651_v24, %s8793_s19  ;;  %1805 = vrot.lane.b32.xlu0 %v9723_v1, %s8791_s14 }
 0x384   : > { %1863 = vrot.lane.b32.xlu1 %v9721_v62, %s8791_s14  ;;  %1893 = vrot.lane.b32.xlu0 %v9725_v59, %s8792_s10 }
 0x388   : > { %1873 = vrot.lane.b32.xlu1 %v9699_v50, %s8793_s19  ;;  %1875 = vrot.lane.b32.xlu0 %v9695_v47, %s8793_s19 }
 0x38c   : > { %1807 = vrot.lane.b32.xlu1 %v9719_v10, %s8791_s14  ;;  %1817 = vrot.lane.b32.xlu0 %v9697_v48, %s8793_s19 }
 0x390   : > { %1895 = vrot.lane.b32.xlu1 %v9721_v62, %s8792_s10 }
 0x394   : > { %1837 = vrot.lane.b32.xlu1 %v9723_v1, %s8792_s10 }
 0x398   : > { %1819 = vrot.lane.b32.xlu1 %v9693_v45, %s8793_s19 }
 0x3c9   : > { %v1856_v56 = vpop.permute.xlu1 %1855 }
 0x3ca   : > { %v1854_v22 = vpop.permute.xlu0 %1853  ;;  %v2053_v16 = vsel %vm1981_vm0, %v1856_v56, 0 }
 0x3cb   : > { %7791 = vmatprep.subr.msk.bf16.mxu1 %vm1981_vm0, %v1854_v22  ;;  %v2050_v46 = vsel %vm1981_vm0, %v1854_v22, 0 }
 0x3cc   : > { %7414 = vmatpush3.bf16.xpose.msra.mxu1 %v2050_v46 }
 0x3cd   : > { %v1798_v11 = vpop.permute.xlu1 %1797  ;;  %7792 = vmatprep.subr.msk.bf16.mxu1 %vm1981_vm0, %v1856_v56 }
 0x3ce   : > { %7417 = vmatprep.mubr.msk.bf16.mxu1 %vm1981_vm0, %v1798_v11  ;;  %v1800_v12 = vpop.permute.xlu0 %1799 }
 0x3d1   : > { %v1886_v13 = vpop.permute.xlu1 %1885 }
 0x3d2   : > { %v1830_v63 = vpop.permute.xlu0 %1829  ;;  %v2172_v9 = vsel %vm1981_vm0, %v1886_v13, 0 }
 0x3d4   : > { %7416 = vmatpush3.bf16.xpose.msra.mxu1 %v2053_v16  ;;  %v2236_v16 = vsel %vm1981_vm0, %v9695_v47, 0 }
 0x3d5   : > { %v1888_v17 = vpop.permute.xlu1 %1887  ;;  %7795 = vmatprep.subr.msk.bf16.mxu1 %vm1981_vm0, %v1886_v13 }
 0x3d6   : > { %v1832_v18 = vpop.permute.xlu0 %1831  ;;  %v2175_v25 = vsel %vm1981_vm0, %v1888_v17, 0 }
 0x3da   : > { %v1858_v19 = vpop.permute.xlu1 %1857  ;;  %v1802_v3 = vpop.permute.xlu0 %1801 }
 0x3db   : > { %7418 = vmatmul.mubr.msk.bf16.vlgmr.msra.gmra.mrb[16].mxu1 %vm1981_vm0, %v1800_v12  ;;  %v2294_v29 = vsel %vm1981_vm0, %v1858_v19, 0 }
 0x3dc   : > { %7430 = vmatpush3.bf16.xpose.msra.mxu1 %v2172_v9  ;;  %7433 = vmatprep.mubr.msk.bf16.mxu1 %vm1981_vm0, %v1830_v63 }
 0x3dd   : > { %7796 = vmatprep.subr.msk.bf16.mxu1 %vm1981_vm0, %v1888_v17 }
 0x3de   : > { %v1860_v21 = vpop.permute.xlu1 %1859  ;;  %v9775_v0 = vpop.permute.xlu0 %1889 }
 0x3df   : > { %v2297_v7 = vsel %vm1981_vm0, %v1860_v21, 0 }
 0x3e2   : > { %v1870_v23 = vpop.permute.xlu1 %1869  ;;  %v1872_v24 = vpop.permute.xlu0 %1871 }
 0x3e3   : > { %7793 = vmatprep.subr.msk.bf16.mxu0 %vm1981_vm0, %v1870_v23  ;;  %v2111_v42 = vsel %vm1981_vm0, %v1870_v23, 0  ;;  %v2114_v28 = vsel %vm1981_vm0, %v1872_v24, 0 }
 0x3e4   : > { %7422 = vmatpush3.bf16.xpose.msra.mxu0 %v2111_v42  ;;  %7432 = vmatpush3.bf16.xpose.msra.mxu1 %v2175_v25 }
 0x3e5   : > { %7794 = vmatprep.subr.msk.bf16.mxu0 %vm1981_vm0, %v1872_v24  ;;  %7799 = vmatprep.subr.msk.bf16.mxu1 %vm1981_vm0, %v1858_v19 }
 0x3e6   : > { %v9782_v26 = vpop.permute.xlu1 %1803  ;;  %v1814_v27 = vpop.permute.xlu0 %1813 }
 0x3e7   : > { %7425 = vmatprep.mubr.msk.bf16.mxu0 %vm1981_vm0, %v1814_v27 }
 0x3ea   : > { %v9785_v14 = vpop.permute.xlu1 %1891  ;;  %v9787_v15 = vpop.permute.xlu0 %1861 }
 0x3eb   : > { %7434 = vmatmul.mubr.msk.bf16.vlgmr.msra.gmra.mrb[20].mxu1 %vm1981_vm0, %v1832_v18  ;;  %v2416_v18 = vsel %vm1981_vm0, %v9775_v0, 0 }
 0x3ec   : > { %v7339_v30 = vpop.f32.mrb[12].mxu0  ;;  %v7371_v31 = vpop.f32.mrb[12].mxu1  ;;  %7424 = vmatpush3.bf16.xpose.msra.mxu0 %v2114_v28  ;;  %7446 = vmatpush3.bf16.xpose.msra.mxu1 %v2294_v29 }
 0x3ed   : > { %7449 = vmatprep.mubr.msk.bf16.mxu1 %vm1981_vm0, %v1802_v3  ;;  %v1448_v32 = vpop.f32.mrb[13].mxu0  ;;  %v1599_v33 = vpop.f32.mrb[13].mxu1  ;;  %7797 = vmatprep.subr.msk.bf16.mxu0 %vm1981_vm0, %v9699_v50  ;;  %v1457_v37 = vadd.f32 %v7339_v30, %v9634_v34  ;;  %v1608_v43 = vadd.f32 %v7371_v31, %v9641_v36  ;;  %v2419_v30 = vsel %vm1981_vm0, %v9785_v14, 0 }
 0x3ee   : > { %7800 = vmatprep.subr.msk.bf16.mxu1 %vm1981_vm0, %v1860_v21  ;;  %v1834_v20 = vpop.permute.xlu1 %1833  ;;  %v7340_v35 = vpop.f32.mrb[14].mxu0  ;;  %v1449_v41 = vadd.f32 %v9634_v34, %v1448_v32  ;;  %v1600_v57 = vadd.f32 %v9641_v36, %v1599_v33 }
 0x3ef   : > { %v1460_v38 = vadd.f32 %v7340_v35, %v9634_v34  ;;  %v7372_v39 = vpop.f32.mrb[14].mxu1  ;;  %v9798_v40 = vpop.permute.xlu0 %1835 }
 0x3f0   : > { %v1611_v44 = vadd.f32 %v7372_v39, %v9641_v36  ;;  %v1451_v52 = vpop.f32.mrb[15].mxu0  ;;  %v1602_v53 = vpop.f32.mrb[15].mxu1 }
 0x3f1   : > { %v9804_v58 = vpack.c.bf16 %v1460_v38, %v1457_v37  ;;  %v1452_v60 = vadd.f32 %v9634_v34, %v1451_v52  ;;  %v1603_v61 = vadd.f32 %v9641_v36, %v1602_v53  ;;  %v9826_v36 = vld [vmem:[%s12252_s18] ss:$0 sm:$0xff]  ;;  %v2538_v52 = vsel %vm1981_vm0, %v9787_v15, 0 }
 0x3f2   : > { %v9808_v2 = vpack.c.bf16 %v1611_v44, %v1608_v43  ;;  %v1816_v49 = vpop.permute.xlu1 %1815 }
 0x3f3   : > { %v9810_v4 = vpack.c.bf16 %v1452_v60, %v1449_v41  ;;  %v9812_v5 = vpack.c.bf16 %v1603_v61, %v1600_v57  ;;  %v9814_v6 = vpop.permute.xlu0 %1805  ;;  %7426 = vmatmul.mubr.msk.bf16.vlgmr.msra.gmra.mrb[36].mxu0 %vm1981_vm0, %v1816_v49 }
 0x3f4   : > { %1867 = vrot.lane.b32.xlu1 %v9808_v2, %s8791_s14  ;;  %v7391_v34 = vpop.f32.mrb[16].mxu0  ;;  %7438 = vmatpush3.bf16.xpose.msra.mxu0 %v2233_v54 }
 0x3f5   : > { %1865 = vrot.lane.b32.xlu0 %v9812_v5, %s8791_s14  ;;  %7441 = vmatprep.mubr.msk.bf16.mxu0 %vm1981_vm0, %v9697_v48  ;;  %v1702_v50 = vpop.f32.mrb[17].mxu0  ;;  %v1711_v51 = vadd.f32 %v7391_v34, %v9826_v36 }
 0x3f6   : > { %7448 = vmatpush3.bf16.xpose.msra.mxu1 %v2297_v7  ;;  %7798 = vmatprep.subr.msk.bf16.mxu0 %vm1981_vm0, %v9695_v47  ;;  %v9835_v8 = vpop.permute.xlu1 %1863  ;;  %v7392_v55 = vpop.f32.mrb[18].mxu0  ;;  %v1703_v48 = vadd.f32 %v9826_v36, %v1702_v50  ;;  %v2477_v7 = vsel %vm1981_vm0, %v9725_v59, 0  ;;  %v2958_v50 = vlaneseq }
 0x3f7   : > { %7803 = vmatprep.subr.msk.bf16.mxu1 %vm1981_vm0, %v9775_v0  ;;  %v1714_v56 = vadd.f32 %v7392_v55, %v9826_v36  ;;  %v1705_v22 = vpop.f32.mrb[19].mxu0  ;;  %v9842_v46 = vpop.permute.xlu0 %1893 }
 0x3f8   : > { %1811 = vrot.lane.b32.xlu1 %v9804_v58, %s8791_s14  ;;  %v1706_v11 = vadd.f32 %v9826_v36, %v1705_v22 }
 0x3f9   : > { %v9847_v12 = vpack.c.bf16 %v1714_v56, %v1711_v51  ;;  %1839 = vrot.lane.b32.xlu0 %v9719_v10, %s8792_s10  ;;  %v9997_v56 = vshrl.u32 %v2958_v50, 7 }
 0x3fa   : > { %v9851_v13 = vpack.c.bf16 %v1706_v11, %v1703_v48  ;;  %v1874_v63 = vpop.permute.xlu1 %1873  ;;  %v2964_v48 = vand.u32 127, %v2958_v50 }
 0x3fb   : > { %v1876_v3 = vpop.permute.xlu0 %1875  ;;  %v2355_v27 = vsel %vm1981_vm0, %v1874_v63, 0  ;;  %12259 = vst [vmem:[#allocation48_spill] sm:$0xff] %v9997_v56  ;;  %v2961_v22 = vadd.s32 16, %v9997_v56 }
 0x3fc   : > { %1879 = vrot.lane.b32.xlu1 %v9721_v62, %s8793_s19  ;;  %v7395_v17 = vpop.f32.mrb[20].mxu0  ;;  %7440 = vmatpush3.bf16.xpose.msra.mxu0 %v2236_v16  ;;  %v2358_v43 = vsel %vm1981_vm0, %v1876_v3, 0  ;;  %vm10009_vm2 = vcmp.le.s32.totalorder %v2964_v48, %v9997_v56 }
 0x3fd   : > { %7450 = vmatmul.mubr.msk.bf16.vlgmr.msra.gmra.mrb[24].mxu1 %vm1981_vm0, %v9782_v26  ;;  %1809 = vrot.lane.b32.xlu0 %v9810_v4, %s8791_s14  ;;  %v1718_v19 = vpop.f32.mrb[21].mxu0  ;;  %v1727_v9 = vadd.f32 %v7395_v17, %v9826_v36  ;;  %vm10000_vm1 = vcmp.le.s32.totalorder %v2964_v48, %v2961_v22 }
 0x3fe   : > { %7462 = vmatpush3.bf16.xpose.msra.mxu1 %v2416_v18  ;;  %7465 = vmatprep.mubr.msk.bf16.mxu1 %vm1981_vm0, %v1834_v20  ;;  %v7396_v47 = vpop.f32.mrb[22].mxu0  ;;  %v1719_v24 = vadd.f32 %v9826_v36, %v1718_v19  ;;  %v9870_v42 = vpop.permute.xlu1 %1807  ;;  %v2962_v19 = vadd.s32 24, %v9997_v56 }
 0x3ff   : > { %7801 = vmatprep.subr.msk.bf16.mxu0 %vm1981_vm0, %v1874_v63  ;;  %7804 = vmatprep.subr.msk.bf16.mxu1 %vm1981_vm0, %v9785_v14  ;;  %v1730_v21 = vadd.f32 %v7396_v47, %v9826_v36  ;;  %v1721_v23 = vpop.f32.mrb[23].mxu0  ;;  %v1818_v28 = vpop.permute.xlu0 %1817  ;;  %v2960_v47 = vadd.s32 8, %v9997_v56 }
 0x400   : > { %1823 = vrot.lane.b32.xlu1 %v9719_v10, %s8793_s19  ;;  %v1722_v0 = vadd.f32 %v9826_v36, %v1721_v23  ;;  %vm10022_vm3 = vcmp.le.s32.totalorder %v2964_v48, %v2962_v19 }
 0x401   : > { %v9875_v25 = vpack.c.bf16 %v1730_v21, %v1727_v9  ;;  %1877 = vrot.lane.b32.xlu0 %v9725_v59, %s8793_s19  ;;  %vm10031_vm4 = vcmp.le.s32.totalorder %v2964_v48, %v2960_v47 }
 0x402   : > { %v9879_v26 = vpack.c.bf16 %v1722_v0, %v1719_v24  ;;  %v9891_v32 = vpop.permute.xlu1 %1895 }
 0x403   : > { %12253 = vst [vmem:[#allocation42_spill] sm:$0xff] %v9875_v25  ;;  %7442 = vmatmul.mubr.msk.bf16.vlgmr.msra.gmra.mrb[40].mxu0 %vm1981_vm0, %v9693_v45 }
 0x404   : > { %12254 = vst [vmem:[#allocation43_spill] sm:$0xff] %v9879_v26  ;;  %1883 = vrot.lane.b32.xlu1 %v9808_v2, %s8793_s19  ;;  %v7399_v29 = vpop.f32.mrb[24].mxu0  ;;  %7454 = vmatpush3.bf16.xpose.msra.mxu0 %v2355_v27 }
 0x405   : > { %1821 = vrot.lane.b32.xlu0 %v9723_v1, %s8793_s19  ;;  %7457 = vmatprep.mubr.msk.bf16.mxu0 %vm1981_vm0, %v1818_v28  ;;  %v1734_v31 = vpop.f32.mrb[25].mxu0  ;;  %v1743_v33 = vadd.f32 %v7399_v29, %v9826_v36 }
 0x406   : > { %7464 = vmatpush3.bf16.xpose.msra.mxu1 %v2419_v30  ;;  %7802 = vmatprep.subr.msk.bf16.mxu0 %vm1981_vm0, %v1876_v3  ;;  %v7400_v45 = vpop.f32.mrb[26].mxu0  ;;  %v1735_v37 = vadd.f32 %v9826_v36, %v1734_v31  ;;  %v1838_v41 = vpop.permute.xlu1 %1837 }
 0x407   : > { %7807 = vmatprep.subr.msk.bf16.mxu1 %vm1981_vm0, %v9787_v15  ;;  %v1746_v20 = vadd.f32 %v7400_v45, %v9826_v36  ;;  %v1737_v35 = vpop.f32.mrb[27].mxu0 }
 0x408   : > { %1827 = vrot.lane.b32.xlu1 %v9804_v58, %s8793_s19  ;;  %v1738_v14 = vadd.f32 %v9826_v36, %v1737_v35 }
 0x409   : > { %v9902_v38 = vpack.c.bf16 %v1746_v20, %v1743_v33  ;;  %1881 = vrot.lane.b32.xlu0 %v9812_v5, %s8793_s19 }
 0x40a   : > { %v9906_v39 = vpack.c.bf16 %v1738_v14, %v1735_v37  ;;  %v1820_v54 = vpop.permute.xlu1 %1819 }
 0x40b   : > { %12255 = vst [vmem:[#allocation44_spill] sm:$0xff] %v9902_v38 }
 0x40c   : > { %12256 = vst [vmem:[#allocation45_spill] sm:$0xff] %v9906_v39  ;;  %1899 = vrot.lane.b32.xlu1 %v9808_v2, %s8792_s10  ;;  %v7403_v44 = vpop.f32.mrb[28].mxu0  ;;  %7456 = vmatpush3.bf16.xpose.msra.mxu0 %v2358_v43 }
 0x40d   : > { %7466 = vmatmul.mubr.msk.bf16.vlgmr.msra.gmra.mrb[28].mxu1 %vm1981_vm0, %v9798_v40  ;;  %1825 = vrot.lane.b32.xlu0 %v9810_v4, %s8793_s19  ;;  %v1750_v53 = vpop.f32.mrb[29].mxu0  ;;  %v1759_v60 = vadd.f32 %v7403_v44, %v9826_v36 }
 0x40e   : > { %7478 = vmatpush3.bf16.xpose.msra.mxu1 %v2538_v52  ;;  %7481 = vmatprep.mubr.msk.bf16.mxu1 %vm1981_vm0, %v9814_v6  ;;  %v7404_v57 = vpop.f32.mrb[30].mxu0  ;;  %v1751_v49 = vadd.f32 %v9826_v36, %v1750_v53 }
 0x40f   : > { %7805 = vmatprep.subr.msk.bf16.mxu0 %vm1981_vm0, %v9725_v59  ;;  %7808 = vmatprep.subr.msk.bf16.mxu1 %vm1981_vm0, %v9835_v8  ;;  %v1762_v40 = vadd.f32 %v7404_v57, %v9826_v36  ;;  %v1753_v61 = vpop.f32.mrb[31].mxu0  ;;  %v2480_v59 = vsel %vm1981_vm0, %v9721_v62, 0  ;;  %v2721_v57 = vsel %vm1981_vm0, %v9812_v5, 0 }
 0x410   : > { %1843 = vrot.lane.b32.xlu1 %v9804_v58, %s8792_s10  ;;  %v1754_v15 = vadd.f32 %v9826_v36, %v1753_v61  ;;  %v2541_v36 = vsel %vm1981_vm0, %v9835_v8, 0 }
 0x411   : > { %v9929_v6 = vpack.c.bf16 %v1762_v40, %v1759_v60  ;;  %1897 = vrot.lane.b32.xlu0 %v9812_v5, %s8792_s10 }
 0x412   : > { %v9933_v34 = vpack.c.bf16 %v1754_v15, %v1751_v49 }
 0x413   : > { %12257 = vst [vmem:[#allocation46_spill] sm:$0xff] %v9929_v6  ;;  %7458 = vmatmul.mubr.msk.bf16.vlgmr.msra.gmra.mrb[44].mxu0 %vm1981_vm0, %v1820_v54 }
 0x414   : > { %12258 = vst [vmem:[#allocation47_spill] sm:$0xff] %v9933_v34  ;;  %1911 = vrot.lane.b32.xlu1 %v9847_v12, %s8791_s14  ;;  %7470 = vmatpush3.bf16.xpose.msra.mxu0 %v2477_v7 }
 0x415   : > { %1841 = vrot.lane.b32.xlu0 %v9810_v4, %s8792_s10  ;;  %7473 = vmatprep.mubr.msk.bf16.mxu0 %vm1981_vm0, %v9723_v1  ;;  %v2660_v1 = vsel %vm1981_vm0, %v9842_v46, 0 }
 0x416   : > { %7480 = vmatpush3.bf16.xpose.msra.mxu1 %v2541_v36  ;;  %7806 = vmatprep.subr.msk.bf16.mxu0 %vm1981_vm0, %v9721_v62  ;;  %v2663_v62 = vsel %vm1981_vm0, %v9891_v32, 0 }
 0x417   : > { %7811 = vmatprep.subr.msk.bf16.mxu1 %vm1981_vm0, %v9842_v46 }
 0x418   : > { %1957 = vrot.lane.b32.xlu1 %v9851_v13, %s8792_s10 }
 0x419   : > { %1959 = vrot.lane.b32.xlu0 %v9847_v12, %s8792_s10 }
 0x41c   : > { %1915 = vrot.lane.b32.xlu1 %v9875_v25, %s8791_s14  ;;  %7472 = vmatpush3.bf16.xpose.msra.mxu0 %v2480_v59 }
 0x41d   : > { %7482 = vmatmul.mubr.msk.bf16.vlgmr.msra.gmra.mrb[32].mxu1 %vm1981_vm0, %v9870_v42  ;;  %1935 = vrot.lane.b32.xlu0 %v9847_v12, %s8793_s19 }
 0x41e   : > { %7494 = vmatpush3.bf16.xpose.msra.mxu1 %v2660_v1  ;;  %7497 = vmatprep.mubr.msk.bf16.mxu1 %vm1981_vm0, %v1838_v41 }
 0x41f   : > { %7812 = vmatprep.subr.msk.bf16.mxu1 %vm1981_vm0, %v9891_v32 }
 0x420   : > { %1963 = vrot.lane.b32.xlu1 %v9875_v25, %s8792_s10 }
 0x421   : > { %1909 = vrot.lane.b32.xlu0 %v9851_v13, %s8791_s14 }
 0x423   : > { %7474 = vmatmul.mubr.msk.bf16.vlgmr.msra.gmra.mrb[48].mxu0 %vm1981_vm0, %v9719_v10 }
 0x424   : > { %1939 = vrot.lane.b32.xlu1 %v9875_v25, %s8793_s19 }
 0x425   : > { %1933 = vrot.lane.b32.xlu0 %v9851_v13, %s8793_s19 }
 0x426   : > { %7496 = vmatpush3.bf16.xpose.msra.mxu1 %v2663_v62 }
 0x428   : > { %1913 = vrot.lane.b32.xlu1 %v9879_v26, %s8791_s14 }
 0x429   : > { %1961 = vrot.lane.b32.xlu0 %v9879_v26, %s8792_s10 }
 0x42c   : > { %1919 = vrot.lane.b32.xlu1 %v9902_v38, %s8791_s14 }
 0x42d   : > { %1937 = vrot.lane.b32.xlu0 %v9879_v26, %s8793_s19 }
 0x430   : > { %1967 = vrot.lane.b32.xlu1 %v9902_v38, %s8792_s10 }
 0x431   : > { %1917 = vrot.lane.b32.xlu0 %v9906_v39, %s8791_s14 }
 0x434   : > { %1965 = vrot.lane.b32.xlu1 %v9906_v39, %s8792_s10 }
 0x438   : > { %1923 = vrot.lane.b32.xlu1 %v9929_v6, %s8791_s14 }
 0x43c   : > { %v7411_v10 = vpop.f32.mrb[32].mxu0  ;;  %1921 = vrot.lane.b32.xlu1 %v9933_v34, %s8791_s14 }
 0x43d   : > { %v2028_v8 = vpop.f32.mrb[33].mxu0  ;;  %v10006_v11 = vsel %vm10000_vm1, %v7411_v10, -1e+30 }
 0x43e   : > { %v7412_v55 = vpop.f32.mrb[34].mxu0  ;;  %v3047_v16 = vsel %vm1981_vm0, %v10006_v11, -inf  ;;  %v10017_v17 = vsel %vm10009_vm2, %v2028_v8, -1e+30 }
 0x43f   : > { %v2031_v51 = vpop.f32.mrb[35].mxu0  ;;  %v3041_v18 = vsel %vm1981_vm0, %v10017_v17, -inf  ;;  %v10029_v9 = vsel %vm10022_vm3, %v7412_v55, -1e+30 }
 0x440   : > { %v3050_v23 = vsel %vm1981_vm0, %v10029_v9, -inf  ;;  %v10039_v24 = vsel %vm10031_vm4, %v2031_v51, -1e+30 }
 0x441   : > { %v3044_v42 = vsel %vm1981_vm0, %v10039_v24, -inf }
 0x450   : > { %3048 = vmax.xlane.f32.xlu0 %v3047_v16 }
 0x454   : > { %3042 = vmax.xlane.f32.xlu0 %v3041_v18 }
 0x460   : > { %3051 = vmax.xlane.f32.xlu1 %v3050_v23 }
 0x464   : > { %3045 = vmax.xlane.f32.xlu1 %v3044_v42 }
 0x466   : > { %v1868_v0 = vpop.permute.xlu1 %1867 }
 0x467   : > { %v1866_v27 = vpop.permute.xlu0 %1865  ;;  %v2785_v20 = vsel %vm1981_vm0, %v1868_v0, 0 }
 0x468   : > { %7815 = vmatprep.subr.msk.bf16.mxu1 %vm1981_vm0, %v1866_v27  ;;  %v2782_v30 = vsel %vm1981_vm0, %v1866_v27, 0 }
 0x46a   : > { %v1812_v28 = vpop.permute.xlu1 %1811 }
 0x46b   : > { %v1840_v29 = vpop.permute.xlu0 %1839 }
 0x46c   : > { %7498 = vmatmul.mubr.msk.bf16.vlgmr.msra.gmra.mrb[36].mxu1 %vm1981_vm0, %v1840_v29 }
 0x46d   : > { %7510 = vmatpush3.bf16.xpose.msra.mxu1 %v2782_v30 }
 0x46e   : > { %7816 = vmatprep.subr.msk.bf16.mxu1 %vm1981_vm0, %v1868_v0  ;;  %v1880_v31 = vpop.permute.xlu1 %1879 }
 0x46f   : > { %v1810_v32 = vpop.permute.xlu0 %1809  ;;  %v2602_v41 = vsel %vm1981_vm0, %v1880_v31, 0 }
 0x470   : > { %7513 = vmatprep.mubr.msk.bf16.mxu1 %vm1981_vm0, %v1810_v32 }
 0x472   : > { %v1824_v33 = vpop.permute.xlu1 %1823 }
 0x473   : > { %v1878_v45 = vpop.permute.xlu0 %1877 }
 0x474   : > { %7809 = vmatprep.subr.msk.bf16.mxu0 %vm1981_vm0, %v1878_v45  ;;  %v2599_v35 = vsel %vm1981_vm0, %v1878_v45, 0 }
 0x475   : > { %7512 = vmatpush3.bf16.xpose.msra.mxu1 %v2785_v20  ;;  %7486 = vmatpush3.bf16.xpose.msra.mxu0 %v2599_v35 }
 0x476   : > { %7810 = vmatprep.subr.msk.bf16.mxu0 %vm1981_vm0, %v1880_v31  ;;  %v1884_v14 = vpop.permute.xlu1 %1883 }
 0x477   : > { %v1822_v37 = vpop.permute.xlu0 %1821  ;;  %v2846_v1 = vsel %vm1981_vm0, %v1884_v14, 0 }
 0x478   : > { %7489 = vmatprep.mubr.msk.bf16.mxu0 %vm1981_vm0, %v1822_v37 }
 0x47a   : > { %v1828_v52 = vpop.permute.xlu1 %1827 }
 0x47b   : > { %v1882_v43 = vpop.permute.xlu0 %1881 }
 0x47c   : > { %7514 = vmatmul.mubr.msk.bf16.vlgmr.msra.gmra.mrb[40].mxu1 %vm1981_vm0, %v1812_v28  ;;  %v2843_v59 = vsel %vm1981_vm0, %v1882_v43, 0 }
 0x47d   : > { %7488 = vmatpush3.bf16.xpose.msra.mxu0 %v2602_v41 }
 0x47e   : > { %7813 = vmatprep.subr.msk.bf16.mxu0 %vm1981_vm0, %v9812_v5  ;;  %v1900_v40 = vpop.permute.xlu1 %1899  ;;  %v2724_v5 = vsel %vm1981_vm0, %v9808_v2, 0 }
 0x47f   : > { %v1826_v44 = vpop.permute.xlu0 %1825  ;;  %v2907_v15 = vsel %vm1981_vm0, %v1900_v40, 0 }
 0x482   : > { %v1844_v54 = vpop.permute.xlu1 %1843 }
 0x483   : > { %v1898_v53 = vpop.permute.xlu0 %1897 }
 0x484   : > { %7490 = vmatmul.mubr.msk.bf16.vlgmr.msra.gmra.mrb[52].mxu0 %vm1981_vm0, %v1824_v33  ;;  %7819 = vmatprep.subr.msk.bf16.mxu1 %vm1981_vm0, %v1898_v53  ;;  %v2904_v60 = vsel %vm1981_vm0, %v1898_v53, 0 }
 0x485   : > { %7502 = vmatpush3.bf16.xpose.msra.mxu0 %v2721_v57  ;;  %7505 = vmatprep.mubr.msk.bf16.mxu0 %vm1981_vm0, %v9810_v4 }
 0x486   : > { %7526 = vmatpush3.bf16.xpose.msra.mxu1 %v2904_v60  ;;  %7814 = vmatprep.subr.msk.bf16.mxu0 %vm1981_vm0, %v9808_v2  ;;  %v1912_v36 = vpop.permute.xlu1 %1911 }
 0x487   : > { %7820 = vmatprep.subr.msk.bf16.mxu1 %vm1981_vm0, %v1900_v40  ;;  %v1842_v61 = vpop.permute.xlu0 %1841 }
 0x488   : > { %7529 = vmatprep.mubr.msk.bf16.mxu1 %vm1981_vm0, %v1842_v61 }
 0x48a   : > { %v10082_v2 = vpop.permute.xlu1 %1957 }
 0x48b   : > { %v10068_v49 = vpop.permute.xlu0 %1959  ;;  %12269 = vst [vmem:[#allocation50_spill] sm:$0xff] %v10082_v2 }
 0x48c   : > { %12268 = vst [vmem:[#allocation49_spill] sm:$0xff] %v10068_v49 }
 0x48d   : > { %7504 = vmatpush3.bf16.xpose.msra.mxu0 %v2724_v5 }
 0x48e   : > { %7528 = vmatpush3.bf16.xpose.msra.mxu1 %v2907_v15  ;;  %7817 = vmatprep.subr.msk.bf16.mxu0 %vm1981_vm0, %v1882_v43  ;;  %v10100_v51 = vpop.permute.xlu1 %1915 }
 0x48f   : > { %v10074_v4 = vpop.permute.xlu0 %1935  ;;  %12270 = vst [vmem:[#allocation51_spill] sm:$0xff] %v10100_v51 }
 0x492   : > { %v10102_v48 = vpop.permute.xlu1 %1963 }
 0x493   : > { %v1910_v7 = vpop.permute.xlu0 %1909  ;;  %12271 = vst [vmem:[#allocation52_spill] sm:$0xff] %v10102_v48 }
 0x494   : > { %7506 = vmatmul.mubr.msk.bf16.vlgmr.msra.gmra.mrb[56].mxu0 %vm1981_vm0, %v9804_v58  ;;  %7541 = vmatprep.subr.bf16.mxu1 %v1910_v7 }
 0x495   : > { %7530 = vmatmul.mubr.msk.bf16.vlgmr.msra.gmra.mrb[44].mxu1 %vm1981_vm0, %v1844_v54  ;;  %7518 = vmatpush3.bf16.xpose.msra.mxu0 %v2843_v59 }
 0x496   : > { %7521 = vmatprep.mubr.msk.bf16.mxu0 %vm1981_vm0, %v1826_v44  ;;  %7542 = vmatpush3.bf16.msra.mxu1 %v1910_v7  ;;  %v10104_v19 = vpop.permute.xlu1 %1939 }
 0x497   : > { %7818 = vmatprep.subr.msk.bf16.mxu0 %vm1981_vm0, %v1884_v14  ;;  %7543 = vmatprep.subr.bf16.mxu1 %v1912_v36  ;;  %v10090_v58 = vpop.permute.xlu0 %1933  ;;  %12272 = vst [vmem:[#allocation53_spill] sm:$0xff] %v10104_v19 }
 0x49a   : > { %7544 = vmatpush3.bf16.msra.mxu1 %v1912_v36  ;;  %v10122_v32 = vpop.permute.xlu1 %1913 }
 0x49b   : > { %7557 = vmatprep.subr.bf16.mxu1 %v10082_v2  ;;  %12273 = vst [vmem:[#allocation54_spill] sm:$0xff] %v10122_v32  ;;  %v10130_v20 = vpop.permute.xlu0 %1961 }
 0x49c   : > { %12274 = vst [vmem:[#allocation55_spill] sm:$0xff] %v10130_v20 }
 0x49d   : > { %7520 = vmatpush3.bf16.xpose.msra.mxu0 %v2846_v1 }
 0x49e   : > { %7533 = vmatprep.subr.bf16.mxu0 %v9851_v13  ;;  %v10144_v44 = vpop.permute.xlu1 %1919 }
 0x49f   : > { %12275 = vst [vmem:[#allocation56_spill] sm:$0xff] %v10144_v44  ;;  %v10154_v40 = vpop.permute.xlu0 %1937 }
 0x4a0   : > { %12276 = vst [vmem:[#allocation57_spill] sm:$0xff] %v10154_v40 }
 0x4a2   : > { %v10168_v59 = vpop.permute.xlu1 %1967 }
 0x4a3   : > { %12277 = vst [vmem:[#allocation58_spill] sm:$0xff] %v10168_v59 }
 0x4a4   : > { %7522 = vmatmul.mubr.msk.bf16.vlgmr.msra.gmra.mrb[60].mxu0 %vm1981_vm0, %v1828_v52 }
 0x4a5   : > { %7534 = vmatpush3.bf16.msra.mxu0 %v9851_v13 }
 0x4a6   : > { %7535 = vmatprep.subr.bf16.mxu0 %v9847_v12 }
 0x4a9   : > { %7536 = vmatpush3.bf16.msra.mxu0 %v9847_v12 }
 0x4aa   : > { %7549 = vmatprep.subr.bf16.mxu0 %v10090_v58 }
 0x4ae   : > { %v7419_v62 = vpop.f32.mrb[16].mxu1 }
 0x4af   : > { %v10096_v10 = vsel %vm10000_vm1, %v7419_v62, -1e+30  ;;  %v2089_v50 = vpop.f32.mrb[17].mxu1 }
 0x4b0   : > { %v7420_v8 = vpop.f32.mrb[18].mxu1  ;;  %v3059_v55 = vsel %vm1981_vm0, %v10096_v10, -inf  ;;  %v10114_v28 = vsel %vm10009_vm2, %v2089_v50, -1e+30 }
 0x4b1   : > { %3060 = vmax.xlane.f32.xlu0 %v3059_v55  ;;  %v2092_v13 = vpop.f32.mrb[19].mxu1  ;;  %v3053_v33 = vsel %vm1981_vm0, %v10114_v28, -inf  ;;  %v10148_v52 = vsel %vm10022_vm3, %v7420_v8, -1e+30  ;;  %v10172_v8 = vpop.permute.xlu0 %1917 }
 0x4b2   : > { %v10126_v45 = vsel %vm10031_vm4, %v2092_v13, -1e+30  ;;  %v3062_v15 = vsel %vm1981_vm0, %v10148_v52, -inf  ;;  %12278 = vst [vmem:[#allocation59_spill] sm:$0xff] %v10172_v8 }
 0x4b3   : > { %v3056_v37 = vsel %vm1981_vm0, %v10126_v45, -inf }
 0x4be   : > { %v7435_v22 = vpop.f32.mrb[20].mxu1 }
 0x4bf   : > { %v2211_v12 = vpop.f32.mrb[21].mxu1  ;;  %v10164_v54 = vsel %vm10000_vm1, %v7435_v22, -1e+30 }
 0x4c0   : > { %v7436_v16 = vpop.f32.mrb[22].mxu1  ;;  %v3083_v62 = vsel %vm1981_vm0, %v10164_v54, -inf }
 0x4c1   : > { %v2214_v18 = vpop.f32.mrb[23].mxu1  ;;  %v10158_v61 = vsel %vm10022_vm3, %v7436_v16, -1e+30 }
 0x4c2   : > { %v3086_v7 = vsel %vm1981_vm0, %v10158_v61, -inf }
 0x4c6   : > { %v7427_v47 = vpop.f32.mrb[36].mxu0 }
 0x4c7   : > { %v10108_v23 = vsel %vm10000_vm1, %v7427_v47, -1e+30  ;;  %v2150_v42 = vpop.f32.mrb[37].mxu0  ;;  %v10186_v47 = vsel %vm10031_vm4, %v2214_v18, -1e+30 }
 0x4c8   : > { %v3071_v0 = vsel %vm1981_vm0, %v10108_v23, -inf  ;;  %v7428_v27 = vpop.f32.mrb[38].mxu0  ;;  %v10134_v35 = vsel %vm10009_vm2, %v2150_v42, -1e+30 }
 0x4c9   : > { %v10118_v29 = vsel %vm10022_vm3, %v7428_v27, -1e+30  ;;  %3072 = vmax.xlane.f32.xlu0 %v3071_v0  ;;  %v2153_v30 = vpop.f32.mrb[39].mxu0  ;;  %v3065_v43 = vsel %vm1981_vm0, %v10134_v35, -inf  ;;  %v10190_v0 = vpop.permute.xlu1 %1965  ;;  %v10194_v27 = vsel %vm10009_vm2, %v2211_v12, -1e+30 }
 0x4ca   : > { %v3074_v31 = vsel %vm1981_vm0, %v10118_v29, -inf  ;;  %v10140_v14 = vsel %vm10031_vm4, %v2153_v30, -1e+30  ;;  %12279 = vst [vmem:[#allocation60_spill] sm:$0xff] %v10190_v0  ;;  %v3077_v18 = vsel %vm1981_vm0, %v10194_v27, -inf }
 0x4cb   : > { %3075 = vmax.xlane.f32.xlu1 %v3074_v31  ;;  %v3068_v57 = vsel %vm1981_vm0, %v10140_v14, -inf  ;;  %v3080_v31 = vsel %vm1981_vm0, %v10186_v47, -inf }
 0x4cd   : > { %3054 = vmax.xlane.f32.xlu0 %v3053_v33 }
 0x4cf   : > { %3057 = vmax.xlane.f32.xlu1 %v3056_v37 }
 0x4d0   : > { %v7451_v41 = vpop.f32.mrb[24].mxu1 }
 0x4d1   : > { %v10150_v53 = vpop.f32.mrb[25].mxu1  ;;  %3066 = vmax.xlane.f32.xlu0 %v3065_v43 }
 0x4d2   : > { %v7452_v60 = vpop.f32.mrb[26].mxu1 }
 0x4d3   : > { %v2336_v5 = vpop.f32.mrb[27].mxu1  ;;  %3069 = vmax.xlane.f32.xlu1 %v3068_v57 }
 0x4d5   : > { %3063 = vmax.xlane.f32.xlu0 %v3062_v15 }
 0x4d6   : > { %v7443_v36 = vpop.f32.mrb[40].mxu0 }
 0x4d7   : > { %3087 = vmax.xlane.f32.xlu1 %v3086_v7  ;;  %v2272_v1 = vpop.f32.mrb[41].mxu0  ;;  %v10176_v55 = vsel %vm10000_vm1, %v7443_v36, -1e+30 }
 0x4d8   : > { %v7444_v50 = vpop.f32.mrb[42].mxu0  ;;  %v3095_v42 = vsel %vm1981_vm0, %v10176_v55, -inf  ;;  %v10208_v43 = vsel %vm10009_vm2, %v2272_v1, -1e+30 }
 0x4d9   : > { %v10180_v13 = vsel %vm10022_vm3, %v7444_v50, -1e+30  ;;  %3084 = vmax.xlane.f32.xlu0 %v3083_v62  ;;  %v2275_v22 = vpop.f32.mrb[43].mxu0  ;;  %v10215_v62 = vpop.permute.xlu1 %1923  ;;  %v10219_v50 = vsel %vm10022_vm3, %v7452_v60, -1e+30 }
 0x4da   : > { %v3098_v16 = vsel %vm1981_vm0, %v10180_v13, -inf  ;;  %v10200_v33 = vsel %vm10031_vm4, %v2275_v22, -1e+30  ;;  %12280 = vst [vmem:[#allocation61_spill] sm:$0xff] %v10215_v62  ;;  %12281 = vst [vmem:[#allocation62_spill] sm:$0xff] %v10219_v50 }
 0x4db   : > { %3099 = vmax.xlane.f32.xlu1 %v3098_v16  ;;  %v3092_v15 = vsel %vm1981_vm0, %v10200_v33, -inf  ;;  %v3089_v16 = vsel %vm1981_vm0, %v10208_v43, -inf }
 0x4dd   : > { %v3049_v30 = vpop.xlane.xlu0 %3048  ;;  %3096 = vmax.xlane.f32.xlu0 %v3095_v42  ;;  %v10228_v42 = vsel %vm10000_vm1, %v7451_v41, -1e+30 }
 0x4de   : > { %v3235_v22 = vsub.f32 %v10006_v11, %v3049_v30  ;;  %v3107_v11 = vsel %vm1981_vm0, %v10228_v42, -inf }
 0x4df   : > { %3081 = vmax.xlane.f32.xlu1 %v3080_v31 }
 0x4e0   : > { %v10204_v37 = vpop.f32.mrb[28].mxu1  ;;  %v3301_v60 = vmul.f32 1.442695, %v3235_v22 }
 0x4e1   : > { %v10210_v12 = vpop.f32.mrb[29].mxu1  ;;  %v3043_v57 = vpop.xlane.xlu0 %3042  ;;  %3078 = vmax.xlane.f32.xlu0 %v3077_v18 }
 0x4e2   : > { %v7468_v7 = vpop.f32.mrb[30].mxu1  ;;  %v3233_v36 = vsub.f32 %v10017_v17, %v3043_v57  ;;  %v3110_v17 = vsel %vm1981_vm0, %v10219_v50, -inf }
 0x4e3   : > { %v10222_v1 = vpop.f32.mrb[31].mxu1  ;;  %3093 = vmax.xlane.f32.xlu1 %v3092_v15  ;;  %v10234_v15 = vpop.permute.xlu1 %1921 }
 0x4e4   : > { %v3297_v31 = vmul.f32 1.442695, %v3233_v36  ;;  %12282 = vst [vmem:[#allocation63_spill] sm:$0xff] %v10234_v15 }
 0x4e5   : > { %3090 = vmax.xlane.f32.xlu0 %v3089_v16 }
 0x4e6   : > { %v7459_v18 = vpop.f32.mrb[44].mxu0  ;;  %8066 = vpow2.f32 %v3297_v31 }
 0x4e7   : > { %3111 = vmax.xlane.f32.xlu1 %v3110_v17  ;;  %v2394_v57 = vpop.f32.mrb[45].mxu0  ;;  %v10238_v41 = vsel %vm10000_vm1, %v7459_v18, -1e+30  ;;  %v10248_v17 = vsel %vm10031_vm4, %v2336_v5, -1e+30  ;;  %8068 = vpow2.f32 %v3301_v60 }
 0x4e8   : > { %v7460_v30 = vpop.f32.mrb[46].mxu0  ;;  %12283 = vst [vmem:[#allocation64_spill] sm:$0xff] %v10248_v17  ;;  %v3119_v31 = vsel %vm1981_vm0, %v10238_v41, -inf  ;;  %v10255_v18 = vsel %vm10009_vm2, %v10150_v53, -1e+30 }
 0x4e9   : > { %v10242_v36 = vsel %vm10022_vm3, %v7460_v30, -1e+30  ;;  %3108 = vmax.xlane.f32.xlu0 %v3107_v11  ;;  %v2397_v16 = vpop.f32.mrb[47].mxu0  ;;  %v3104_v11 = vsel %vm1981_vm0, %v10248_v17, -inf  ;;  %v3101_v60 = vsel %vm1981_vm0, %v10255_v18, -inf }
 0x4ea   : > { %v3122_v22 = vsel %vm1981_vm0, %v10242_v36, -inf  ;;  %v10262_v5 = vsel %vm10031_vm4, %v2397_v16, -1e+30  ;;  %v10268_v53 = vsel %vm10009_vm2, %v2394_v57, -1e+30 }
 0x4eb   : > { %3123 = vmax.xlane.f32.xlu1 %v3122_v22  ;;  %12284 = vst [vmem:[#allocation65_spill] sm:$0xff] %v10268_v53 }
 0x4ed   : > { %v3052_v30 = vpop.xlane.xlu1 %3051  ;;  %3120 = vmax.xlane.f32.xlu0 %v3119_v31 }
 0x4ee   : > { %v3236_v56 = vsub.f32 %v10029_v9, %v3052_v30  ;;  %v3116_v9 = vsel %vm1981_vm0, %v10262_v5, -inf }
 0x4ef   : > { %3105 = vmax.xlane.f32.xlu1 %v3104_v11 }
 0x4f0   : > { %v3303_v22 = vmul.f32 1.442695, %v3236_v56  ;;  %v7483_v62 = vpop.f32.mrb[32].mxu1  ;;  %v10275_v11 = vpop.eup %8066  ;;  %v3113_v56 = vsel %vm1981_vm0, %v10268_v53, -inf }
 0x4f1   : > { %v10270_v31 = vpop.f32.mrb[33].mxu1  ;;  %v3046_v15 = vpop.xlane.xlu1 %3045  ;;  %3102 = vmax.xlane.f32.xlu0 %v3101_v60 }
 0x4f2   : > { %8070 = vpow2.f32 %v3303_v22  ;;  %v3234_v16 = vsub.f32 %v10039_v24, %v3046_v15  ;;  %v7484_v30 = vpop.f32.mrb[34].mxu1  ;;  %v10281_v0 = vpop.eup %8068  ;;  %v3425_v22 = vsel %vm1981_vm0, %v10275_v11, 0.0  ;;  %v10287_v24 = vsel %vm10022_vm3, %v7468_v7, -1e+30 }
 0x4f3   : > { %v10277_v59 = vpop.f32.mrb[35].mxu1  ;;  %3117 = vmax.xlane.f32.xlu1 %v3116_v9  ;;  %12285 = vst [vmem:[#allocation66_spill] sm:$0xff] %v10287_v24  ;;  %v3431_v9 = vsel %vm1981_vm0, %v10281_v0, 0.0  ;;  %v10333_v6 = vsel %vm10022_vm3, %v7484_v30, -1e+30 }
 0x4f4   : > { %v3299_v57 = vmul.f32 1.442695, %v3234_v16  ;;  %v3134_v16 = vsel %vm1981_vm0, %v10287_v24, -inf  ;;  %12290 = vst [vmem:[#allocation71_spill] sm:$0xff] %v10333_v6  ;;  %v10381_v38 = vsel %vm10009_vm2, %v10270_v31, -1e+30 }
 0x4f5   : > { %3114 = vmax.xlane.f32.xlu0 %v3113_v56  ;;  %12295 = vst [vmem:[#allocation76_spill] sm:$0xff] %v10381_v38  ;;  %v3149_v31 = vsel %vm1981_vm0, %v10381_v38, -inf }
 0x4f6   : > { %8072 = vpow2.f32 %v3299_v57  ;;  %v7475_v60 = vpop.f32.mrb[48].mxu0 }
 0x4f7   : > { %v2516_v15 = vpop.f32.mrb[49].mxu0  ;;  %3426 = vadd.xlane.f32.xlu1 %v3425_v22 }
 0x4f8   : > { %v7476_v44 = vpop.f32.mrb[50].mxu0  ;;  %v10348_v30 = vsel %vm10009_vm2, %v2516_v15, -1e+30 }
 0x4f9   : > { %v2519_v34 = vpop.f32.mrb[51].mxu0  ;;  %3432 = vadd.xlane.f32.xlu0 %v3431_v9  ;;  %v10295_v56 = vsel %vm10022_vm3, %v7476_v44, -1e+30  ;;  %v10306_v9 = vsel %vm10031_vm4, %v10222_v1, -1e+30  ;;  %12292 = vst [vmem:[#allocation73_spill] sm:$0xff] %v10348_v30 }
 0x4fa   : > { %12286 = vst [vmem:[#allocation67_spill] sm:$0xff] %v10295_v56  ;;  %v3146_v22 = vsel %vm1981_vm0, %v10295_v56, -inf  ;;  %12287 = vst [vmem:[#allocation68_spill] sm:$0xff] %v10306_v9  ;;  %v3128_v48 = vsel %vm1981_vm0, %v10306_v9, -inf }
 0x4fb   : > { %3135 = vmax.xlane.f32.xlu1 %v3134_v16  ;;  %v10315_v16 = vsel %vm10000_vm1, %v10204_v37, -1e+30 }
 0x4fc   : > { %v10297_v57 = vpop.eup %8070  ;;  %v3131_v1 = vsel %vm1981_vm0, %v10315_v16, -inf }
 0x4fd   : > { %v3434_v7 = vsel %vm1981_vm0, %v10297_v57, 0.0 }
 0x4fe   : > { %3435 = vadd.xlane.f32.xlu0 %v3434_v7  ;;  %v10321_v7 = vsel %vm10031_vm4, %v2519_v34, -1e+30 }
 0x4ff   : > { %3147 = vmax.xlane.f32.xlu1 %v3146_v22  ;;  %12288 = vst [vmem:[#allocation69_spill] sm:$0xff] %v10321_v7  ;;  %v10327_v22 = vsel %vm10000_vm1, %v7475_v60, -1e+30  ;;  %v3140_v37 = vsel %vm1981_vm0, %v10321_v7, -inf  ;;  %v3158_v60 = vsel %vm1981_vm0, %v10333_v6, -inf }
 0x500   : > { %v10308_v8 = vpop.eup %8072  ;;  %12289 = vst [vmem:[#allocation70_spill] sm:$0xff] %v10327_v22  ;;  %v3143_v34 = vsel %vm1981_vm0, %v10327_v22, -inf }
 0x501   : > { %v3428_v44 = vsel %vm1981_vm0, %v10308_v8, 0.0 }
 0x502   : > { %3429 = vadd.xlane.f32.xlu0 %v3428_v44 }
 0x503   : > { %3129 = vmax.xlane.f32.xlu1 %v3128_v48  ;;  %v10340_v48 = vsel %vm10009_vm2, %v10210_v12, -1e+30  ;;  %v10354_v12 = vsel %vm10000_vm1, %v7483_v62, -1e+30 }
 0x504   : > { %12291 = vst [vmem:[#allocation72_spill] sm:$0xff] %v10340_v48  ;;  %v3125_v44 = vsel %vm1981_vm0, %v10340_v48, -inf  ;;  %12293 = vst [vmem:[#allocation74_spill] sm:$0xff] %v10354_v12 }
 0x506   : > { %3132 = vmax.xlane.f32.xlu0 %v3131_v1  ;;  %v3137_v1 = vsel %vm1981_vm0, %v10348_v30, -inf }
 0x507   : > { %3141 = vmax.xlane.f32.xlu1 %v3140_v37  ;;  %v3155_v37 = vsel %vm1981_vm0, %v10354_v12, -inf }
 0x50a   : > { %3144 = vmax.xlane.f32.xlu0 %v3143_v34 }
 0x50b   : > { %3159 = vmax.xlane.f32.xlu1 %v3158_v60 }
 0x50e   : > { %3126 = vmax.xlane.f32.xlu0 %v3125_v44 }
 0x512   : > { %3138 = vmax.xlane.f32.xlu0 %v3137_v1 }
 0x516   : > { %3156 = vmax.xlane.f32.xlu0 %v3155_v37 }
 0x53e   : > { %v10364_v32 = vpop.xlane.xlu0 %3060 }
 0x53f   : > { %v7499_v34 = vpop.f32.mrb[36].mxu1 }
 0x540   : > { %v2699_v60 = vpop.f32.mrb[37].mxu1 }
 0x541   : > { %v7500_v20 = vpop.f32.mrb[38].mxu1 }
 0x542   : > { %v2702_v51 = vpop.f32.mrb[39].mxu1 }
 0x54f   : > { %v10358_v19 = vpop.f32.mrb[40].mxu1 }
 0x550   : > { %v10360_v15 = vpop.f32.mrb[41].mxu1 }
 0x551   : > { %v10362_v44 = vpop.f32.mrb[42].mxu1 }
 0x552   : > { %v10366_v49 = vpop.f32.mrb[43].mxu1 }
 0x556   : > { %v10368_v62 = vpop.xlane.xlu0 %3072 }
 0x557   : > { %v7491_v1 = vpop.f32.mrb[52].mxu0 }
 0x558   : > { %v10372_v37 = vsel %vm10000_vm1, %v7491_v1, -1e+30  ;;  %v2638_v2 = vpop.f32.mrb[53].mxu0  ;;  %v10374_v40 = vpop.xlane.xlu1 %3075 }
 0x559   : > { %12294 = vst [vmem:[#allocation75_spill] sm:$0xff] %v10372_v37  ;;  %v3167_v39 = vsel %vm1981_vm0, %v10372_v37, -inf  ;;  %v7492_v25 = vpop.f32.mrb[54].mxu0  ;;  %v10394_v37 = vsel %vm10031_vm4, %v10277_v59, -1e+30 }
 0x55a   : > { %v10385_v6 = vsel %vm10022_vm3, %v7492_v25, -1e+30  ;;  %v2641_v9 = vpop.f32.mrb[55].mxu0  ;;  %3168 = vmax.xlane.f32.xlu0 %v3167_v39  ;;  %v10387_v1 = vpop.xlane.xlu0 %3054  ;;  %12297 = vst [vmem:[#allocation78_spill] sm:$0xff] %v10394_v37  ;;  %v10402_v25 = vsel %vm10009_vm2, %v2638_v2, -1e+30 }
 0x55b   : > { %12296 = vst [vmem:[#allocation77_spill] sm:$0xff] %v10385_v6  ;;  %v3170_v56 = vsel %vm1981_vm0, %v10385_v6, -inf  ;;  %12298 = vst [vmem:[#allocation79_spill] sm:$0xff] %v10402_v25  ;;  %v3152_v6 = vsel %vm1981_vm0, %v10394_v37, -inf  ;;  %v10410_v59 = vsel %vm10031_vm4, %v2641_v9, -1e+30 }
 0x55c   : > { %3171 = vmax.xlane.f32.xlu1 %v3170_v56  ;;  %v10396_v24 = vpop.xlane.xlu1 %3057  ;;  %12299 = vst [vmem:[#allocation80_spill] sm:$0xff] %v10410_v59  ;;  %v3161_v38 = vsel %vm1981_vm0, %v10402_v25, -inf  ;;  %v10418_v2 = vsel %vm10000_vm1, %v7499_v34, -1e+30  ;;  %v3164_v37 = vsel %vm1981_vm0, %v10410_v59, -inf }
 0x55d   : > { %12300 = vst [vmem:[#allocation81_spill] sm:$0xff] %v10418_v2  ;;  %v10426_v9 = vsel %vm10022_vm3, %v7500_v20, -1e+30  ;;  %v3179_v25 = vsel %vm1981_vm0, %v10418_v2, -inf  ;;  %v10450_v2 = vsel %vm10009_vm2, %v2699_v60, -1e+30 }
 0x55e   : > { %3150 = vmax.xlane.f32.xlu0 %v3149_v31  ;;  %v10404_v39 = vpop.xlane.xlu0 %3066  ;;  %12301 = vst [vmem:[#allocation82_spill] sm:$0xff] %v10426_v9  ;;  %12303 = vst [vmem:[#allocation84_spill] sm:$0xff] %v10450_v2  ;;  %v3173_v53 = vsel %vm1981_vm0, %v10450_v2, -inf  ;;  %v10464_v60 = vsel %vm10031_vm4, %v2702_v51, -1e+30 }
 0x55f   : > { %12305 = vst [vmem:[#allocation86_spill] sm:$0xff] %v10464_v60  ;;  %v3176_v2 = vsel %vm1981_vm0, %v10464_v60, -inf }
 0x560   : > { %3153 = vmax.xlane.f32.xlu1 %v3152_v6  ;;  %v10412_v56 = vpop.xlane.xlu1 %3069 }
 0x562   : > { %3162 = vmax.xlane.f32.xlu0 %v3161_v38  ;;  %v10420_v31 = vpop.xlane.xlu0 %3063  ;;  %v3182_v38 = vsel %vm1981_vm0, %v10426_v9, -inf }
 0x564   : > { %3165 = vmax.xlane.f32.xlu1 %v3164_v37  ;;  %v10428_v6 = vpop.xlane.xlu1 %3087 }
 0x566   : > { %3180 = vmax.xlane.f32.xlu0 %v3179_v25  ;;  %v10432_v30 = vpop.xlane.xlu0 %3084 }
 0x567   : > { %v7507_v34 = vpop.f32.mrb[56].mxu0 }
 0x568   : > { %v10438_v59 = vsel %vm10000_vm1, %v7507_v34, -1e+30  ;;  %v10440_v48 = vpop.f32.mrb[44].mxu1  ;;  %v2760_v20 = vpop.f32.mrb[57].mxu0  ;;  %3183 = vmax.xlane.f32.xlu1 %v3182_v38 }
 0x569   : > { %12302 = vst [vmem:[#allocation83_spill] sm:$0xff] %v10438_v59  ;;  %v3191_v37 = vsel %vm1981_vm0, %v10438_v59, -inf  ;;  %v10444_v17 = vpop.f32.mrb[45].mxu1  ;;  %v10446_v25 = vpop.xlane.xlu1 %3099 }
 0x56a   : > { %v7508_v9 = vpop.f32.mrb[58].mxu0  ;;  %3192 = vmax.xlane.f32.xlu0 %v3191_v37  ;;  %v10452_v12 = vpop.xlane.xlu0 %3096 }
 0x56b   : > { %v10456_v34 = vsel %vm10022_vm3, %v7508_v9, -1e+30  ;;  %v7532_v38 = vpop.f32.mrb[46].mxu1  ;;  %v2763_v50 = vpop.f32.mrb[59].mxu0  ;;  %v10470_v9 = vsel %vm10009_vm2, %v2760_v20, -1e+30  ;;  %v3237_v20 = vsub.f32 %v10114_v28, %v10387_v1  ;;  %v3244_v28 = vsub.f32 %v10118_v29, %v10374_v40 }
 0x56c   : > { %12304 = vst [vmem:[#allocation85_spill] sm:$0xff] %v10456_v34  ;;  %v3194_v59 = vsel %vm1981_vm0, %v10456_v34, -inf  ;;  %v2946_v7 = vpop.f32.mrb[47].mxu1  ;;  %12306 = vst [vmem:[#allocation87_spill] sm:$0xff] %v10470_v9  ;;  %v3239_v34 = vsub.f32 %v10096_v10, %v10364_v32  ;;  %v3185_v51 = vsel %vm1981_vm0, %v10470_v9, -inf }
 0x56d   : > { %3195 = vmax.xlane.f32.xlu1 %v3194_v59  ;;  %v10466_v37 = vpop.xlane.xlu1 %3081  ;;  %v10482_v59 = vsel %vm10031_vm4, %v2763_v50, -1e+30  ;;  %v10522_v29 = vsel %vm10022_vm3, %v7532_v38, -1e+30 }
 0x56e   : > { %3174 = vmax.xlane.f32.xlu0 %v3173_v53  ;;  %v10472_v26 = vpop.xlane.xlu0 %3078  ;;  %12307 = vst [vmem:[#allocation88_spill] sm:$0xff] %v10482_v59  ;;  %v10489_v53 = vsel %vm10000_vm1, %v10358_v19, -1e+30  ;;  %v3309_v32 = vmul.f32 1.442695, %v3239_v34  ;;  %v3188_v60 = vsel %vm1981_vm0, %v10482_v59, -inf }
 0x56f   : > { %12308 = vst [vmem:[#allocation89_spill] sm:$0xff] %v10489_v53  ;;  %v3203_v50 = vsel %vm1981_vm0, %v10489_v53, -inf  ;;  %v10504_v19 = vsel %vm10009_vm2, %v10360_v15, -1e+30  ;;  %v3305_v34 = vmul.f32 1.442695, %v3237_v20 }
 0x570   : > { %12309 = vst [vmem:[#allocation90_spill] sm:$0xff] %v10504_v19  ;;  %8074 = vpow2.f32 %v3309_v32  ;;  %v3197_v53 = vsel %vm1981_vm0, %v10504_v19, -inf  ;;  %v3230_v19 = vsel %vm1981_vm0, %v10522_v29, -inf }
 0x571   : > { %3177 = vmax.xlane.f32.xlu1 %v3176_v2  ;;  %v10484_v22 = vpop.xlane.xlu1 %3093  ;;  %8076 = vpow2.f32 %v3305_v34  ;;  %v3247_v34 = vsub.f32 %v10164_v54, %v10432_v30  ;;  %v3252_v30 = vsub.f32 %v10180_v13, %v10446_v25  ;;  %v10582_v13 = vsel %vm10031_vm4, %v10366_v49, -1e+30 }
 0x572   : > { %3186 = vmax.xlane.f32.xlu0 %v3185_v51  ;;  %v10491_v10 = vpop.xlane.xlu0 %3090  ;;  %v3250_v21 = vsub.f32 %v10200_v33, %v10484_v22  ;;  %v10616_v33 = vsel %vm10009_vm2, %v10444_v17, -1e+30 }
 0x573   : > { %v3221_v17 = vsel %vm1981_vm0, %v10616_v33, -inf }
 0x574   : > { %v3331_v22 = vmul.f32 1.442695, %v3250_v21 }
 0x575   : > { %3189 = vmax.xlane.f32.xlu1 %v3188_v60  ;;  %v10499_v2 = vpop.xlane.xlu1 %3111 }
 0x576   : > { %3204 = vmax.xlane.f32.xlu0 %v3203_v50  ;;  %v10506_v51 = vpop.xlane.xlu0 %3108 }
 0x577   : > { %v7523_v1 = vpop.f32.mrb[60].mxu0 }
 0x578   : > { %v10512_v59 = vsel %vm10000_vm1, %v7523_v1, -1e+30  ;;  %v2882_v60 = vpop.f32.mrb[61].mxu0  ;;  %v3319_v1 = vmul.f32 1.442695, %v3244_v28 }
 0x579   : > { %12310 = vst [vmem:[#allocation91_spill] sm:$0xff] %v10512_v59  ;;  %v3215_v15 = vsel %vm1981_vm0, %v10512_v59, -inf  ;;  %v10518_v50 = vpop.xlane.xlu1 %3123  ;;  %v7524_v9 = vpop.f32.mrb[62].mxu0  ;;  %v10526_v40 = vsel %vm10009_vm2, %v2882_v60, -1e+30  ;;  %v3242_v59 = vsub.f32 %v10140_v14, %v10412_v56 }
 0x57a   : > { %v2885_v32 = vpop.f32.mrb[63].mxu0  ;;  %3198 = vmax.xlane.f32.xlu0 %v3197_v53  ;;  %3216 = vmax.xlane.f32.xlu1 %v3215_v15  ;;  %v10528_v20 = vpop.xlane.xlu0 %3120  ;;  %v3209_v38 = vsel %vm1981_vm0, %v10526_v40, -inf  ;;  %v10539_v60 = vsel %vm10022_vm3, %v10362_v44, -1e+30  ;;  %v10543_v53 = vsel %vm10031_vm4, %v2946_v7, -1e+30  ;;  %8078 = vpow2.f32 %v3319_v1 }
 0x57b   : > { %12311 = vst [vmem:[#allocation92_spill] sm:$0xff] %v10543_v53  ;;  %v3315_v56 = vmul.f32 1.442695, %v3242_v59  ;;  %v3206_v15 = vsel %vm1981_vm0, %v10539_v60, -inf  ;;  %v3243_v44 = vsub.f32 %v10108_v23, %v10368_v62  ;;  %v3224_v7 = vsel %vm1981_vm0, %v10543_v53, -inf }
 0x57c   : > { %v3241_v1 = vsub.f32 %v10134_v35, %v10404_v39  ;;  %v10563_v59 = vsel %vm10022_vm3, %v7524_v9, -1e+30  ;;  %v3325_v23 = vmul.f32 1.442695, %v3247_v34  ;;  %v3245_v62 = vsub.f32 %v10194_v27, %v10472_v26 }
 0x57d   : > { %v10547_v14 = vpop.xlane.xlu1 %3105  ;;  %8080 = vpow2.f32 %v3315_v56  ;;  %v3218_v35 = vsel %vm1981_vm0, %v10563_v59, -inf  ;;  %v3335_v27 = vmul.f32 1.442695, %v3252_v30  ;;  %v10592_v49 = vsel %vm10031_vm4, %v2885_v32, -1e+30 }
 0x57e   : > { %3231 = vmax.xlane.f32.xlu0 %v3230_v19  ;;  %3210 = vmax.xlane.f32.xlu1 %v3209_v38  ;;  %v10545_v28 = vpop.xlane.xlu0 %3102  ;;  %v10557_v19 = vpop.eup %8074  ;;  %v3317_v38 = vmul.f32 1.442695, %v3243_v44  ;;  %v3313_v25 = vmul.f32 1.442695, %v3241_v1  ;;  %8082 = vpow2.f32 %v3325_v23  ;;  %v3321_v56 = vmul.f32 1.442695, %v3245_v62 }
 0x57f   : > { %v3443_v3 = vsel %vm1981_vm0, %v10557_v19, 0.0  ;;  %v10577_v9 = vpop.eup %8076  ;;  %v3240_v30 = vsub.f32 %v10148_v52, %v10420_v31  ;;  %v10601_v62 = vsel %vm10000_vm1, %v10440_v48, -1e+30  ;;  %v3212_v32 = vsel %vm1981_vm0, %v10592_v49, -inf }
 0x580   : > { %8084 = vpow2.f32 %v3317_v38  ;;  %v3437_v44 = vsel %vm1981_vm0, %v10577_v9, 0.0  ;;  %12312 = vst [vmem:[#allocation93_spill] sm:$0xff] %v10601_v62  ;;  %v3238_v31 = vsub.f32 %v10126_v45, %v10396_v24  ;;  %v3227_v48 = vsel %vm1981_vm0, %v10601_v62, -inf }
 0x581   : > { %v10573_v39 = vpop.xlane.xlu1 %3117  ;;  %8086 = vpow2.f32 %v3313_v25  ;;  %v3311_v46 = vmul.f32 1.442695, %v3240_v30 }
 0x582   : > { %3225 = vmax.xlane.f32.xlu0 %v3224_v7  ;;  %3207 = vmax.xlane.f32.xlu1 %v3206_v15  ;;  %v10565_v54 = vpop.xlane.xlu0 %3114  ;;  %v3200_v15 = vsel %vm1981_vm0, %v10582_v13, -inf  ;;  %8088 = vpow2.f32 %v3335_v27  ;;  %v3307_v63 = vmul.f32 1.442695, %v3238_v31 }
 0x583   : > { %8090 = vpow2.f32 %v3321_v56 }
 0x584   : > { %v10584_v34 = vpop.eup %8078 }
 0x585   : > { %v3427_v7 = vpop.xlane.xlu1 %3426  ;;  %v3458_v23 = vsel %vm1981_vm0, %v10584_v34, 0.0 }
 0x586   : > { %3219 = vmax.xlane.f32.xlu1 %v3218_v35  ;;  %3444 = vadd.xlane.f32.xlu0 %v3443_v3  ;;  %v3433_v26 = vpop.xlane.xlu0 %3432  ;;  %v3255_v35 = vsub.f32 %v10228_v42, %v10506_v51  ;;  %v3251_v42 = vsub.f32 %v10176_v55, %v10452_v12  ;;  %v3249_v12 = vsub.f32 %v10208_v43, %v10491_v10 }
 0x587   : > { %v10607_v38 = vpop.eup %8080  ;;  %v3248_v43 = vsub.f32 %v10158_v61, %v10428_v6 }
 0x588   : > { %v3452_v3 = vsel %vm1981_vm0, %v10607_v38, 0.0  ;;  %v10622_v25 = vpop.eup %8082  ;;  %v3341_v56 = vmul.f32 1.442695, %v3255_v35  ;;  %v3333_v55 = vmul.f32 1.442695, %v3251_v42  ;;  %v3246_v42 = vsub.f32 %v10186_v47, %v10466_v37 }
 0x589   : > { %v10634_v51 = vpop.xlane.xlu1 %3135 }
 0x58a   : > { %3201 = vmax.xlane.f32.xlu1 %v3200_v15  ;;  %3438 = vadd.xlane.f32.xlu0 %v3437_v44  ;;  %v10624_v45 = vpop.eup %8084  ;;  %v3253_v15 = vsub.f32 %v10255_v18, %v10545_v28  ;;  %v3467_v44 = vsel %vm1981_vm0, %v10622_v25, 0.0 }
 0x58b   : > { %v3436_v1 = vpop.xlane.xlu0 %3435 }
 0x58c   : > { %8092 = vrcp.f32 %v3436_v1  ;;  %v3337_v28 = vmul.f32 1.442695, %v3253_v15 }
 0x58d   : > { %8094 = vrcp.f32 %v3427_v7 }
 0x58e   : > { %3213 = vmax.xlane.f32.xlu1 %v3212_v32  ;;  %3459 = vadd.xlane.f32.xlu0 %v3458_v23  ;;  %8096 = vrcp.f32 %v3433_v26  ;;  %v10628_v26 = vpop.eup %8086  ;;  %v3260_v23 = vsub.f32 %v10242_v36, %v10518_v50  ;;  %v3455_v32 = vsel %vm1981_vm0, %v10624_v45, 0.0 }
 0x58f   : > { %v3430_v52 = vpop.xlane.xlu0 %3429  ;;  %v10636_v27 = vpop.eup %8088  ;;  %v3449_v36 = vsel %vm1981_vm0, %v10628_v26, 0.0 }
 0x590   : > { %8098 = vrcp.f32 %v3430_v52  ;;  %v10642_v7 = vpop.eup %8090  ;;  %v3351_v35 = vmul.f32 1.442695, %v3260_v23 }
 0x591   : > { %8100 = vpow2.f32 %v3311_v46  ;;  %v3461_v52 = vsel %vm1981_vm0, %v10642_v7, 0.0 }
 0x592   : > { %3228 = vmax.xlane.f32.xlu1 %v3227_v48  ;;  %3453 = vadd.xlane.f32.xlu0 %v3452_v3  ;;  %8102 = vpow2.f32 %v3331_v22  ;;  %v10655_v48 = vpop.xlane.xlu1 %3147  ;;  %v3329_v22 = vmul.f32 1.442695, %v3249_v12 }
 0x593   : > { %v10626_v24 = vpop.xlane.xlu0 %3132  ;;  %8104 = vpow2.f32 %v3307_v63  ;;  %v3482_v63 = vsel %vm1981_vm0, %v10636_v27, 0.0 }
 0x594   : > { %8106 = vpow2.f32 %v3341_v56  ;;  %v3263_v56 = vsub.f32 %v10315_v16, %v10626_v24  ;;  %v3259_v16 = vsub.f32 %v10238_v41, %v10528_v20 }
 0x595   : > { %8108 = vpow2.f32 %v3333_v55 }
 0x596   : > { %3222 = vmax.xlane.f32.xlu1 %v3221_v17  ;;  %3468 = vadd.xlane.f32.xlu0 %v3467_v44  ;;  %v8093_v1 = vpop.eup %8092  ;;  %8110 = vpow2.f32 %v3337_v28  ;;  %v3357_v24 = vmul.f32 1.442695, %v3263_v56  ;;  %v12314_v28 = vld [vmem:[#allocation43_spill] sm:$0xff] }
 0x597   : > { %v8095_v30 = vpop.eup %8094  ;;  %v10648_v21 = vpop.xlane.xlu0 %3144  ;;  %v3684_v46 = vmul.f32 %v8093_v1, %v10297_v57  ;;  %v3258_v57 = vsub.f32 %v10262_v5, %v10573_v39  ;;  %8112 = vpow2.f32 %v3329_v22  ;;  %v3323_v1 = vmul.f32 1.442695, %v3246_v42 }
 0x598   : > { %v8097_v18 = vpop.eup %8096  ;;  %v3681_v10 = vmul.f32 %v8095_v30, %v10275_v11  ;;  %v10677_v5 = vpop.xlane.xlu1 %3129  ;;  %8114 = vpow2.f32 %v3351_v35  ;;  %v12313_v30 = vld [vmem:[#allocation70_spill] sm:$0xff] }
 0x599   : > { %v3683_v3 = vmul.f32 %v8097_v18, %v10281_v0  ;;  %v3327_v0 = vmul.f32 1.442695, %v3248_v43  ;;  %v3347_v39 = vmul.f32 1.442695, %v3258_v57  ;;  %v3267_v55 = vsub.f32 %v12313_v30, %v10648_v21  ;;  %v12315_v21 = vld [vmem:[#allocation65_spill] sm:$0xff]  ;;  %v12317_v35 = vld [vmem:[#allocation62_spill] sm:$0xff] }
 0x59a   : > { %v8099_v31 = vpop.eup %8098  ;;  %3456 = vadd.xlane.f32.xlu1 %v3455_v32  ;;  %3462 = vadd.xlane.f32.xlu0 %v3461_v52  ;;  %v3349_v32 = vmul.f32 1.442695, %v3259_v16  ;;  %v12316_v52 = vld [vmem:[#allocation69_spill] sm:$0xff] }
 0x59b   : > { %v3682_v50 = vmul.f32 %v8099_v31, %v10308_v8  ;;  %v10668_v6 = vpop.eup %8100  ;;  %v10670_v17 = vpop.xlane.xlu0 %3126  ;;  %v3746_v8 = vpack.c.bf16 %v3684_v46, %v3683_v3  ;;  %8116 = vpow2.f32 %v3327_v0  ;;  %v3365_v46 = vmul.f32 1.442695, %v3267_v55 }
 0x59c   : > { %v10672_v11 = vpop.eup %8102  ;;  %v3446_v15 = vsel %vm1981_vm0, %v10668_v6, 0.0  ;;  %8118 = vpow2.f32 %v3347_v39  ;;  %v3142_v18 = vpop.xlane.xlu1 %3141 }
 0x59d   : > { %v3745_v61 = vpack.c.bf16 %v3682_v50, %v3681_v10  ;;  %v10685_v44 = vpop.eup %8104  ;;  %v3476_v47 = vsel %vm1981_vm0, %v10672_v11, 0.0  ;;  %8120 = vpow2.f32 %v3323_v1  ;;  %v3266_v31 = vsub.f32 %v12316_v52, %v3142_v18  ;;  %v12321_v52 = vld [vmem:[#allocation73_spill] sm:$0xff] }
 0x59e   : > { %3450 = vadd.xlane.f32.xlu1 %v3449_v36  ;;  %3483 = vadd.xlane.f32.xlu0 %v3482_v63  ;;  %v10690_v37 = vpop.eup %8106  ;;  %v3440_v12 = vsel %vm1981_vm0, %v10685_v44, 0.0  ;;  %8122 = vpow2.f32 %v3357_v24  ;;  %v12318_v63 = vld [vmem:[#allocation74_spill] sm:$0xff] }
 0x59f   : > { %7537 = vmatprep.mubr.msk.bf16.mxu0 %vm1981_vm0, %v3745_v61  ;;  %v10701_v23 = vpop.eup %8108  ;;  %v3491_v41 = vsel %vm1981_vm0, %v10690_v37, 0.0  ;;  %8124 = vpow2.f32 %v3349_v32  ;;  %v3363_v57 = vmul.f32 1.442695, %v3266_v31 }
 0x5a0   : > { %7538 = vmatmul.mubr.msk.bf16.vlgmr.msra.gmra.mrb[64].mxu0 %vm1981_vm0, %v3746_v8  ;;  %v10706_v20 = vpop.eup %8110  ;;  %v3479_v43 = vsel %vm1981_vm0, %v10701_v23, 0.0  ;;  %8126 = vpow2.f32 %v3365_v46 }
 0x5a1   : > { %7550 = vmatpush3.bf16.msra.mxu0 %v10090_v58  ;;  %v10694_v58 = vpop.xlane.xlu0 %3138  ;;  %v10713_v36 = vpop.eup %8112  ;;  %v3485_v50 = vsel %vm1981_vm0, %v10706_v20, 0.0 }
 0x5a2   : > { %7551 = vmatprep.subr.bf16.mxu0 %v10074_v4  ;;  %3447 = vadd.xlane.f32.xlu1 %v3446_v15  ;;  %v10717_v22 = vpop.eup %8114  ;;  %v3473_v8 = vsel %vm1981_vm0, %v10713_v36, 0.0  ;;  %v3265_v31 = vsub.f32 %v12321_v52, %v10694_v58 }
 0x5a3   : > { %3477 = vadd.xlane.f32.xlu0 %v3476_v47  ;;  %v3506_v42 = vsel %vm1981_vm0, %v10717_v22, 0.0 }
 0x5a5   : > { %7552 = vmatpush3.bf16.msra.mxu0 %v10074_v4  ;;  %v3257_v4 = vsub.f32 %v12315_v21, %v10565_v54  ;;  %v3157_v10 = vpop.xlane.xlu0 %3156  ;;  %v3256_v54 = vsub.f32 %v12317_v35, %v10499_v2  ;;  %v10724_v0 = vpop.eup %8116  ;;  %v12319_v2 = vld [vmem:[#allocation64_spill] sm:$0xff] }
 0x5a6   : > { %7565 = vmatprep.subr.bf16.mxu0 %v12314_v28  ;;  %3441 = vadd.xlane.f32.xlu1 %v3440_v12  ;;  %v3271_v61 = vsub.f32 %v12318_v63, %v3157_v10  ;;  %v10728_v39 = vpop.eup %8118  ;;  %v3254_v15 = vsub.f32 %v12319_v2, %v10547_v14  ;;  %v3470_v1 = vsel %vm1981_vm0, %v10724_v0, 0.0  ;;  %v12320_v12 = vld [vmem:[#allocation72_spill] sm:$0xff] }
 0x5a7   : > { %3492 = vadd.xlane.f32.xlu0 %v3491_v41  ;;  %v3345_v3 = vmul.f32 1.442695, %v3257_v4  ;;  %v3343_v56 = vmul.f32 1.442695, %v3256_v54  ;;  %v10734_v16 = vpop.eup %8120  ;;  %v3500_v24 = vsel %vm1981_vm0, %v10728_v39, 0.0  ;;  %v3261_v14 = vsub.f32 %v12320_v12, %v10670_v17 }
 0x5a8   : > { %v3373_v47 = vmul.f32 1.442695, %v3271_v61  ;;  %v10738_v30 = vpop.eup %8122  ;;  %v3339_v55 = vmul.f32 1.442695, %v3254_v15  ;;  %v3464_v18 = vsel %vm1981_vm0, %v10734_v16, 0.0 }
 0x5a9   : > { %8128 = vpow2.f32 %v3345_v3  ;;  %v10744_v41 = vpop.eup %8124  ;;  %v3515_v32 = vsel %vm1981_vm0, %v10738_v30, 0.0  ;;  %v3353_v4 = vmul.f32 1.442695, %v3261_v14  ;;  %v3361_v54 = vmul.f32 1.442695, %v3265_v31 }
 0x5aa   : > { %3480 = vadd.xlane.f32.xlu1 %v3479_v43  ;;  %8130 = vpow2.f32 %v3363_v57  ;;  %v10748_v21 = vpop.eup %8126  ;;  %v3503_v17 = vsel %vm1981_vm0, %v10744_v41, 0.0 }
 0x5ab   : > { %3486 = vadd.xlane.f32.xlu0 %v3485_v50  ;;  %8132 = vpow2.f32 %v3343_v56  ;;  %v3527_v43 = vsel %vm1981_vm0, %v10748_v21, 0.0  ;;  %v12322_v50 = vld [vmem:[#allocation66_spill] sm:$0xff] }
 0x5ac   : > { %8134 = vpow2.f32 %v3373_v47  ;;  %v3264_v35 = vsub.f32 %v12322_v50, %v10634_v51  ;;  %v12325_v47 = vld [vmem:[#allocation68_spill] sm:$0xff] }
 0x5ad   : > { %8136 = vpow2.f32 %v3339_v55 }
 0x5ae   : > { %3474 = vadd.xlane.f32.xlu1 %v3473_v8  ;;  %8138 = vpow2.f32 %v3353_v4  ;;  %v3359_v61 = vmul.f32 1.442695, %v3264_v35  ;;  %v12324_v8 = vld [vmem:[#allocation67_spill] sm:$0xff] }
 0x5af   : > { %3507 = vadd.xlane.f32.xlu0 %v3506_v42  ;;  %v3268_v42 = vsub.f32 %v12324_v8, %v10655_v48  ;;  %8140 = vpow2.f32 %v3361_v54  ;;  %v12326_v35 = vld [vmem:[#allocation75_spill] sm:$0xff] }
 0x5b0   : > { %8142 = vpow2.f32 %v3359_v61 }
 0x5b1   : > { %v3367_v15 = vmul.f32 1.442695, %v3268_v42 }
 0x5b2   : > { %3471 = vadd.xlane.f32.xlu1 %v3470_v1  ;;  %v3262_v1 = vsub.f32 %v12325_v47, %v10677_v5 }
 0x5b3   : > { %3501 = vadd.xlane.f32.xlu0 %v3500_v24  ;;  %v10754_v46 = vpop.eup %8128  ;;  %8144 = vpow2.f32 %v3367_v15 }
 0x5b4   : > { %v10758_v10 = vpop.eup %8130  ;;  %v3497_v58 = vsel %vm1981_vm0, %v10754_v46, 0.0  ;;  %v3355_v55 = vmul.f32 1.442695, %v3262_v1  ;;  %v12329_v1 = vld [vmem:[#allocation77_spill] sm:$0xff] }
 0x5b5   : > { %v10764_v3 = vpop.eup %8132  ;;  %v3524_v57 = vsel %vm1981_vm0, %v10758_v10, 0.0 }
 0x5b6   : > { %3465 = vadd.xlane.f32.xlu1 %v3464_v18  ;;  %v10768_v63 = vpop.eup %8134  ;;  %v3494_v51 = vsel %vm1981_vm0, %v10764_v3, 0.0  ;;  %8146 = vpow2.f32 %v3355_v55 }
 0x5b7   : > { %3516 = vadd.xlane.f32.xlu0 %v3515_v32  ;;  %12323 = vst [vmem:[#allocation70_spill] sm:$0xff] %v10768_v63  ;;  %v10774_v56 = vpop.eup %8136  ;;  %v3539_v2 = vsel %vm1981_vm0, %v10768_v63, 0.0 }
 0x5b8   : > { %v3488_v24 = vsel %vm1981_vm0, %v10774_v56, 0.0  ;;  %v10782_v48 = vpop.eup %8138 }
 0x5b9   : > { %v3509_v12 = vsel %vm1981_vm0, %v10782_v48, 0.0  ;;  %v10786_v14 = vpop.eup %8140 }
 0x5ba   : > { %3504 = vadd.xlane.f32.xlu1 %v3503_v17  ;;  %v3521_v18 = vsel %vm1981_vm0, %v10786_v14, 0.0  ;;  %v10790_v32 = vpop.eup %8142 }
 0x5bb   : > { %3528 = vadd.xlane.f32.xlu0 %v3527_v43  ;;  %v3518_v5 = vsel %vm1981_vm0, %v10790_v32, 0.0  ;;  %v3160_v43 = vpop.xlane.xlu1 %3159 }
 0x5bd   : > { %v10794_v4 = vpop.eup %8144 }
 0x5be   : > { %3498 = vadd.xlane.f32.xlu1 %v3497_v58  ;;  %v3530_v52 = vsel %vm1981_vm0, %v10794_v4, 0.0 }
 0x5bf   : > { %3525 = vadd.xlane.f32.xlu0 %v3524_v57  ;;  %v12327_v57 = vld [vmem:[#allocation71_spill] sm:$0xff] }
 0x5c0   : > { %v10798_v31 = vpop.eup %8146  ;;  %v3272_v61 = vsub.f32 %v12327_v57, %v3160_v43  ;;  %v12332_v57 = vld [vmem:[#allocation81_spill] sm:$0xff] }
 0x5c1   : > { %v3512_v17 = vsel %vm1981_vm0, %v10798_v31, 0.0 }
 0x5c2   : > { %3495 = vadd.xlane.f32.xlu1 %v3494_v51  ;;  %v12328_v51 = vld [vmem:[#allocation76_spill] sm:$0xff]  ;;  %v3375_v47 = vmul.f32 1.442695, %v3272_v61 }
 0x5c3   : > { %3540 = vadd.xlane.f32.xlu0 %v3539_v2  ;;  %v12334_v61 = vld [vmem:[#allocation80_spill] sm:$0xff] }
 0x5c6   : > { %3489 = vadd.xlane.f32.xlu1 %v3488_v24 }
 0x5ca   : > { %3510 = vadd.xlane.f32.xlu1 %v3509_v12 }
 0x5ce   : > { %3522 = vadd.xlane.f32.xlu1 %v3521_v18  ;;  %v12330_v18 = vld [vmem:[#allocation79_spill] sm:$0xff] }
 0x5d2   : > { %3519 = vadd.xlane.f32.xlu1 %v3518_v5 }
 0x5d6   : > { %3531 = vadd.xlane.f32.xlu1 %v3530_v52 }
 0x5da   : > { %3513 = vadd.xlane.f32.xlu1 %v3512_v17 }
 0x5e7   : > { %v3169_v50 = vpop.xlane.xlu0 %3168 }
 0x5e8   : > { %v3275_v54 = vsub.f32 %v12326_v35, %v3169_v50  ;;  %v12331_v50 = vld [vmem:[#allocation78_spill] sm:$0xff] }
 0x5e9   : > { %v3172_v58 = vpop.xlane.xlu1 %3171 }
 0x5ea   : > { %v3381_v8 = vmul.f32 1.442695, %v3275_v54  ;;  %v3276_v24 = vsub.f32 %v12329_v1, %v3172_v58 }
 0x5eb   : > { %v3151_v42 = vpop.xlane.xlu0 %3150 }
 0x5ec   : > { %8148 = vpow2.f32 %v3381_v8  ;;  %v3269_v2 = vsub.f32 %v12328_v51, %v3151_v42  ;;  %v3383_v17 = vmul.f32 1.442695, %v3276_v24  ;;  %v12335_v24 = vld [vmem:[#allocation83_spill] sm:$0xff] }
 0x5ed   : > { %v3154_v15 = vpop.xlane.xlu1 %3153 }
 0x5ee   : > { %v3369_v55 = vmul.f32 1.442695, %v3269_v2  ;;  %v3270_v35 = vsub.f32 %v12331_v50, %v3154_v15 }
 0x5ef   : > { %v3163_v12 = vpop.xlane.xlu0 %3162 }
 0x5f0   : > { %8150 = vpow2.f32 %v3369_v55  ;;  %v3273_v5 = vsub.f32 %v12330_v18, %v3163_v12  ;;  %v3371_v58 = vmul.f32 1.442695, %v3270_v35  ;;  %v12338_v35 = vld [vmem:[#allocation84_spill] sm:$0xff] }
 0x5f1   : > { %v3166_v52 = vpop.xlane.xlu1 %3165  ;;  %8152 = vpow2.f32 %v3375_v47 }
 0x5f2   : > { %v3377_v43 = vmul.f32 1.442695, %v3273_v5  ;;  %v3274_v2 = vsub.f32 %v12334_v61, %v3166_v52 }
 0x5f3   : > { %v3181_v54 = vpop.xlane.xlu0 %3180 }
 0x5f4   : > { %8154 = vpow2.f32 %v3377_v43  ;;  %v3279_v8 = vsub.f32 %v12332_v57, %v3181_v54  ;;  %v3379_v18 = vmul.f32 1.442695, %v3274_v2 }
 0x5f5   : > { %v3184_v42 = vpop.xlane.xlu1 %3183  ;;  %8156 = vpow2.f32 %v3383_v17 }
 0x5f6   : > { %v10809_v51 = vpop.eup %8148  ;;  %v3389_v1 = vmul.f32 1.442695, %v3279_v8  ;;  %v12340_v8 = vld [vmem:[#allocation82_spill] sm:$0xff] }
 0x5f7   : > { %12333 = vst [vmem:[#allocation43_spill] sm:$0xff] %v10809_v51  ;;  %v3193_v55 = vpop.xlane.xlu0 %3192  ;;  %v3551_v47 = vsel %vm1981_vm0, %v10809_v51, 0.0  ;;  %v3280_v61 = vsub.f32 %v12340_v8, %v3184_v42 }
 0x5f8   : > { %8158 = vpow2.f32 %v3389_v1  ;;  %v3283_v15 = vsub.f32 %v12335_v24, %v3193_v55  ;;  %3552 = vadd.xlane.f32.xlu0 %v3551_v47 }
 0x5f9   : > { %8160 = vpow2.f32 %v3371_v58 }
 0x5fa   : > { %v10815_v12 = vpop.eup %8150  ;;  %v3397_v5 = vmul.f32 1.442695, %v3283_v15  ;;  %v3196_v50 = vpop.xlane.xlu1 %3195  ;;  %v12342_v15 = vld [vmem:[#allocation87_spill] sm:$0xff] }
 0x5fb   : > { %12336 = vst [vmem:[#allocation65_spill] sm:$0xff] %v10815_v12  ;;  %v3175_v43 = vpop.xlane.xlu0 %3174  ;;  %v3533_v17 = vsel %vm1981_vm0, %v10815_v12, 0.0  ;;  %v10819_v52 = vpop.eup %8152 }
 0x5fc   : > { %12337 = vst [vmem:[#allocation69_spill] sm:$0xff] %v10819_v52  ;;  %8162 = vpow2.f32 %v3397_v5  ;;  %v3277_v54 = vsub.f32 %v12338_v35, %v3175_v43  ;;  %3534 = vadd.xlane.f32.xlu0 %v3533_v17  ;;  %v3542_v55 = vsel %vm1981_vm0, %v10819_v52, 0.0  ;;  %v12344_v17 = vld [vmem:[#allocation85_spill] sm:$0xff] }
 0x5fd   : > { %8164 = vpow2.f32 %v3379_v18  ;;  %v3391_v18 = vmul.f32 1.442695, %v3280_v61  ;;  %v3284_v42 = vsub.f32 %v12344_v17, %v3196_v50 }
 0x5fe   : > { %v10822_v57 = vpop.eup %8154  ;;  %v3385_v1 = vmul.f32 1.442695, %v3277_v54  ;;  %v3178_v58 = vpop.xlane.xlu1 %3177 }
 0x5ff   : > { %12339 = vst [vmem:[#allocation62_spill] sm:$0xff] %v10822_v57  ;;  %v3187_v2 = vpop.xlane.xlu0 %3186  ;;  %v3545_v47 = vsel %vm1981_vm0, %v10822_v57, 0.0  ;;  %v10829_v24 = vpop.eup %8156  ;;  %v3399_v50 = vmul.f32 1.442695, %v3284_v42 }
 0x600   : > { %12341 = vst [vmem:[#allocation74_spill] sm:$0xff] %v10829_v24  ;;  %v3281_v5 = vsub.f32 %v12342_v15, %v3187_v2  ;;  %3543 = vadd.xlane.f32.xlu0 %v3542_v55  ;;  %3546 = vadd.xlane.f32.xlu1 %v3545_v47  ;;  %8166 = vpow2.f32 %v3385_v1  ;;  %v3554_v51 = vsel %vm1981_vm0, %v10829_v24, 0.0  ;;  %v12346_v2 = vld [vmem:[#allocation89_spill] sm:$0xff]  ;;  %v12348_v1 = vld [vmem:[#allocation86_spill] sm:$0xff] }
 0x601   : > { %v3278_v47 = vsub.f32 %v12348_v1, %v3178_v58  ;;  %v12351_v58 = vld [vmem:[#allocation88_spill] sm:$0xff] }
 0x602   : > { %v10832_v43 = vpop.eup %8158  ;;  %v3393_v35 = vmul.f32 1.442695, %v3281_v5  ;;  %v3190_v54 = vpop.xlane.xlu1 %3189 }
 0x603   : > { %12343 = vst [vmem:[#allocation64_spill] sm:$0xff] %v10832_v43  ;;  %v3205_v8 = vpop.xlane.xlu0 %3204  ;;  %v3563_v57 = vsel %vm1981_vm0, %v10832_v43, 0.0  ;;  %v10839_v63 = vpop.eup %8160  ;;  %v3282_v42 = vsub.f32 %v12351_v58, %v3190_v54 }
 0x604   : > { %12345 = vst [vmem:[#allocation72_spill] sm:$0xff] %v10839_v63  ;;  %8168 = vpow2.f32 %v3393_v35  ;;  %v3287_v55 = vsub.f32 %v12346_v2, %v3205_v8  ;;  %3555 = vadd.xlane.f32.xlu0 %v3554_v51  ;;  %3564 = vadd.xlane.f32.xlu1 %v3563_v57  ;;  %v3536_v24 = vsel %vm1981_vm0, %v10839_v63, 0.0  ;;  %v12350_v51 = vld [vmem:[#allocation90_spill] sm:$0xff] }
 0x605   : > { %8170 = vpow2.f32 %v3391_v18  ;;  %v3387_v18 = vmul.f32 1.442695, %v3278_v47 }
 0x606   : > { %v10842_v61 = vpop.eup %8162  ;;  %v3405_v15 = vmul.f32 1.442695, %v3287_v55 }
 0x607   : > { %12347 = vst [vmem:[#allocation73_spill] sm:$0xff] %v10842_v61  ;;  %v10845_v5 = vpop.xlane.xlu1 %3216  ;;  %v3199_v17 = vpop.xlane.xlu0 %3198  ;;  %v3575_v35 = vsel %vm1981_vm0, %v10842_v61, 0.0 }
 0x608   : > { %v10851_v43 = vpop.eup %8164  ;;  %8172 = vpow2.f32 %v3405_v15  ;;  %v3285_v57 = vsub.f32 %v12350_v51, %v3199_v17  ;;  %3537 = vadd.xlane.f32.xlu0 %v3536_v24  ;;  %3576 = vadd.xlane.f32.xlu1 %v3575_v35  ;;  %v3395_v24 = vmul.f32 1.442695, %v3282_v42 }
 0x609   : > { %12349 = vst [vmem:[#allocation66_spill] sm:$0xff] %v10851_v43  ;;  %8174 = vpow2.f32 %v3399_v50  ;;  %v3548_v1 = vsel %vm1981_vm0, %v10851_v43, 0.0 }
 0x60a   : > { %v3401_v8 = vmul.f32 1.442695, %v3285_v57  ;;  %v10861_v61 = vpop.eup %8166 }
 0x60b   : > { %v10855_v2 = vpop.xlane.xlu1 %3210  ;;  %v10857_v55 = vpop.xlane.xlu0 %3231  ;;  %12352 = vst [vmem:[#allocation67_spill] sm:$0xff] %v10861_v61  ;;  %v3557_v54 = vsel %vm1981_vm0, %v10861_v61, 0.0 }
 0x60c   : > { %3549 = vadd.xlane.f32.xlu0 %v3548_v1  ;;  %8176 = vpow2.f32 %v3401_v8 }
 0x60d   : > { %8178 = vpow2.f32 %v3387_v18 }
 0x60e   : > { %v10863_v15 = vpop.eup %8168  ;;  %8180 = vpow2.f32 %v3395_v24 }
 0x60f   : > { %12353 = vst [vmem:[#allocation68_spill] sm:$0xff] %v10863_v15  ;;  %v3208_v50 = vpop.xlane.xlu1 %3207  ;;  %v10865_v47 = vpop.xlane.xlu0 %3225  ;;  %v3569_v17 = vsel %vm1981_vm0, %v10863_v15, 0.0 }
 0x610   : > { %12354 = vst [vmem:[#allocation75_spill] sm:$0xff] %v10865_v47  ;;  %v10871_v35 = vpop.eup %8170  ;;  %v3288_v51 = vsub.f32 %v10539_v60, %v3208_v50  ;;  %3558 = vadd.xlane.f32.xlu0 %v3557_v54  ;;  %3570 = vadd.xlane.f32.xlu1 %v3569_v17 }
 0x611   : > { %12355 = vst [vmem:[#allocation71_spill] sm:$0xff] %v10871_v35  ;;  %v3566_v8 = vsel %vm1981_vm0, %v10871_v35, 0.0 }
 0x612   : > { %v10874_v57 = vpop.eup %8172  ;;  %v3407_v18 = vmul.f32 1.442695, %v3288_v51 }
 0x613   : > { %12356 = vst [vmem:[#allocation76_spill] sm:$0xff] %v10874_v57  ;;  %v10876_v58 = vpop.xlane.xlu1 %3219  ;;  %v3445_v42 = vpop.xlane.xlu0 %3444  ;;  %v3587_v1 = vsel %vm1981_vm0, %v10874_v57, 0.0 }
 0x614   : > { %v10882_v15 = vpop.eup %8174  ;;  %3567 = vadd.xlane.f32.xlu0 %v3566_v8  ;;  %3588 = vadd.xlane.f32.xlu1 %v3587_v1  ;;  %8182 = vpow2.f32 %v3407_v18 }
 0x615   : > { %12357 = vst [vmem:[#allocation77_spill] sm:$0xff] %v10882_v15  ;;  %v3578_v24 = vsel %vm1981_vm0, %v10882_v15, 0.0 }
 0x616   : > { %v10884_v60 = vpop.eup %8176 }
 0x617   : > { %12358 = vst [vmem:[#allocation79_spill] sm:$0xff] %v10884_v60  ;;  %v3202_v50 = vpop.xlane.xlu1 %3201  ;;  %v3439_v54 = vpop.xlane.xlu0 %3438  ;;  %v3581_v57 = vsel %vm1981_vm0, %v10884_v60, 0.0 }
 0x618   : > { %v10888_v17 = vpop.eup %8178  ;;  %v3286_v51 = vsub.f32 %v10582_v13, %v3202_v50  ;;  %3579 = vadd.xlane.f32.xlu0 %v3578_v24  ;;  %3582 = vadd.xlane.f32.xlu1 %v3581_v57 }
 0x619   : > { %12359 = vst [vmem:[#allocation78_spill] sm:$0xff] %v10888_v17  ;;  %v3560_v1 = vsel %vm1981_vm0, %v10888_v17, 0.0  ;;  %v10897_v35 = vpop.eup %8180 }
 0x61a   : > { %v3403_v61 = vmul.f32 1.442695, %v3286_v51  ;;  %12360 = vst [vmem:[#allocation81_spill] sm:$0xff] %v10897_v35  ;;  %v3572_v13 = vsel %vm1981_vm0, %v10897_v35, 0.0 }
 0x61b   : > { %v10893_v8 = vpop.xlane.xlu1 %3213  ;;  %v3460_v18 = vpop.xlane.xlu0 %3459 }
 0x61c   : > { %8184 = vpow2.f32 %v3403_v61  ;;  %3561 = vadd.xlane.f32.xlu0 %v3560_v1 }
 0x61e   : > { %v10903_v50 = vpop.eup %8182 }
 0x61f   : > { %v10899_v15 = vpop.xlane.xlu1 %3228  ;;  %v3454_v43 = vpop.xlane.xlu0 %3453  ;;  %12362 = vst [vmem:[#allocation83_spill] sm:$0xff] %v10903_v50  ;;  %v3590_v51 = vsel %vm1981_vm0, %v10903_v50, 0.0 }
 0x620   : > { %12361 = vst [vmem:[#allocation80_spill] sm:$0xff] %v10899_v15  ;;  %3573 = vadd.xlane.f32.xlu0 %v3572_v13  ;;  %v12364_v13 = vld [vmem:[#allocation44_spill] sm:$0xff] }
 0x623   : > { %v10905_v57 = vpop.xlane.xlu1 %3222  ;;  %v10907_v24 = vpop.xlane.xlu0 %3468 }
 0x624   : > { %3591 = vadd.xlane.f32.xlu0 %v3590_v51 }
 0x626   : > { %v10911_v60 = vpop.eup %8184 }
 0x627   : > { %12363 = vst [vmem:[#allocation84_spill] sm:$0xff] %v10911_v60  ;;  %v3457_v61 = vpop.xlane.xlu1 %3456  ;;  %v3463_v1 = vpop.xlane.xlu0 %3462  ;;  %v3584_v17 = vsel %vm1981_vm0, %v10911_v60, 0.0 }
 0x628   : > { %3585 = vadd.xlane.f32.xlu0 %v3584_v17  ;;  %8186 = vrcp.f32 %v3457_v61 }
 0x629   : > { %8188 = vrcp.f32 %v3454_v43  ;;  %1943 = vrot.lane.b32.xlu1 %v12364_v13, %s8793_s19 }
 0x62a   : > { %8190 = vrcp.f32 %v3460_v18  ;;  %v3289_v18 = vsub.f32 %v10526_v40, %v10855_v2 }
 0x62b   : > { %v3451_v35 = vpop.xlane.xlu1 %3450  ;;  %v3484_v63 = vpop.xlane.xlu0 %3483 }
 0x62c   : > { %8192 = vrcp.f32 %v3451_v35 }
 0x62f   : > { %v3448_v12 = vpop.xlane.xlu1 %3447 }
 0x630   : > { %v3478_v50 = vpop.xlane.xlu0 %3477  ;;  %8194 = vrcp.f32 %v3448_v12 }
 0x631   : > { %8196 = vrcp.f32 %v3439_v54 }
 0x632   : > { %v8187_v51 = vpop.eup %8186  ;;  %8198 = vrcp.f32 %v3445_v42  ;;  %v3292_v42 = vsub.f32 %v10563_v59, %v10876_v58 }
 0x633   : > { %v3442_v52 = vpop.xlane.xlu1 %3441  ;;  %v8189_v53 = vpop.eup %8188  ;;  %v3691_v61 = vmul.f32 %v8187_v51, %v10624_v45  ;;  %v3409_v51 = vmul.f32 1.442695, %v3289_v18  ;;  %v12368_v18 = vld [vmem:[#allocation50_spill] sm:$0xff] }
 0x634   : > { %8200 = vrcp.f32 %v3442_v52  ;;  %v10917_v60 = vpop.xlane.xlu0 %3492  ;;  %v8191_v17 = vpop.eup %8190  ;;  %v3690_v12 = vmul.f32 %v8189_v53, %v10607_v38  ;;  %v3415_v2 = vmul.f32 1.442695, %v3292_v42  ;;  %v12365_v38 = vld [vmem:[#allocation42_spill] sm:$0xff]  ;;  %v12370_v42 = vld [vmem:[#allocation91_spill] sm:$0xff] }
 0x635   : > { %v3692_v54 = vmul.f32 %v8191_v17, %v10584_v34 }
 0x636   : > { %v8193_v43 = vpop.eup %8192 }
 0x637   : > { %v3481_v47 = vpop.xlane.xlu1 %3480  ;;  %v3689_v35 = vmul.f32 %v8193_v43, %v10628_v26  ;;  %v3750_v15 = vpack.c.bf16 %v3692_v54, %v3691_v61  ;;  %v3291_v54 = vsub.f32 %v12370_v42, %v10845_v5  ;;  %v12371_v5 = vld [vmem:[#allocation54_spill] sm:$0xff] }
 0x638   : > { %8202 = vrcp.f32 %v3481_v47  ;;  %v10927_v52 = vpop.xlane.xlu0 %3486  ;;  %v12366_v47 = vld [vmem:[#allocation45_spill] sm:$0xff] }
 0x639   : > { %v3749_v62 = vpack.c.bf16 %v3690_v12, %v3689_v35  ;;  %8204 = vrcp.f32 %v3478_v50  ;;  %v12369_v12 = vld [vmem:[#allocation49_spill] sm:$0xff] }
 0x63a   : > { %v8195_v45 = vpop.eup %8194  ;;  %8206 = vrcp.f32 %v3484_v63 }
 0x63b   : > { %v3475_v40 = vpop.xlane.xlu1 %3474  ;;  %7553 = vmatprep.mubr.msk.bf16.mxu0 %vm1981_vm0, %v3749_v62  ;;  %v8197_v26 = vpop.eup %8196  ;;  %v3688_v34 = vmul.f32 %v8195_v45, %v10668_v6  ;;  %v12367_v6 = vld [vmem:[#allocation57_spill] sm:$0xff] }
 0x63c   : > { %8208 = vrcp.f32 %v3475_v40  ;;  %7554 = vmatmul.mubr.msk.bf16.vlgmr.msra.gmra.mrb[68].mxu0 %vm1981_vm0, %v3750_v15  ;;  %v8199_v53 = vpop.eup %8198  ;;  %v3508_v63 = vpop.xlane.xlu0 %3507  ;;  %v3685_v62 = vmul.f32 %v8197_v26, %v10577_v9  ;;  %v3290_v40 = vsub.f32 %v10592_v49, %v10893_v8 }
 0x63d   : > { %7566 = vmatpush3.bf16.msra.mxu0 %v12314_v28  ;;  %8210 = vpow2.f32 %v3409_v51  ;;  %v3687_v15 = vmul.f32 %v8199_v53, %v10557_v19 }
 0x63e   : > { %v8201_v59 = vpop.eup %8200  ;;  %7567 = vmatprep.subr.bf16.mxu0 %v12365_v38  ;;  %1941 = vrot.lane.b32.xlu0 %v12366_v47, %s8793_s19  ;;  %8212 = vpow2.f32 %v3415_v2  ;;  %v3411_v8 = vmul.f32 1.442695, %v3290_v40 }
 0x63f   : > { %v3472_v58 = vpop.xlane.xlu1 %3471  ;;  %v3686_v50 = vmul.f32 %v8201_v59, %v10685_v44  ;;  %v3748_v17 = vpack.c.bf16 %v3688_v34, %v3687_v15  ;;  %v3413_v34 = vmul.f32 1.442695, %v3291_v54 }
 0x640   : > { %8214 = vrcp.f32 %v3472_v58  ;;  %v3502_v19 = vpop.xlane.xlu0 %3501 }
 0x641   : > { %7568 = vmatpush3.bf16.msra.mxu0 %v12365_v38  ;;  %v3747_v28 = vpack.c.bf16 %v3686_v50, %v3685_v62  ;;  %8216 = vrcp.f32 %v3463_v1 }
 0x642   : > { %7581 = vmatprep.subr.bf16.mxu0 %v12367_v6  ;;  %v8203_v43 = vpop.eup %8202  ;;  %8218 = vrcp.f32 %v10907_v24 }
 0x643   : > { %v3466_v61 = vpop.xlane.xlu1 %3465  ;;  %7545 = vmatprep.mubr.msk.bf16.mxu1 %vm1981_vm0, %v3747_v28  ;;  %v8205_v9 = vpop.eup %8204  ;;  %v3699_v1 = vmul.f32 %v8203_v43, %v10701_v23 }
 0x644   : > { %8220 = vrcp.f32 %v3466_v61  ;;  %7546 = vmatmul.mubr.msk.bf16.vlgmr.msra.gmra.mrb[48].mxu1 %vm1981_vm0, %v3748_v17  ;;  %v8207_v44 = vpop.eup %8206  ;;  %v3698_v51 = vmul.f32 %v8205_v9, %v10672_v11  ;;  %v10960_v11 = vpop.xlane.xlu0 %3516 }
 0x645   : > { %7558 = vmatpush3.bf16.msra.mxu1 %v12368_v18  ;;  %v3700_v26 = vmul.f32 %v8207_v44, %v10636_v27  ;;  %v12373_v18 = vld [vmem:[#allocation51_spill] sm:$0xff] }
 0x646   : > { %v8209_v35 = vpop.eup %8208  ;;  %7559 = vmatprep.subr.bf16.mxu1 %v12369_v12 }
 0x647   : > { %v3505_v24 = vpop.xlane.xlu1 %3504  ;;  %v3697_v45 = vmul.f32 %v8209_v35, %v10713_v36  ;;  %v10954_v2 = vpop.eup %8210  ;;  %v3754_v59 = vpack.c.bf16 %v3700_v26, %v3699_v1 }
 0x648   : > { %8222 = vrcp.f32 %v3505_v24  ;;  %v10957_v53 = vpop.eup %8212  ;;  %v3593_v58 = vsel %vm1981_vm0, %v10954_v2, 0.0  ;;  %v3529_v61 = vpop.xlane.xlu0 %3528 }
 0x649   : > { %7560 = vmatpush3.bf16.msra.mxu1 %v12369_v12  ;;  %v3753_v23 = vpack.c.bf16 %v3698_v51, %v3697_v45  ;;  %8224 = vrcp.f32 %v3502_v19  ;;  %v12374_v51 = vld [vmem:[#allocation55_spill] sm:$0xff] }
 0x64a   : > { %7573 = vmatprep.subr.bf16.mxu1 %v12371_v5  ;;  %v8215_v36 = vpop.eup %8214  ;;  %8226 = vrcp.f32 %v3508_v63  ;;  %v12372_v63 = vld [vmem:[#allocation53_spill] sm:$0xff] }
 0x64b   : > { %v3499_v49 = vpop.xlane.xlu1 %3498  ;;  %7569 = vmatprep.mubr.msk.bf16.mxu0 %vm1981_vm0, %v3753_v23  ;;  %v8217_v27 = vpop.eup %8216  ;;  %v3696_v50 = vmul.f32 %v8215_v36, %v10724_v0 }
 0x64c   : > { %8228 = vrcp.f32 %v3499_v49  ;;  %7570 = vmatmul.mubr.msk.bf16.vlgmr.msra.gmra.mrb[72].mxu0 %vm1981_vm0, %v3754_v59  ;;  %v8219_v38 = vpop.eup %8218  ;;  %v3693_v28 = vmul.f32 %v8217_v27, %v10642_v7  ;;  %v3526_v35 = vpop.xlane.xlu0 %3525 }
 0x64d   : > { %7582 = vmatpush3.bf16.msra.mxu0 %v12367_v6  ;;  %3594 = vadd.xlane.f32.xlu1 %v3593_v58  ;;  %8230 = vpow2.f32 %v3413_v34  ;;  %v3695_v43 = vmul.f32 %v8219_v38, %v10622_v25  ;;  %v3602_v6 = vsel %vm1981_vm0, %v10957_v53, 0.0 }
 0x64e   : > { %v8221_v62 = vpop.eup %8220  ;;  %7583 = vmatprep.subr.bf16.mxu0 %v12372_v63  ;;  %8232 = vpow2.f32 %v3411_v8 }
 0x64f   : > { %v3496_v15 = vpop.xlane.xlu1 %3495  ;;  %v3694_v17 = vmul.f32 %v8221_v62, %v10734_v16  ;;  %v3752_v9 = vpack.c.bf16 %v3696_v50, %v3695_v43 }
 0x650   : > { %8234 = vrcp.f32 %v3496_v15 }
 0x651   : > { %7584 = vmatpush3.bf16.msra.mxu0 %v12372_v63  ;;  %v3751_v0 = vpack.c.bf16 %v3694_v17, %v3693_v28  ;;  %8236 = vrcp.f32 %v10927_v52  ;;  %3603 = vadd.xlane.f32.xlu1 %v3602_v6  ;;  %v12377_v63 = vld [vmem:[#allocation59_spill] sm:$0xff] }
 0x652   : > { %7597 = vmatprep.subr.bf16.mxu0 %v12366_v47  ;;  %v8223_v7 = vpop.eup %8222  ;;  %8238 = vrcp.f32 %v10917_v60 }
 0x653   : > { %v3490_v16 = vpop.xlane.xlu1 %3489  ;;  %7561 = vmatprep.mubr.msk.bf16.mxu1 %vm1981_vm0, %v3751_v0  ;;  %v8225_v25 = vpop.eup %8224  ;;  %v3707_v52 = vmul.f32 %v8223_v7, %v10744_v41 }
 0x654   : > { %8240 = vrcp.f32 %v3490_v16  ;;  %7562 = vmatmul.mubr.msk.bf16.vlgmr.msra.gmra.mrb[52].mxu1 %vm1981_vm0, %v3752_v9  ;;  %v8227_v44 = vpop.eup %8226  ;;  %v3706_v60 = vmul.f32 %v8225_v25, %v10728_v39 }
 0x655   : > { %7574 = vmatpush3.bf16.msra.mxu1 %v12371_v5  ;;  %v3708_v42 = vmul.f32 %v8227_v44, %v10717_v22  ;;  %8242 = vrcp.f32 %v3526_v35  ;;  %v3296_v44 = vsub.f32 %v10522_v29, %v10857_v55  ;;  %v12380_v55 = vld [vmem:[#allocation60_spill] sm:$0xff] }
 0x656   : > { %v8229_v19 = vpop.eup %8228  ;;  %7575 = vmatprep.subr.bf16.mxu1 %v12373_v18  ;;  %v12381_v35 = vld [vmem:[#allocation80_spill] sm:$0xff] }
 0x657   : > { %v3511_v1 = vpop.xlane.xlu1 %3510  ;;  %v3705_v12 = vmul.f32 %v8229_v19, %v10754_v46  ;;  %v10986_v54 = vpop.eup %8230  ;;  %v3758_v41 = vpack.c.bf16 %v3708_v42, %v3707_v52  ;;  %v3423_v29 = vmul.f32 1.442695, %v3296_v44 }
 0x658   : > { %v10989_v45 = vpop.eup %8232  ;;  %v3599_v22 = vsel %vm1981_vm0, %v10986_v54, 0.0 }
 0x659   : > { %7576 = vmatpush3.bf16.msra.mxu1 %v12373_v18  ;;  %v3757_v24 = vpack.c.bf16 %v3706_v60, %v3705_v12  ;;  %v3596_v27 = vsel %vm1981_vm0, %v10989_v45, 0.0  ;;  %v3541_v60 = vpop.xlane.xlu0 %3540 }
 0x65a   : > { %7589 = vmatprep.subr.bf16.mxu1 %v12374_v51  ;;  %v8235_v40 = vpop.eup %8234 }
 0x65b   : > { %v3523_v26 = vpop.xlane.xlu1 %3522  ;;  %7585 = vmatprep.mubr.msk.bf16.mxu0 %vm1981_vm0, %v3757_v24  ;;  %v8237_v46 = vpop.eup %8236  ;;  %v3704_v5 = vmul.f32 %v8235_v40, %v10764_v3  ;;  %v12375_v3 = vld [vmem:[#allocation46_spill] sm:$0xff]  ;;  %v12383_v24 = vld [vmem:[#allocation75_spill] sm:$0xff] }
 0x65c   : > { %8244 = vrcp.f32 %v3523_v26  ;;  %7586 = vmatmul.mubr.msk.bf16.vlgmr.msra.gmra.mrb[76].mxu0 %vm1981_vm0, %v3758_v41  ;;  %v8239_v39 = vpop.eup %8238  ;;  %v3701_v36 = vmul.f32 %v8237_v46, %v10706_v20 }
 0x65d   : > { %7598 = vmatpush3.bf16.msra.mxu0 %v12366_v47  ;;  %3600 = vadd.xlane.f32.xlu0 %v3599_v22  ;;  %v3703_v49 = vmul.f32 %v8239_v39, %v10690_v37  ;;  %8246 = vrcp.f32 %v3529_v61 }
 0x65e   : > { %v8241_v23 = vpop.eup %8240  ;;  %7599 = vmatprep.subr.bf16.mxu0 %v12364_v13 }
 0x65f   : > { %v3520_v59 = vpop.xlane.xlu1 %3519  ;;  %v3702_v34 = vmul.f32 %v8241_v23, %v10774_v56  ;;  %v3756_v8 = vpack.c.bf16 %v3704_v5, %v3703_v49  ;;  %v8243_v20 = vpop.eup %8242  ;;  %v12376_v56 = vld [vmem:[#allocation52_spill] sm:$0xff] }
 0x660   : > { %v3714_v62 = vmul.f32 %v8243_v20, %v10758_v10  ;;  %v3293_v10 = vsub.f32 %v10616_v33, %v10905_v57 }
 0x661   : > { %7600 = vmatpush3.bf16.msra.mxu0 %v12364_v13  ;;  %3597 = vadd.xlane.f32.xlu0 %v3596_v27  ;;  %v3755_v47 = vpack.c.bf16 %v3702_v34, %v3701_v36 }
 0x662   : > { %1947 = vrot.lane.b32.xlu1 %v12375_v3, %s8793_s19  ;;  %v3417_v33 = vmul.f32 1.442695, %v3293_v10 }
 0x663   : > { %v3532_v38 = vpop.xlane.xlu1 %3531  ;;  %7577 = vmatprep.mubr.msk.bf16.mxu1 %vm1981_vm0, %v3755_v47 }
 0x664   : > { %8248 = vrcp.f32 %v3532_v38  ;;  %7578 = vmatmul.mubr.msk.bf16.vlgmr.msra.gmra.mrb[56].mxu1 %vm1981_vm0, %v3756_v8 }
 0x665   : > { %8250 = vrcp.f32 %v3520_v59  ;;  %7590 = vmatpush3.bf16.msra.mxu1 %v12374_v51  ;;  %v12384_v51 = vld [vmem:[#allocation92_spill] sm:$0xff] }
 0x666   : > { %v8245_v37 = vpop.eup %8244  ;;  %8252 = vrcp.f32 %v3511_v1  ;;  %7591 = vmatprep.subr.bf16.mxu1 %v12376_v56  ;;  %v12382_v1 = vld [vmem:[#allocation93_spill] sm:$0xff]  ;;  %v3294_v41 = vsub.f32 %v12384_v51, %v12383_v24 }
 0x667   : > { %8254 = vrcp.f32 %v10960_v11  ;;  %v3514_v13 = vpop.xlane.xlu1 %3513  ;;  %v3713_v58 = vmul.f32 %v8245_v37, %v10786_v14  ;;  %v8247_v15 = vpop.eup %8246  ;;  %v3295_v12 = vsub.f32 %v12382_v1, %v12381_v35  ;;  %v12391_v35 = vld [vmem:[#allocation58_spill] sm:$0xff] }
 0x668   : > { %8256 = vrcp.f32 %v3514_v13  ;;  %v3715_v43 = vmul.f32 %v8247_v15, %v10748_v21  ;;  %v3419_v39 = vmul.f32 1.442695, %v3294_v41 }
 0x669   : > { %7592 = vmatpush3.bf16.msra.mxu1 %v12376_v56  ;;  %v3761_v50 = vpack.c.bf16 %v3714_v62, %v3713_v58  ;;  %8258 = vpow2.f32 %v3417_v33  ;;  %v3421_v40 = vmul.f32 1.442695, %v3295_v12  ;;  %v12389_v33 = vld [vmem:[#allocation62_spill] sm:$0xff] }
 0x66a   : > { %7605 = vmatprep.subr.bf16.mxu1 %v12377_v63  ;;  %8260 = vpow2.f32 %v3423_v29 }
 0x66b   : > { %7601 = vmatprep.mubr.msk.bf16.mxu0 %vm1981_vm0, %v3761_v50  ;;  %8262 = vpow2.f32 %v3421_v40 }
 0x66c   : > { %8264 = vpow2.f32 %v3419_v39 }
 0x66e   : > { %v8249_v28 = vpop.eup %8248 }
 0x66f   : > { %v8251_v17 = vpop.eup %8250  ;;  %v3716_v11 = vmul.f32 %v8249_v28, %v10794_v4 }
 0x670   : > { %v8253_v61 = vpop.eup %8252  ;;  %v3712_v9 = vmul.f32 %v8251_v17, %v10790_v32 }
 0x671   : > { %v8255_v6 = vpop.eup %8254  ;;  %v3762_v14 = vpack.c.bf16 %v3716_v11, %v3715_v43  ;;  %v3709_v16 = vmul.f32 %v8253_v61, %v10782_v48  ;;  %v12386_v11 = vld [vmem:[#allocation65_spill] sm:$0xff] }
 0x672   : > { %v8257_v0 = vpop.eup %8256  ;;  %v3711_v21 = vmul.f32 %v8255_v6, %v10738_v30  ;;  %v12378_v30 = vld [vmem:[#allocation47_spill] sm:$0xff]  ;;  %v12387_v6 = vld [vmem:[#allocation72_spill] sm:$0xff] }
 0x673   : > { %v11022_v7 = vpop.f32.mrb[64].mxu0  ;;  %7602 = vmatmul.mubr.msk.bf16.vlgmr.msra.gmra.mrb[80].mxu0 %vm1981_vm0, %v3762_v14  ;;  %v3710_v25 = vmul.f32 %v8257_v0, %v10798_v31  ;;  %v12379_v31 = vld [vmem:[#allocation56_spill] sm:$0xff]  ;;  %v11050_v42 = vpop.eup %8258  ;;  %v12388_v14 = vld [vmem:[#allocation70_spill] sm:$0xff] }
 0x674   : > { %v11028_v4 = vpop.f32.mrb[65].mxu0  ;;  %v3760_v18 = vpack.c.bf16 %v3712_v9, %v3711_v21  ;;  %v3605_v46 = vsel %vm1981_vm0, %v11050_v42, 0.0  ;;  %v11058_v22 = vpop.eup %8260 }
 0x675   : > { %v11032_v57 = vpop.f32.mrb[66].mxu0  ;;  %v3759_v19 = vpack.c.bf16 %v3710_v25, %v3709_v16  ;;  %v3614_v5 = vsel %vm1981_vm0, %v11058_v22, 0.0  ;;  %v11062_v34 = vpop.eup %8262 }
 0x676   : > { %v4658_v32 = vpack.c.bf16 %v11032_v57, %v11022_v7  ;;  %v11036_v52 = vpop.f32.mrb[67].mxu0  ;;  %v3611_v47 = vsel %vm1981_vm0, %v11062_v34, 0.0  ;;  %v11066_v8 = vpop.eup %8264  ;;  %v7993_v7 = vld [vmem:[%s9347_s27 + $0x38] sm:$0xff]  }
 0x677   : > { %v4657_v48 = vpack.c.bf16 %v11036_v52, %v11028_v4  ;;  %1945 = vrot.lane.b32.xlu0 %v12378_v30, %s8793_s19  ;;  %7593 = vmatprep.mubr.msk.bf16.mxu1 %vm1981_vm0, %v3759_v19  ;;  %v3608_v20 = vsel %vm1981_vm0, %v11066_v8, 0.0 }
 0x678   : > { %7594 = vmatmul.mubr.msk.bf16.vlgmr.msra.gmra.mrb[60].mxu1 %vm1981_vm0, %v3760_v18  ;;  %v12390_v18 = vld [vmem:[#allocation66_spill] sm:$0xff] }
 0x679   : > { %7606 = vmatpush3.bf16.msra.mxu1 %v12377_v63  ;;  %v12385_v63 = vld [vmem:[#allocation69_spill] sm:$0xff] }
 0x67a   : > { %7607 = vmatprep.subr.bf16.mxu1 %v12379_v31 }
 0x67d   : > { %7608 = vmatpush3.bf16.msra.mxu1 %v12379_v31 }
 0x67e   : > { %7621 = vmatprep.subr.bf16.mxu1 %v12380_v55 }
 0x685   : > { %v11054_v26 = vpop.xlane.xlu0 %3552 }
 0x686   : > { %3606 = vadd.xlane.f32.xlu1 %v3605_v46 }
 0x689   : > { %v3535_v23 = vpop.xlane.xlu0 %3534 }
 0x68a   : > { %3615 = vadd.xlane.f32.xlu1 %v3614_v5 }
 0x68d   : > { %v3544_v59 = vpop.xlane.xlu0 %3543  ;;  %v3547_v49 = vpop.xlane.xlu1 %3546 }
 0x68e   : > { %8266 = vrcp.f32 %v3544_v59 }
 0x68f   : > { %8268 = vrcp.f32 %v3535_v23  ;;  %v12393_v23 = vld [vmem:[#allocation71_spill] sm:$0xff] }
 0x690   : > { %8270 = vrcp.f32 %v3541_v60  ;;  %v12392_v60 = vld [vmem:[#allocation63_spill] sm:$0xff] }
 0x691   : > { %v3556_v36 = vpop.xlane.xlu0 %3555  ;;  %v3565_v37 = vpop.xlane.xlu1 %3564 }
 0x695   : > { %v3538_v27 = vpop.xlane.xlu0 %3537  ;;  %v3577_v28 = vpop.xlane.xlu1 %3576 }
 0x696   : > { %3612 = vadd.xlane.f32.xlu0 %v3611_v47  ;;  %8272 = vrcp.f32 %v3538_v27  ;;  %v12395_v27 = vld [vmem:[#allocation78_spill] sm:$0xff] }
 0x697   : > { %8274 = vrcp.f32 %v3547_v49 }
 0x698   : > { %v8267_v13 = vpop.eup %8266 }
 0x699   : > { %v3550_v38 = vpop.xlane.xlu0 %3549  ;;  %v8269_v58 = vpop.eup %8268  ;;  %v3720_v15 = vmul.f32 %v8267_v13, %v12385_v63 }
 0x69a   : > { %8276 = vrcp.f32 %v3550_v38  ;;  %3609 = vadd.xlane.f32.xlu0 %v3608_v20  ;;  %v8271_v62 = vpop.eup %8270  ;;  %v3717_v61 = vmul.f32 %v8269_v58, %v12386_v11  ;;  %v12396_v38 = vld [vmem:[#allocation64_spill] sm:$0xff] }
 0x69b   : > { %1971 = vrot.lane.b32.xlu1 %v12375_v3, %s8792_s10  ;;  %v3719_v0 = vmul.f32 %v8271_v62, %v12388_v14 }
 0x69d   : > { %v3559_v56 = vpop.xlane.xlu0 %3558  ;;  %v3571_v25 = vpop.xlane.xlu1 %3570  ;;  %v3764_v44 = vpack.c.bf16 %v3720_v15, %v3719_v0  ;;  %v12397_v15 = vld [vmem:[#allocation74_spill] sm:$0xff] }
 0x6a0   : > { %v8273_v50 = vpop.eup %8272 }
 0x6a1   : > { %v3568_v17 = vpop.xlane.xlu0 %3567  ;;  %v8275_v43 = vpop.eup %8274  ;;  %v3718_v10 = vmul.f32 %v8273_v50, %v12387_v6 }
 0x6a2   : > { %v3721_v19 = vmul.f32 %v8275_v43, %v12389_v33  ;;  %8278 = vrcp.f32 %v3568_v17  ;;  %v3589_v12 = vpop.xlane.xlu1 %3588  ;;  %v12398_v43 = vld [vmem:[#allocation61_spill] sm:$0xff] }
 0x6a3   : > { %v3763_v16 = vpack.c.bf16 %v3718_v10, %v3717_v61  ;;  %8280 = vrcp.f32 %v3559_v56  ;;  %v12400_v10 = vld [vmem:[#allocation43_spill] sm:$0xff] }
 0x6a4   : > { %v8277_v9 = vpop.eup %8276  ;;  %8282 = vrcp.f32 %v3565_v37 }
 0x6a5   : > { %v3580_v21 = vpop.xlane.xlu0 %3579  ;;  %v3722_v29 = vmul.f32 %v8277_v9, %v12390_v18  ;;  %7609 = vmatprep.mubr.msk.bf16.mxu1 %vm1981_vm0, %v3763_v16  ;;  %v12401_v9 = vld [vmem:[#allocation68_spill] sm:$0xff] }
 0x6a6   : > { %7610 = vmatmul.mubr.msk.bf16.vlgmr.msra.gmra.mrb[64].mxu1 %vm1981_vm0, %v3764_v44 }
 0x6a7   : > { %v3765_v31 = vpack.c.bf16 %v3722_v29, %v3721_v19  ;;  %7622 = vmatpush3.bf16.msra.mxu1 %v12380_v55  ;;  %v3583_v55 = vpop.xlane.xlu1 %3582  ;;  %v12403_v29 = vld [vmem:[#allocation79_spill] sm:$0xff] }
 0x6a8   : > { %7623 = vmatprep.subr.bf16.mxu1 %v12391_v35 }
 0x6a9   : > { %7617 = vmatprep.mubr.msk.bf16.mxu0 %vm1981_vm0, %v3765_v31  ;;  %v3562_v1 = vpop.xlane.xlu0 %3561 }
 0x6aa   : > { %8284 = vrcp.f32 %v3562_v1 }
 0x6ab   : > { %7624 = vmatpush3.bf16.msra.mxu1 %v12391_v35  ;;  %8286 = vrcp.f32 %v3556_v36  ;;  %v12394_v36 = vld [vmem:[#allocation67_spill] sm:$0xff]  ;;  %v1944_v50 = vpop.permute.xlu1 %1943  ;;  %v12404_v35 = vld [vmem:[#allocation84_spill] sm:$0xff] }
 0x6ac   : > { %7637 = vmatprep.subr.bf16.mxu1 %v12392_v60  ;;  %v8279_v51 = vpop.eup %8278 }
 0x6ad   : > { %v3574_v24 = vpop.xlane.xlu0 %3573  ;;  %v8281_v40 = vpop.eup %8280  ;;  %v3728_v5 = vmul.f32 %v8279_v51, %v12393_v23 }
 0x6ae   : > { %8288 = vrcp.f32 %v3574_v24  ;;  %v8283_v46 = vpop.eup %8282  ;;  %v3725_v49 = vmul.f32 %v8281_v40, %v12394_v36 }
 0x6af   : > { %8290 = vrcp.f32 %v11054_v26  ;;  %v3727_v20 = vmul.f32 %v8283_v46, %v12396_v38  ;;  %v12407_v46 = vld [vmem:[#allocation73_spill] sm:$0xff] }
 0x6b0   : > { %1969 = vrot.lane.b32.xlu0 %v12378_v30, %s8792_s10  ;;  %8292 = vrcp.f32 %v3571_v25 }
 0x6b1   : > { %v3592_v41 = vpop.xlane.xlu0 %3591  ;;  %v3768_v37 = vpack.c.bf16 %v3728_v5, %v3727_v20 }
 0x6b2   : > { %8294 = vrcp.f32 %v3592_v41 }
 0x6b3   : > { %8296 = vrcp.f32 %v3583_v55  ;;  %v12406_v55 = vld [vmem:[#allocation77_spill] sm:$0xff] }
 0x6b4   : > { %v8285_v39 = vpop.eup %8284  ;;  %8298 = vrcp.f32 %v3589_v12  ;;  %v12405_v12 = vld [vmem:[#allocation76_spill] sm:$0xff] }
 0x6b5   : > { %v3586_v59 = vpop.xlane.xlu0 %3585  ;;  %v3726_v47 = vmul.f32 %v8285_v39, %v12395_v27  ;;  %v8287_v56 = vpop.eup %8286 }
 0x6b6   : > { %8300 = vrcp.f32 %v3586_v59  ;;  %v3724_v17 = vmul.f32 %v8287_v56, %v12397_v15  ;;  %v7988_v15 = vld [vmem:[%s9347_s27] sm:$0xff]  }
 0x6b7   : > { %8302 = vrcp.f32 %v3580_v21  ;;  %v3767_v26 = vpack.c.bf16 %v3726_v47, %v3725_v49  ;;  %v12402_v21 = vld [vmem:[#allocation83_spill] sm:$0xff]  ;;  %v7986_v47 = vld [vmem:[%s9347_s27 + $0x10] sm:$0xff]  }
 0x6b8   : > { %8304 = vrcp.f32 %v3577_v28  ;;  %v8289_v58 = vpop.eup %8288  ;;  %v12399_v28 = vld [vmem:[#allocation81_spill] sm:$0xff] }
 0x6b9   : > { %7625 = vmatprep.mubr.msk.bf16.mxu1 %vm1981_vm0, %v3767_v26  ;;  %v1942_v13 = vpop.permute.xlu0 %1941  ;;  %v8291_v62 = vpop.eup %8290  ;;  %v3730_v61 = vmul.f32 %v8289_v58, %v12399_v28 }
 0x6ba   : > { %7613 = vmatprep.subr.bf16.mxu0 %v1942_v13  ;;  %7626 = vmatmul.mubr.msk.bf16.vlgmr.msra.gmra.mrb[68].mxu1 %vm1981_vm0, %v3768_v37  ;;  %v8293_v63 = vpop.eup %8292  ;;  %v3723_v14 = vmul.f32 %v8291_v62, %v12400_v10 }
 0x6bb   : > { %7638 = vmatpush3.bf16.msra.mxu1 %v12392_v60  ;;  %7614 = vmatpush3.bf16.msra.mxu0 %v1942_v13  ;;  %v3729_v16 = vmul.f32 %v8293_v63, %v12401_v9  ;;  %v7987_v63 = vld [vmem:[%s9347_s27 + $0x18] sm:$0xff]  }
 0x6bc   : > { %7639 = vmatprep.subr.bf16.mxu1 %v12398_v43  ;;  %7615 = vmatprep.subr.bf16.mxu0 %v1944_v50  ;;  %v8295_v11 = vpop.eup %8294  ;;  %v3766_v33 = vpack.c.bf16 %v3724_v17, %v3723_v14 }
 0x6bd   : > { %v8297_v6 = vpop.eup %8296  ;;  %v3736_v44 = vmul.f32 %v8295_v11, %v12402_v21  ;;  %v3769_v18 = vpack.c.bf16 %v3730_v61, %v3729_v16 }
 0x6be   : > { %v8299_v0 = vpop.eup %8298  ;;  %v3733_v31 = vmul.f32 %v8297_v6, %v12403_v29 }
 0x6bf   : > { %7640 = vmatpush3.bf16.msra.mxu1 %v12398_v43  ;;  %7616 = vmatpush3.bf16.msra.mxu0 %v1944_v50  ;;  %v3735_v60 = vmul.f32 %v8299_v0, %v12405_v12  ;;  %v7989_v0 = vld [vmem:[%s9347_s27 + $0x8] sm:$0xff]  }
 0x6c0   : > { %v8301_v25 = vpop.eup %8300  ;;  %7629 = vmatprep.subr.bf16.mxu0 %v12378_v30 }
 0x6c1   : > { %v8303_v19 = vpop.eup %8302  ;;  %v3734_v1 = vmul.f32 %v8301_v25, %v12404_v35  ;;  %v3772_v40 = vpack.c.bf16 %v3736_v44, %v3735_v60  ;;  %v11147_v44 = vld [vmem:[%s9347_s27 + $0x20] sm:$0xff]  }
 0x6c2   : > { %7618 = vmatmul.mubr.msk.bf16.vlgmr.msra.gmra.mrb[84].mxu0 %vm1981_vm0, %v3766_v33  ;;  %v8305_v24 = vpop.eup %8304  ;;  %v3732_v41 = vmul.f32 %v8303_v19, %v12406_v55 }
 0x6c3   : > { %7630 = vmatpush3.bf16.msra.mxu0 %v12378_v30  ;;  %7633 = vmatprep.mubr.msk.bf16.mxu0 %vm1981_vm0, %v3769_v18  ;;  %v3771_v51 = vpack.c.bf16 %v3734_v1, %v3733_v31  ;;  %v3731_v39 = vmul.f32 %v8305_v24, %v12407_v46 }
 0x6c4   : > { %7631 = vmatprep.subr.bf16.mxu0 %v12375_v3 }
 0x6c5   : > { %7641 = vmatprep.mubr.msk.bf16.mxu1 %vm1981_vm0, %v3771_v51  ;;  %v3770_v23 = vpack.c.bf16 %v3732_v41, %v3731_v39 }
 0x6c6   : > { %7642 = vmatmul.mubr.msk.bf16.vlgmr.msra.gmra.mrb[72].mxu1 %vm1981_vm0, %v3772_v40 }
 0x6c7   : > { %7632 = vmatpush3.bf16.msra.mxu0 %v12375_v3 }
 0x6ca   : > { %7634 = vmatmul.mubr.msk.bf16.vlgmr.msra.gmra.mrb[88].mxu0 %vm1981_vm0, %v3770_v23 }
 0x6da   : > { %v3595_v30 = vpop.xlane.xlu1 %3594 }
 0x6de   : > { %v3604_v59 = vpop.xlane.xlu1 %3603 }
 0x6e2   : > { %v1948_v27 = vpop.permute.xlu1 %1947 }
 0x6ea   : > { %v3601_v5 = vpop.xlane.xlu0 %3600 }
 0x6eb   : > { %8306 = vrcp.f32 %v3601_v5 }
 0x6ec   : > { %8308 = vrcp.f32 %v3595_v30 }
 0x6ed   : > { %8310 = vrcp.f32 %v3604_v59 }
 0x6ee   : > { %v3598_v36 = vpop.xlane.xlu0 %3597 }
 0x6ef   : > { %8312 = vrcp.f32 %v3598_v36 }
 0x6f2   : > { %v1946_v49 = vpop.permute.xlu0 %1945 }
 0x6f3   : > { %7645 = vmatprep.subr.bf16.mxu0 %v1946_v49 }
 0x6f4   : > { %7646 = vmatpush3.bf16.msra.mxu0 %v1946_v49 }
 0x6f5   : > { %7647 = vmatprep.subr.bf16.mxu0 %v1948_v27  ;;  %v8307_v3 = vpop.eup %8306 }
 0x6f6   : > { %v8309_v38 = vpop.eup %8308  ;;  %v3739_v37 = vmul.f32 %v8307_v3, %v10986_v54 }
 0x6f7   : > { %v8311_v20 = vpop.eup %8310  ;;  %v3737_v56 = vmul.f32 %v8309_v38, %v10954_v2 }
 0x6f8   : > { %7648 = vmatpush3.bf16.msra.mxu0 %v1948_v27  ;;  %v3740_v58 = vmul.f32 %v8311_v20, %v10957_v53 }
 0x6f9   : > { %v8313_v26 = vpop.eup %8312  ;;  %7661 = vmatprep.subr.bf16.mxu0 %v7986_v47 }
 0x6fa   : > { %v3738_v13 = vmul.f32 %v8313_v26, %v10989_v45  ;;  %v3774_v50 = vpack.c.bf16 %v3740_v58, %v3739_v37 }
 0x6fc   : > { %v3773_v62 = vpack.c.bf16 %v3738_v13, %v3737_v56 }
 0x6fe   : > { %7649 = vmatprep.mubr.msk.bf16.mxu0 %vm1981_vm0, %v3773_v62 }
 0x6ff   : > { %7650 = vmatmul.mubr.msk.bf16.vlgmr.msra.gmra.mrb[92].mxu0 %vm1981_vm0, %v3774_v50 }
 0x700   : > { %7662 = vmatpush3.bf16.msra.mxu0 %v7986_v47 }
 0x701   : > { %7663 = vmatprep.subr.bf16.mxu0 %v7987_v63 }
 0x704   : > { %7664 = vmatpush3.bf16.msra.mxu0 %v7987_v63 }
 0x705   : > { %7681 = vmatprep.subr.bf16.mxu0 %v7988_v15 }
 0x70f   : > { %v11125_v54 = vpop.f32.mrb[68].mxu0 }
 0x710   : > { %v11127_v2 = vpop.f32.mrb[69].mxu0 }
 0x711   : > { %v11129_v45 = vpop.f32.mrb[70].mxu0 }
 0x712   : > { %v4940_v53 = vpack.c.bf16 %v11129_v45, %v11125_v54  ;;  %v11133_v17 = vpop.f32.mrb[71].mxu0 }
 0x713   : > { %v4939_v43 = vpack.c.bf16 %v11133_v17, %v11127_v2  ;;  %v3607_v9 = vpop.xlane.xlu1 %3606 }
 0x717   : > { %v7547_v11 = vpop.f32.mrb[48].mxu1  ;;  %v3616_v31 = vpop.xlane.xlu1 %3615 }
 0x718   : > { %v3872_v28 = vpop.f32.mrb[49].mxu1 }
 0x719   : > { %v7548_v61 = vpop.f32.mrb[50].mxu1 }
 0x71a   : > { %v4666_v6 = vpack.c.bf16 %v7548_v61, %v7547_v11  ;;  %v3875_v10 = vpop.f32.mrb[51].mxu1 }
 0x71b   : > { %v4665_v14 = vpack.c.bf16 %v3875_v10, %v3872_v28  ;;  %v1972_v40 = vpop.permute.xlu1 %1971 }
 0x71d   : > { %7665 = vmatprep.mubr.msk.bf16.mxu0 %vm1981_vm0, %v4665_v14 }
 0x71e   : > { %7666 = vmatmul.mubr.msk.bf16.vlgmr.msra.gmra.mrb[96].mxu0 %vm1981_vm0, %v4666_v6 }
 0x71f   : > { %v11140_v16 = vpop.f32.mrb[72].mxu0  ;;  %7682 = vmatpush3.bf16.msra.mxu0 %v7988_v15 }
 0x720   : > { %v11142_v25 = vpop.f32.mrb[73].mxu0  ;;  %7683 = vmatprep.subr.bf16.mxu0 %v7989_v0 }
 0x721   : > { %v11144_v21 = vpop.f32.mrb[74].mxu0 }
 0x722   : > { %v4660_v33 = vpack.c.bf16 %v11144_v21, %v11140_v16  ;;  %v11151_v19 = vpop.f32.mrb[75].mxu0  ;;  %v11276_v21 = vld [vmem:[%s12409_s5] ss:$0 sm:$0xff] }
 0x723   : > { %v4659_v18 = vpack.c.bf16 %v11151_v19, %v11142_v25  ;;  %v3613_v29 = vpop.xlane.xlu0 %3612  ;;  %7684 = vmatpush3.bf16.msra.mxu0 %v7989_v0 }
 0x724   : > { %7701 = vmatprep.subr.bf16.mxu0 %v11147_v44  ;;  %8314 = vrcp.f32 %v3613_v29 }
 0x725   : > { %8316 = vrcp.f32 %v3607_v9 }
 0x726   : > { %8318 = vrcp.f32 %v3616_v31 }
 0x727   : > { %v11156_v35 = vpop.f32.mrb[52].mxu1  ;;  %v3610_v1 = vpop.xlane.xlu0 %3609 }
 0x728   : > { %8320 = vrcp.f32 %v3610_v1  ;;  %v11158_v12 = vpop.f32.mrb[53].mxu1 }
 0x729   : > { %v11160_v60 = vpop.f32.mrb[54].mxu1 }
 0x72a   : > { %v5097_v24 = vpack.c.bf16 %v11160_v60, %v11156_v35  ;;  %v11164_v51 = vpop.f32.mrb[55].mxu1  ;;  %v8419_v60 = vld [vmem:[#allocation2 + $0x18] sm:$0xff] }
 0x72b   : > { %v5096_v55 = vpack.c.bf16 %v11164_v51, %v11158_v12  ;;  %v1970_v41 = vpop.permute.xlu0 %1969  ;;  %v8420_v51 = vld [vmem:[#allocation2 + $0x8] sm:$0xff] }
 0x72c   : > { %7653 = vmatprep.subr.bf16.mxu1 %v1970_v41 }
 0x72d   : > { %7654 = vmatpush3.bf16.msra.mxu1 %v1970_v41 }
 0x72e   : > { %7655 = vmatprep.subr.bf16.mxu1 %v1972_v40  ;;  %v8315_v46 = vpop.eup %8314 }
 0x72f   : > { %v11168_v39 = vpop.f32.mrb[76].mxu0  ;;  %v8317_v23 = vpop.eup %8316  ;;  %v3743_v49 = vmul.f32 %v8315_v46, %v11062_v34 }
 0x730   : > { %v11170_v30 = vpop.f32.mrb[77].mxu0  ;;  %v8319_v5 = vpop.eup %8318  ;;  %v3741_v38 = vmul.f32 %v8317_v23, %v11050_v42 }
 0x731   : > { %v11172_v59 = vpop.f32.mrb[78].mxu0  ;;  %7656 = vmatpush3.bf16.msra.mxu1 %v1972_v40  ;;  %v3744_v26 = vmul.f32 %v8319_v5, %v11058_v22 }
 0x732   : > { %v8321_v36 = vpop.eup %8320  ;;  %v4942_v27 = vpack.c.bf16 %v11172_v59, %v11168_v39  ;;  %v11177_v47 = vpop.f32.mrb[79].mxu0  ;;  %v8421_v39 = vld [vmem:[#allocation2 + $0x10] sm:$0xff] }
 0x733   : > { %v4941_v3 = vpack.c.bf16 %v11177_v47, %v11170_v30  ;;  %v3742_v20 = vmul.f32 %v8321_v36, %v11066_v8  ;;  %v3776_v56 = vpack.c.bf16 %v3744_v26, %v3743_v49 }
 0x735   : > { %v3775_v37 = vpack.c.bf16 %v3742_v20, %v3741_v38 }
 0x737   : > { %v7579_v13 = vpop.f32.mrb[56].mxu1  ;;  %7657 = vmatprep.mubr.msk.bf16.mxu1 %vm1981_vm0, %v3775_v37 }
 0x738   : > { %v4092_v34 = vpop.f32.mrb[57].mxu1  ;;  %7658 = vmatmul.mubr.msk.bf16.vlgmr.msra.gmra.mrb[76].mxu1 %vm1981_vm0, %v3776_v56 }
 0x739   : > { %v7580_v58 = vpop.f32.mrb[58].mxu1 }
 0x73a   : > { %v4668_v62 = vpack.c.bf16 %v7580_v58, %v7579_v13  ;;  %v4095_v50 = vpop.f32.mrb[59].mxu1 }
 0x73b   : > { %v4667_v63 = vpack.c.bf16 %v4095_v50, %v4092_v34 }
 0x73d   : > { %7669 = vmatprep.mubr.msk.bf16.mxu0 %vm1981_vm0, %v4667_v63 }
 0x73e   : > { %7670 = vmatmul.mubr.msk.bf16.gmra.mrb[100].mxu0 %vm1981_vm0, %v4668_v62 }
 0x746   : > { %v7603_v42 = vpop.f32.mrb[80].mxu0 }
 0x747   : > { %v4257_v8 = vpop.f32.mrb[81].mxu0 }
 0x748   : > { %v7604_v15 = vpop.f32.mrb[82].mxu0 }
 0x749   : > { %v4662_v22 = vpack.c.bf16 %v7604_v15, %v7603_v42  ;;  %v4260_v11 = vpop.f32.mrb[83].mxu0 }
 0x74a   : > { %v4661_v28 = vpack.c.bf16 %v4260_v11, %v4257_v8 }
 0x74b   : > { %v11188_v61 = vpop.f32.mrb[60].mxu1 }
 0x74c   : > { %v11190_v6 = vpop.f32.mrb[61].mxu1 }
 0x74d   : > { %v11192_v10 = vpop.f32.mrb[62].mxu1 }
 0x74e   : > { %v5099_v14 = vpack.c.bf16 %v11192_v10, %v11188_v61  ;;  %v11196_v0 = vpop.f32.mrb[63].mxu1 }
 0x74f   : > { %v5098_v9 = vpack.c.bf16 %v11196_v0, %v11190_v6 }
 0x779   : > { %v7611_v29 = vpop.f32.mrb[64].mxu1 }
 0x77a   : > { %v4312_v31 = vpop.f32.mrb[65].mxu1 }
 0x77b   : > { %v7612_v1 = vpop.f32.mrb[66].mxu1 }
 0x77c   : > { %v4670_v41 = vpack.c.bf16 %v7612_v1, %v7611_v29  ;;  %v4315_v40 = vpop.f32.mrb[67].mxu1 }
 0x77d   : > { %v4669_v46 = vpack.c.bf16 %v4315_v40, %v4312_v31 }
 0x77f   : > { %7673 = vmatprep.mubr.msk.bf16.mxu0 %vm1981_vm0, %v4669_v46  ;;  %v7991_v46 = vld [vmem:[%s9347_s27 + $0x28] sm:$0xff]  }
 0x780   : > { %7674 = vmatmul.mubr.msk.bf16.gmra.mrb[104].mxu0 %vm1981_vm0, %v4670_v41 }
 0x78d   : > { %v11202_v23 = vpop.f32.mrb[68].mxu1 }
 0x78e   : > { %v4422_v5 = vpop.f32.mrb[69].mxu1 }
 0x78f   : > { %v7628_v36 = vpop.f32.mrb[70].mxu1 }
 0x790   : > { %v5101_v49 = vpack.c.bf16 %v7628_v36, %v11202_v23  ;;  %v4425_v38 = vpop.f32.mrb[71].mxu1  ;;  %v7992_v23 = vld [vmem:[%s9347_s27 + $0x30] sm:$0xff]  }
 0x791   : > { %v5100_v20 = vpack.c.bf16 %v4425_v38, %v4422_v5 }
 0x795   : > { %v7619_v26 = vpop.f32.mrb[84].mxu0 }
 0x796   : > { %v4367_v37 = vpop.f32.mrb[85].mxu0 }
 0x797   : > { %v7620_v56 = vpop.f32.mrb[86].mxu0 }
 0x798   : > { %v4944_v13 = vpack.c.bf16 %v7620_v56, %v7619_v26  ;;  %v4370_v34 = vpop.f32.mrb[87].mxu0 }
 0x799   : > { %v4943_v58 = vpack.c.bf16 %v4370_v34, %v4367_v37  ;;  %v7643_v62 = vpop.f32.mrb[72].mxu1  ;;  %v8426_v34 = vld [vmem:[#allocation2 + $0x40] sm:$0xff] }
 0x79a   : > { %v4532_v50 = vpop.f32.mrb[73].mxu1 }
 0x79b   : > { %v7644_v63 = vpop.f32.mrb[74].mxu1 }
 0x79c   : > { %v4672_v42 = vpack.c.bf16 %v7644_v63, %v7643_v62  ;;  %v4535_v8 = vpop.f32.mrb[75].mxu1  ;;  %v8427_v63 = vld [vmem:[#allocation2 + $0x48] sm:$0xff] }
 0x79d   : > { %v4671_v15 = vpack.c.bf16 %v4535_v8, %v4532_v50  ;;  %v7635_v11 = vpop.f32.mrb[88].mxu0  ;;  %v8428_v8 = vld [vmem:[#allocation2 + $0x50] sm:$0xff] }
 0x79e   : > { %v4477_v29 = vpop.f32.mrb[89].mxu0 }
 0x79f   : > { %v7636_v31 = vpop.f32.mrb[90].mxu0  ;;  %7677 = vmatprep.mubr.msk.bf16.mxu0 %vm1981_vm0, %v4671_v15 }
 0x7a0   : > { %v4664_v1 = vpack.c.bf16 %v7636_v31, %v7635_v11  ;;  %v4480_v41 = vpop.f32.mrb[91].mxu0  ;;  %7678 = vmatmul.mubr.msk.bf16.gmra.mrb[108].mxu0 %vm1981_vm0, %v4672_v42 }
 0x7a1   : > { %v4663_v40 = vpack.c.bf16 %v4480_v41, %v4477_v29  ;;  %7685 = vmatprep.mubr.msk.bf16.mxu0 %vm1981_vm0, %v4657_v48  ;;  %v8429_v29 = vld [vmem:[#allocation2 + $0x58] sm:$0xff] }
 0x7a8   : > { %7686 = vmatmul.mubr.msk.bf16.vlgmr.msra.gmra.mrb[96].mxu0 %vm1981_vm0, %v4658_v32 }
 0x7a9   : > { %7702 = vmatpush3.bf16.msra.mxu0 %v11147_v44  ;;  %7689 = vmatprep.mubr.msk.bf16.mxu0 %vm1981_vm0, %v4659_v18 }
 0x7aa   : > { %7703 = vmatprep.subr.bf16.mxu0 %v7991_v46 }
 0x7ad   : > { %7704 = vmatpush3.bf16.msra.mxu0 %v7991_v46 }
 0x7ae   : > { %7721 = vmatprep.subr.bf16.mxu0 %v7992_v23 }
 0x7b0   : > { %7690 = vmatmul.mubr.msk.bf16.gmra.mrb[100].mxu0 %vm1981_vm0, %v4660_v33  ;;  %v8418_v33 = vld [vmem:[#allocation2] sm:$0xff] }
 0x7b1   : > { %7693 = vmatprep.mubr.msk.bf16.mxu0 %vm1981_vm0, %v4661_v28  ;;  %v8422_v28 = vld [vmem:[#allocation2 + $0x20] sm:$0xff] }
 0x7b8   : > { %7694 = vmatmul.mubr.msk.bf16.gmra.mrb[104].mxu0 %vm1981_vm0, %v4662_v22 }
 0x7b9   : > { %7697 = vmatprep.mubr.msk.bf16.mxu0 %vm1981_vm0, %v4663_v40 }
 0x7c0   : > { %7698 = vmatmul.mubr.msk.bf16.gmra.mrb[108].mxu0 %vm1981_vm0, %v4664_v1 }
 0x7c1   : > { %7705 = vmatprep.mubr.msk.bf16.mxu0 %vm1981_vm0, %v4939_v43 }
 0x7c8   : > { %7706 = vmatmul.mubr.msk.bf16.vlgmr.msra.gmra.mrb[96].mxu0 %vm1981_vm0, %v4940_v53 }
 0x7c9   : > { %7722 = vmatpush3.bf16.msra.mxu0 %v7992_v23  ;;  %7709 = vmatprep.mubr.msk.bf16.mxu0 %vm1981_vm0, %v4941_v3 }
 0x7ca   : > { %7723 = vmatprep.subr.bf16.mxu0 %v7993_v7 }
 0x7cd   : > { %7724 = vmatpush3.bf16.msra.mxu0 %v7993_v7  ;;  %v8430_v7 = vld [vmem:[#allocation2 + $0x60] sm:$0xff] }
 0x7d0   : > { %7710 = vmatmul.mubr.msk.bf16.gmra.mrb[100].mxu0 %vm1981_vm0, %v4942_v27 }
 0x7d1   : > { %7713 = vmatprep.mubr.msk.bf16.mxu0 %vm1981_vm0, %v4943_v58 }
 0x7d2   : > { %v7651_v4 = vpop.f32.mrb[92].mxu0 }
 0x7d3   : > { %v4587_v57 = vpop.f32.mrb[93].mxu0 }
 0x7d4   : > { %v7652_v32 = vpop.f32.mrb[94].mxu0 }
 0x7d5   : > { %v4946_v52 = vpack.c.bf16 %v7652_v32, %v7651_v4  ;;  %v4590_v48 = vpop.f32.mrb[95].mxu0 }
 0x7d6   : > { %v4945_v54 = vpack.c.bf16 %v4590_v48, %v4587_v57 }
 0x7d8   : > { %7714 = vmatmul.mubr.msk.bf16.gmra.mrb[104].mxu0 %vm1981_vm0, %v4944_v13 }
 0x7d9   : > { %7717 = vmatprep.mubr.msk.bf16.mxu0 %vm1981_vm0, %v4945_v54 }
 0x7e0   : > { %7718 = vmatmul.mubr.msk.bf16.gmra.mrb[108].mxu0 %vm1981_vm0, %v4946_v52  ;;  %v8431_v52 = vld [vmem:[#allocation2 + $0x70] sm:$0xff] }
 0x7e1   : > { %7725 = vmatprep.mubr.msk.bf16.mxu0 %vm1981_vm0, %v5096_v55 }
 0x7e8   : > { %7726 = vmatmul.mubr.msk.bf16.vlgmr.msra.gmra.mrb[96].mxu0 %vm1981_vm0, %v5097_v24 }
 0x7e9   : > { %7729 = vmatprep.mubr.msk.bf16.mxu0 %vm1981_vm0, %v5098_v9  ;;  %v8424_v9 = vld [vmem:[#allocation2 + $0x30] sm:$0xff] }
 0x7f0   : > { %7730 = vmatmul.mubr.msk.bf16.gmra.mrb[100].mxu0 %vm1981_vm0, %v5099_v14  ;;  %v8423_v14 = vld [vmem:[#allocation2 + $0x28] sm:$0xff] }
 0x7f1   : > { %7733 = vmatprep.mubr.msk.bf16.mxu0 %vm1981_vm0, %v5100_v20 }
 0x7f8   : > { %7734 = vmatmul.mubr.msk.bf16.gmra.mrb[104].mxu0 %vm1981_vm0, %v5101_v49  ;;  %v8425_v49 = vld [vmem:[#allocation2 + $0x38] sm:$0xff] }
 0x80b   : > { %v7659_v2 = vpop.f32.mrb[76].mxu1 }
 0x80c   : > { %v4642_v45 = vpop.f32.mrb[77].mxu1 }
 0x80d   : > { %v7660_v53 = vpop.f32.mrb[78].mxu1 }
 0x80e   : > { %v5103_v17 = vpack.c.bf16 %v7660_v53, %v7659_v2  ;;  %v4645_v43 = vpop.f32.mrb[79].mxu1  ;;  %v8432_v2 = vld [vmem:[#allocation2 + $0x68] sm:$0xff]  ;;  %v8433_v53 = vld [vmem:[#allocation2 + $0x78] sm:$0xff] }
 0x80f   : > { %v5102_v16 = vpack.c.bf16 %v4645_v43, %v4642_v45 }
 0x811   : > { %7737 = vmatprep.mubr.msk.bf16.mxu0 %vm1981_vm0, %v5102_v16 }
 0x812   : > { %7738 = vmatmul.mubr.msk.bf16.gmra.mrb[108].mxu0 %vm1981_vm0, %v5103_v17 }
 0x8bb   : > { %v7727_v25 = vpop.f32.mrb[96].mxu0 }
 0x8bc   : > { %v5174_v44 = vpop.f32.mrb[97].mxu0  ;;  %v5255_v30 = vadd.f32 %v8421_v39, %v7727_v25 }
 0x8bd   : > { %v5253_v19 = vadd.f32 %v8418_v33, %v5174_v44  ;;  %v7728_v18 = vpop.f32.mrb[98].mxu0  ;;  %v7994_v44 = vld [vmem:[%s12413_s22] ss:$8 sps:$4 sm:$0xff]   ;;  %v7996_v33 = vld [vmem:[%s12413_s22 + $0x4] ss:$8 sps:$4 sm:$0xff]  }
 0x8be   : > { %v5177_v35 = vpop.f32.mrb[99].mxu0  ;;  %v5256_v24 = vadd.f32 %v8419_v60, %v7728_v18  ;;  %v11290_v22 = vadd.f32 %v11276_v21, %v5255_v30  ;;  %5626 = vmatprep.subr.bf16.mxu1 %v7996_v33  ;;  %v7997_v18 = vld [vmem:[%s12413_s22 + $0x10] ss:$8 sps:$4 sm:$0xff]   ;;  %v8000_v33 = vld [vmem:[%s12413_s22 + $0x20] ss:$8 sps:$4 sm:$0xff]  }
 0x8bf   : > { %v11279_v12 = vadd.f32 %v11276_v21, %v5253_v19  ;;  %v5254_v55 = vadd.f32 %v8420_v51, %v5177_v35  ;;  %v7999_v19 = vld [vmem:[%s12413_s22 + $0x14] ss:$8 sps:$4 sm:$0xff]   ;;  %5627 = vmatpush1.bf16.msra.mxu1 %v7994_v44  ;;  %v8002_v44 = vld [vmem:[%s12413_s22 + $0x24] ss:$8 sps:$4 sm:$0xff]  }
 0x8c0   : > { %v11286_v27 = vadd.f32 %v11276_v21, %v5256_v24  ;;  %5628 = vmatprep.subr.bf16.mxu1 %v7999_v19 }
 0x8c1   : > { %v11282_v59 = vadd.f32 %v11276_v21, %v5254_v55  ;;  %5291 = vadd.xlane.f32.xlu1 %v11279_v12 }
 0x8c3   : > { %5293 = vadd.xlane.f32.xlu0 %v11282_v59  ;;  %v7731_v47 = vpop.f32.mrb[100].mxu0  ;;  %5629 = vmatpush1.bf16.msra.mxu1 %v7997_v18 }
 0x8c4   : > { %v5190_v3 = vpop.f32.mrb[101].mxu0  ;;  %v5259_v5 = vadd.f32 %v8424_v9, %v7731_v47  ;;  %5630 = vmatprep.subr.bf16.mxu1 %v8002_v44 }
 0x8c5   : > { %v5257_v61 = vadd.f32 %v8422_v28, %v5190_v3  ;;  %5297 = vadd.xlane.f32.xlu1 %v11286_v27  ;;  %v7732_v6 = vpop.f32.mrb[102].mxu0 }
 0x8c6   : > { %v5193_v10 = vpop.f32.mrb[103].mxu0  ;;  %v5260_v38 = vadd.f32 %v8425_v49, %v7732_v6  ;;  %v11303_v56 = vadd.f32 %v11276_v21, %v5259_v5 }
 0x8c7   : > { %v5258_v0 = vadd.f32 %v8423_v14, %v5193_v10  ;;  %5295 = vadd.xlane.f32.xlu0 %v11290_v22  ;;  %v11295_v36 = vadd.f32 %v11276_v21, %v5257_v61  ;;  %5631 = vmatpush1.bf16.msra.mxu1 %v8000_v33 }
 0x8c8   : > { %v11306_v13 = vadd.f32 %v11276_v21, %v5260_v38 }
 0x8c9   : > { %v11298_v20 = vadd.f32 %v11276_v21, %v5258_v0 }
 0x8cb   : > { %5299 = vadd.xlane.f32.xlu0 %v11295_v36  ;;  %5301 = vadd.xlane.f32.xlu1 %v11298_v20  ;;  %v7735_v26 = vpop.f32.mrb[104].mxu0 }
 0x8cc   : > { %v5206_v37 = vpop.f32.mrb[105].mxu0  ;;  %v5263_v15 = vadd.f32 %v8428_v8, %v7735_v26 }
 0x8cd   : > { %v5261_v58 = vadd.f32 %v8426_v34, %v5206_v37  ;;  %v7736_v62 = vpop.f32.mrb[106].mxu0 }
 0x8ce   : > { %v5209_v50 = vpop.f32.mrb[107].mxu0  ;;  %v5264_v31 = vadd.f32 %v8429_v29, %v7736_v62  ;;  %v11319_v41 = vadd.f32 %v11276_v21, %v5263_v15 }
 0x8cf   : > { %v5262_v42 = vadd.f32 %v8427_v63, %v5209_v50  ;;  %5303 = vadd.xlane.f32.xlu0 %v11303_v56  ;;  %5305 = vadd.xlane.f32.xlu1 %v11306_v13  ;;  %v11311_v11 = vadd.f32 %v11276_v21, %v5261_v58 }
 0x8d0   : > { %12411 = vst [vmem:[#allocation87_spill] sm:$0xff] %v11319_v41  ;;  %v11322_v40 = vadd.f32 %v11276_v21, %v5264_v31 }
 0x8d1   : > { %v11314_v1 = vadd.f32 %v11276_v21, %v5262_v42 }
 0x8d2   : > { %12412 = vst [vmem:[#allocation85_spill] sm:$0xff] %v11322_v40 }
 0x8d3   : > { %12410 = vst [vmem:[#allocation82_spill] sm:$0xff] %v11314_v1  ;;  %5307 = vadd.xlane.f32.xlu0 %v11311_v11  ;;  %5309 = vadd.xlane.f32.xlu1 %v11314_v1 }
 0x8d7   : > { %5311 = vadd.xlane.f32.xlu0 %v11319_v41  ;;  %5313 = vadd.xlane.f32.xlu1 %v11322_v40 }
 0x8e5   : > { %v7739_v46 = vpop.f32.mrb[108].mxu0 }
 0x8e6   : > { %v5222_v23 = vpop.f32.mrb[109].mxu0  ;;  %v5267_v48 = vadd.f32 %v8431_v52, %v7739_v46 }
 0x8e7   : > { %v5265_v4 = vadd.f32 %v8430_v7, %v5222_v23  ;;  %v7740_v57 = vpop.f32.mrb[110].mxu0 }
 0x8e8   : > { %v5225_v32 = vpop.f32.mrb[111].mxu0  ;;  %v5268_v17 = vadd.f32 %v8433_v53, %v7740_v57  ;;  %v11334_v16 = vadd.f32 %v11276_v21, %v5267_v48 }
 0x8e9   : > { %v11327_v54 = vadd.f32 %v11276_v21, %v5265_v4  ;;  %v5266_v45 = vadd.f32 %v8432_v2, %v5225_v32 }
 0x8ea   : > { %12416 = vst [vmem:[#allocation90_spill] sm:$0xff] %v11334_v16  ;;  %v11338_v25 = vadd.f32 %v11276_v21, %v5268_v17 }
 0x8eb   : > { %12414 = vst [vmem:[#allocation89_spill] sm:$0xff] %v11327_v54  ;;  %v11330_v43 = vadd.f32 %v11276_v21, %v5266_v45  ;;  %5315 = vadd.xlane.f32.xlu0 %v11327_v54 }
 0x8ec   : > { %12417 = vst [vmem:[#allocation88_spill] sm:$0xff] %v11338_v25 }
 0x8ed   : > { %12415 = vst [vmem:[#allocation86_spill] sm:$0xff] %v11330_v43  ;;  %5317 = vadd.xlane.f32.xlu1 %v11330_v43 }
 0x8ef   : > { %5319 = vadd.xlane.f32.xlu0 %v11334_v16 }
 0x8f1   : > { %5321 = vadd.xlane.f32.xlu1 %v11338_v25 }
 0x94e   : > { %v5292_v35 = vpop.xlane.xlu1 %5291 }
 0x94f   : > { %v5323_v60 = vmul.f32 0.0078125, %v5292_v35 }
 0x950   : > { %v5294_v24 = vpop.xlane.xlu0 %5293 }
 0x951   : > { %v11347_v51 = vsub.f32 %v11279_v12, %v5323_v60  ;;  %v5324_v21 = vmul.f32 0.0078125, %v5294_v24  ;;  %v8005_v24 = vld [vmem:[%s12413_s22 + $0x34] ss:$8 sps:$4 sm:$0xff]  }
 0x952   : > { %v5298_v55 = vpop.xlane.xlu1 %5297  ;;  %5632 = vmatprep.subr.bf16.mxu1 %v8005_v24 }
 0x953   : > { %v11350_v39 = vsub.f32 %v11282_v59, %v5324_v21  ;;  %v5326_v30 = vmul.f32 0.0078125, %v5298_v55  ;;  %v5355_v47 = vmul.f32 %v11347_v51, %v11347_v51  ;;  %v8003_v21 = vld [vmem:[%s12413_s22 + $0x30] ss:$8 sps:$4 sm:$0xff]   ;;  %v8008_v55 = vld [vmem:[%s12413_s22 + $0x44] ss:$8 sps:$4 sm:$0xff]  }
 0x954   : > { %v5296_v3 = vpop.xlane.xlu0 %5295  ;;  %5633 = vmatpush1.bf16.msra.mxu1 %v8003_v21 }
 0x955   : > { %v11355_v28 = vsub.f32 %v11286_v27, %v5326_v30  ;;  %v5325_v61 = vmul.f32 0.0078125, %v5296_v3  ;;  %5371 = vadd.xlane.f32.xlu0 %v5355_v47  ;;  %v5356_v6 = vmul.f32 %v11350_v39, %v11350_v39  ;;  %v8006_v30 = vld [vmem:[%s12413_s22 + $0x40] ss:$8 sps:$4 sm:$0xff]   ;;  %5634 = vmatprep.subr.bf16.mxu1 %v8008_v55  ;;  %v8011_v47 = vld [vmem:[%s12413_s22 + $0x54] ss:$8 sps:$4 sm:$0xff]  }
 0x956   : > { %v8009_v3 = vld [vmem:[%s12413_s22 + $0x50] ss:$8 sps:$4 sm:$0xff]  }
 0x957   : > { %v11360_v10 = vsub.f32 %v11290_v22, %v5325_v61  ;;  %5373 = vadd.xlane.f32.xlu1 %v5356_v6  ;;  %v5358_v49 = vmul.f32 %v11355_v28, %v11355_v28  ;;  %v8014_v61 = vld [vmem:[%s12413_s22 + $0x64] ss:$8 sps:$4 sm:$0xff]   ;;  %v8012_v6 = vld [vmem:[%s12413_s22 + $0x60] ss:$8 sps:$4 sm:$0xff]  }
 0x958   : > { %v5302_v14 = vpop.xlane.xlu1 %5301  ;;  %v5300_v0 = vpop.xlane.xlu0 %5299  ;;  %5635 = vmatpush1.bf16.msra.mxu1 %v8006_v30 }
 0x959   : > { %v5328_v9 = vmul.f32 0.0078125, %v5302_v14  ;;  %v5327_v5 = vmul.f32 0.0078125, %v5300_v0  ;;  %v5357_v38 = vmul.f32 %v11360_v10, %v11360_v10  ;;  %5636 = vmatprep.subr.bf16.mxu1 %v8011_v47 }
 0x95b   : > { %v11367_v26 = vsub.f32 %v11298_v20, %v5328_v9  ;;  %v11370_v37 = vsub.f32 %v11295_v36, %v5327_v5  ;;  %5377 = vadd.xlane.f32.xlu1 %v5358_v49  ;;  %5375 = vadd.xlane.f32.xlu0 %v5357_v38  ;;  %v8017_v9 = vld [vmem:[%s12413_s22 + $0x74] ss:$8 sps:$4 sm:$0xff]   ;;  %v8015_v49 = vld [vmem:[%s12413_s22 + $0x70] ss:$8 sps:$4 sm:$0xff]  }
 0x95c   : > { %v5306_v34 = vpop.xlane.xlu1 %5305  ;;  %v5304_v58 = vpop.xlane.xlu0 %5303  ;;  %5637 = vmatpush1.bf16.msra.mxu1 %v8009_v3 }
 0x95d   : > { %v5330_v62 = vmul.f32 0.0078125, %v5306_v34  ;;  %v5329_v50 = vmul.f32 0.0078125, %v5304_v58  ;;  %v5360_v63 = vmul.f32 %v11367_v26, %v11367_v26  ;;  %v5359_v42 = vmul.f32 %v11370_v37, %v11370_v37  ;;  %5638 = vmatprep.subr.bf16.mxu1 %v8014_v61 }
 0x95f   : > { %v11377_v8 = vsub.f32 %v11306_v13, %v5330_v62  ;;  %v11380_v15 = vsub.f32 %v11303_v56, %v5329_v50  ;;  %5381 = vadd.xlane.f32.xlu1 %v5360_v63  ;;  %5379 = vadd.xlane.f32.xlu0 %v5359_v42 }
 0x960   : > { %v5310_v29 = vpop.xlane.xlu1 %5309  ;;  %v5308_v31 = vpop.xlane.xlu0 %5307  ;;  %5639 = vmatpush1.bf16.msra.mxu1 %v8012_v6 }
 0x961   : > { %v5332_v46 = vmul.f32 0.0078125, %v5310_v29  ;;  %v5331_v23 = vmul.f32 0.0078125, %v5308_v31  ;;  %v5362_v7 = vmul.f32 %v11377_v8, %v11377_v8  ;;  %v5361_v4 = vmul.f32 %v11380_v15, %v11380_v15  ;;  %5640 = vmatprep.subr.bf16.mxu1 %v8017_v9 }
 0x962   : > { %v8794_v29 = vmov 0  }
 0x963   : > { %v11387_v57 = vsub.f32 %v11314_v1, %v5332_v46  ;;  %v11390_v32 = vsub.f32 %v11311_v11, %v5331_v23  ;;  %5385 = vadd.xlane.f32.xlu1 %v5362_v7  ;;  %5383 = vadd.xlane.f32.xlu0 %v5361_v4 }
 0x964   : > { %v5314_v52 = vpop.xlane.xlu1 %5313  ;;  %v5312_v48 = vpop.xlane.xlu0 %5311  ;;  %5641 = vmatpush1.bf16.msra.mxu1 %v8015_v49  ;;  %5658 = vmatprep.mubr.bf16.mxu1 %v8794_v29 }
 0x965   : > { %v5334_v2 = vmul.f32 0.0078125, %v5314_v52  ;;  %v5333_v45 = vmul.f32 0.0078125, %v5312_v48  ;;  %v5364_v53 = vmul.f32 %v11387_v57, %v11387_v57  ;;  %v5363_v17 = vmul.f32 %v11390_v32, %v11390_v32  ;;  %v8018_v48 = vld [vmem:[%s9402_s15 + $0x40] sm:$0xff]  }
 0x966   : > { %7245 = vmatprep.subr.bf16.mxu1 %v8018_v48 }
 0x967   : > { %v11399_v19 = vsub.f32 %v11322_v40, %v5334_v2  ;;  %v11402_v18 = vsub.f32 %v11319_v41, %v5333_v45  ;;  %5389 = vadd.xlane.f32.xlu1 %v5364_v53  ;;  %5387 = vadd.xlane.f32.xlu0 %v5363_v17 }
 0x969   : > { %v5366_v35 = vmul.f32 %v11399_v19, %v11399_v19  ;;  %v5365_v60 = vmul.f32 %v11402_v18, %v11402_v18 }
 0x96b   : > { %5393 = vadd.xlane.f32.xlu1 %v5366_v35  ;;  %5391 = vadd.xlane.f32.xlu0 %v5365_v60 }
 0x978   : > { %v5316_v14 = vpop.xlane.xlu0 %5315 }
 0x979   : > { %v5335_v0 = vmul.f32 0.0078125, %v5316_v14 }
 0x97a   : > { %v5318_v5 = vpop.xlane.xlu1 %5317 }
 0x97b   : > { %v11419_v38 = vsub.f32 %v11327_v54, %v5335_v0  ;;  %v5336_v34 = vmul.f32 0.0078125, %v5318_v5 }
 0x97c   : > { %v5320_v58 = vpop.xlane.xlu0 %5319 }
 0x97d   : > { %v11422_v62 = vsub.f32 %v11330_v43, %v5336_v34  ;;  %v5337_v50 = vmul.f32 0.0078125, %v5320_v58  ;;  %v5367_v63 = vmul.f32 %v11419_v38, %v11419_v38 }
 0x97e   : > { %v5322_v42 = vpop.xlane.xlu1 %5321 }
 0x97f   : > { %v11428_v31 = vsub.f32 %v11334_v16, %v5337_v50  ;;  %v5338_v46 = vmul.f32 0.0078125, %v5322_v42  ;;  %5395 = vadd.xlane.f32.xlu0 %v5367_v63  ;;  %v5368_v23 = vmul.f32 %v11422_v62, %v11422_v62  ;;  %v11445_v50 = vld [vmem:[%s944_s0] ss:$0 sm:$0xff] }
 0x981   : > { %v11433_v7 = vsub.f32 %v11338_v25, %v5338_v46  ;;  %5397 = vadd.xlane.f32.xlu1 %v5368_v23  ;;  %v5369_v4 = vmul.f32 %v11428_v31, %v11428_v31 }
 0x983   : > { %5399 = vadd.xlane.f32.xlu0 %v5369_v4  ;;  %v5370_v52 = vmul.f32 %v11433_v7, %v11433_v7 }
 0x985   : > { %5401 = vadd.xlane.f32.xlu1 %v5370_v52 }
 0x9e2   : > { %v5372_v2 = vpop.xlane.xlu0 %5371 }
 0x9e3   : > { %v5403_v45 = vmul.f32 0.0078125, %v5372_v2  ;;  %v11455_v2 = vld [vmem:[%s947_s20] ss:$0 sm:$0xff] }
 0x9e4   : > { %v5374_v53 = vpop.xlane.xlu1 %5373 }
 0x9e5   : > { %v5419_v17 = vadd.f32 1e-05, %v5403_v45  ;;  %v5404_v44 = vmul.f32 0.0078125, %v5374_v53 }
 0x9e7   : > { %8322 = vrsqrt.f32 %v5419_v17  ;;  %v5420_v33 = vadd.f32 1e-05, %v5404_v44 }
 0x9e8   : > { %v5378_v35 = vpop.xlane.xlu1 %5377  ;;  %v5376_v60 = vpop.xlane.xlu0 %5375 }
 0x9e9   : > { %8324 = vrsqrt.f32 %v5420_v33  ;;  %v5406_v24 = vmul.f32 0.0078125, %v5378_v35  ;;  %v5405_v21 = vmul.f32 0.0078125, %v5376_v60 }
 0x9eb   : > { %v5422_v55 = vadd.f32 1e-05, %v5406_v24  ;;  %v5421_v30 = vadd.f32 1e-05, %v5405_v21  ;;  %v8019_v21 = vld [vmem:[%s9402_s15] sm:$0xff]  }
 0x9ec   : > { %v5382_v47 = vpop.xlane.xlu1 %5381  ;;  %v5380_v3 = vpop.xlane.xlu0 %5379 }
 0x9ed   : > { %8326 = vrsqrt.f32 %v5422_v55  ;;  %v5408_v61 = vmul.f32 0.0078125, %v5382_v47  ;;  %v5407_v6 = vmul.f32 0.0078125, %v5380_v3  ;;  %v8020_v47 = vld [vmem:[%s9402_s15 + $0x48] sm:$0xff]  }
 0x9ee   : > { %8328 = vrsqrt.f32 %v5421_v30 }
 0x9ef   : > { %v5424_v14 = vadd.f32 1e-05, %v5408_v61  ;;  %v5423_v0 = vadd.f32 1e-05, %v5407_v6 }
 0x9f0   : > { %v5386_v9 = vpop.xlane.xlu1 %5385  ;;  %v5384_v5 = vpop.xlane.xlu0 %5383 }
 0x9f1   : > { %v8323_v49 = vpop.eup %8322  ;;  %8330 = vrsqrt.f32 %v5424_v14  ;;  %v5410_v34 = vmul.f32 0.0078125, %v5386_v9  ;;  %v5409_v58 = vmul.f32 0.0078125, %v5384_v5 }
 0x9f2   : > { %v5451_v63 = vmul.f32 %v8323_v49, %v11347_v51  ;;  %8332 = vrsqrt.f32 %v5423_v0 }
 0x9f3   : > { %v8325_v42 = vpop.eup %8324  ;;  %v5426_v46 = vadd.f32 1e-05, %v5410_v34  ;;  %v5425_v52 = vadd.f32 1e-05, %v5409_v58 }
 0x9f4   : > { %v5452_v23 = vmul.f32 %v8325_v42, %v11350_v39  ;;  %v5473_v4 = vmul.f32 %v11445_v50, %v5451_v63  ;;  %v5390_v48 = vpop.xlane.xlu1 %5389  ;;  %v5388_v45 = vpop.xlane.xlu0 %5387  ;;  %v8022_v63 = vld [vmem:[%s9402_s15 + $0x50] sm:$0xff]  }
 0x9f5   : > { %8334 = vrsqrt.f32 %v5426_v46  ;;  %v5412_v44 = vmul.f32 0.0078125, %v5390_v48  ;;  %v5411_v60 = vmul.f32 0.0078125, %v5388_v45 }
 0x9f6   : > { %v5474_v51 = vmul.f32 %v11445_v50, %v5452_v23  ;;  %v5495_v39 = vadd.f32 %v11455_v2, %v5473_v4  ;;  %8336 = vrsqrt.f32 %v5425_v52  ;;  %v8023_v4 = vld [vmem:[%s9402_s15 + $0x10] sm:$0xff]  }
 0x9f7   : > { %v8327_v53 = vpop.eup %8326  ;;  %v5428_v14 = vadd.f32 1e-05, %v5412_v44  ;;  %v5427_v0 = vadd.f32 1e-05, %v5411_v60 }
 0x9f8   : > { %v8329_v17 = vpop.eup %8328  ;;  %v5496_v33 = vadd.f32 %v11455_v2, %v5474_v51  ;;  %v5454_v35 = vmul.f32 %v8327_v53, %v11355_v28  ;;  %v5394_v9 = vpop.xlane.xlu1 %5393  ;;  %v8021_v28 = vld [vmem:[%s9402_s15 + $0x8] sm:$0xff]   ;;  %v8024_v51 = vld [vmem:[%s9402_s15 + $0x58] sm:$0xff]  }
 0x9f9   : > { %v5453_v24 = vmul.f32 %v8329_v17, %v11360_v10  ;;  %v5392_v10 = vpop.xlane.xlu0 %5391  ;;  %8338 = vrsqrt.f32 %v5428_v14  ;;  %v5414_v42 = vmul.f32 0.0078125, %v5394_v9  ;;  %v8025_v17 = vld [vmem:[%s9402_s15 + $0x18] sm:$0xff]  }
 0x9fa   : > { %v5511_v55 = vpack.c.bf16 %v5496_v33, %v5495_v39  ;;  %v5476_v30 = vmul.f32 %v11445_v50, %v5454_v35  ;;  %8340 = vrsqrt.f32 %v5427_v0  ;;  %v5413_v23 = vmul.f32 0.0078125, %v5392_v10 }
 0x9fb   : > { %v8331_v3 = vpop.eup %8330  ;;  %v5475_v61 = vmul.f32 %v11445_v50, %v5453_v24  ;;  %v5430_v53 = vadd.f32 1e-05, %v5414_v42 }
 0x9fc   : > { %v8333_v6 = vpop.eup %8332  ;;  %5659 = vmatmul.mubr.bf16.vlgmr.msra.gmra.mrb[80].mxu1 %v5511_v55  ;;  %v5498_v49 = vadd.f32 %v11455_v2, %v5476_v30  ;;  %v5456_v58 = vmul.f32 %v8331_v3, %v11367_v26  ;;  %v5429_v26 = vadd.f32 1e-05, %v5413_v23 }
 0x9fd   : > { %5668 = vmatprep.mubr.bf16.mxu1 %v8794_v29  ;;  %7246 = vmatpush3.bf16.msra.mxu1 %v8019_v21  ;;  %v5497_v5 = vadd.f32 %v11455_v2, %v5475_v61  ;;  %v5455_v34 = vmul.f32 %v8333_v6, %v11370_v37  ;;  %8342 = vrsqrt.f32 %v5430_v53 }
 0x9fe   : > { %7247 = vmatprep.subr.bf16.mxu1 %v8020_v47  ;;  %v5478_v45 = vmul.f32 %v11445_v50, %v5456_v58  ;;  %8344 = vrsqrt.f32 %v5429_v26 }
 0x9ff   : > { %v8335_v46 = vpop.eup %8334  ;;  %v5512_v52 = vpack.c.bf16 %v5498_v49, %v5497_v5  ;;  %v5477_v48 = vmul.f32 %v11445_v50, %v5455_v34 }
 0xa00   : > { %v8337_v37 = vpop.eup %8336  ;;  %v5500_v39 = vadd.f32 %v11455_v2, %v5478_v45  ;;  %v5458_v35 = vmul.f32 %v8335_v46, %v11377_v8 }
 0xa01   : > { %7248 = vmatpush3.bf16.msra.mxu1 %v8021_v28  ;;  %v5499_v44 = vadd.f32 %v11455_v2, %v5477_v48  ;;  %v5457_v33 = vmul.f32 %v8337_v37, %v11380_v15 }
 0xa02   : > { %7249 = vmatprep.subr.bf16.mxu1 %v8022_v63  ;;  %v5480_v55 = vmul.f32 %v11445_v50, %v5458_v35 }
 0xa03   : > { %v8339_v60 = vpop.eup %8338  ;;  %v5513_v24 = vpack.c.bf16 %v5500_v39, %v5499_v44  ;;  %v5479_v21 = vmul.f32 %v11445_v50, %v5457_v33 }
 0xa04   : > { %5669 = vmatmul.mubr.bf16.gmra.mrb[84].mxu1 %v5512_v52  ;;  %v8341_v30 = vpop.eup %8340  ;;  %v5502_v8 = vadd.f32 %v11455_v2, %v5480_v55  ;;  %v5460_v14 = vmul.f32 %v8339_v60, %v11387_v57 }
 0xa05   : > { %5678 = vmatprep.mubr.bf16.mxu1 %v8794_v29  ;;  %7250 = vmatpush3.bf16.msra.mxu1 %v8023_v4  ;;  %v5501_v15 = vadd.f32 %v11455_v2, %v5479_v21  ;;  %v5459_v6 = vmul.f32 %v8341_v30, %v11390_v32 }
 0xa06   : > { %7251 = vmatprep.subr.bf16.mxu1 %v8024_v51  ;;  %v5482_v63 = vmul.f32 %v11445_v50, %v5460_v14  ;;  %v8028_v14 = vld [vmem:[%s9402_s15 + $0x68] sm:$0xff]  }
 0xa07   : > { %v8343_v5 = vpop.eup %8342  ;;  %v5514_v34 = vpack.c.bf16 %v5502_v8, %v5501_v15  ;;  %v5481_v58 = vmul.f32 %v11445_v50, %v5459_v6  ;;  %v8026_v6 = vld [vmem:[%s9402_s15 + $0x60] sm:$0xff]  }
 0xa08   : > { %v8345_v42 = vpop.eup %8344  ;;  %v5504_v4 = vadd.f32 %v11455_v2, %v5482_v63  ;;  %v5462_v48 = vmul.f32 %v8343_v5, %v11399_v19  ;;  %v1081_v5 = vld [vmem:[%s9400_s2] sm:$0x3] }
 0xa09   : > { %7252 = vmatpush3.bf16.msra.mxu1 %v8025_v17  ;;  %v5503_v57 = vadd.f32 %v11455_v2, %v5481_v58  ;;  %v5461_v52 = vmul.f32 %v8345_v42, %v11402_v18 }
 0xa0a   : > { %v5484_v53 = vmul.f32 %v11445_v50, %v5462_v48  ;;  %7253 = vmatprep.subr.bf16.mxu1 %v8026_v6 }
 0xa0b   : > { %v5515_v51 = vpack.c.bf16 %v5504_v4, %v5503_v57  ;;  %v5483_v37 = vmul.f32 %v11445_v50, %v5461_v52 }
 0xa0c   : > { %5679 = vmatmul.mubr.bf16.gmra.mrb[88].mxu1 %v5513_v24  ;;  %v5396_v47 = vpop.xlane.xlu0 %5395  ;;  %v5506_v39 = vadd.f32 %v11455_v2, %v5484_v53 }
 0xa0d   : > { %v5415_v3 = vmul.f32 0.0078125, %v5396_v47  ;;  %5688 = vmatprep.mubr.bf16.mxu1 %v8794_v29  ;;  %v5505_v44 = vadd.f32 %v11455_v2, %v5483_v37 }
 0xa0e   : > { %v5398_v61 = vpop.xlane.xlu1 %5397 }
 0xa0f   : > { %v5431_v0 = vadd.f32 1e-05, %v5415_v3  ;;  %v5416_v9 = vmul.f32 0.0078125, %v5398_v61  ;;  %v5516_v33 = vpack.c.bf16 %v5506_v39, %v5505_v44 }
 0xa10   : > { %v5400_v28 = vpop.xlane.xlu0 %5399 }
 0xa11   : > { %v5432_v10 = vadd.f32 1e-05, %v5416_v9  ;;  %8346 = vrsqrt.f32 %v5431_v0  ;;  %v5417_v46 = vmul.f32 0.0078125, %v5400_v28  ;;  %v8029_v0 = vld [vmem:[%s9402_s15 + $0x28] sm:$0xff]   ;;  %v8031_v9 = vld [vmem:[%s9402_s15 + $0x30] sm:$0xff]   ;;  %v8033_v28 = vld [vmem:[%s9402_s15 + $0x38] sm:$0xff]  }
 0xa12   : > { %v5402_v49 = vpop.xlane.xlu1 %5401 }
 0xa13   : > { %8348 = vrsqrt.f32 %v5432_v10  ;;  %v5418_v23 = vmul.f32 0.0078125, %v5402_v49  ;;  %v5433_v45 = vadd.f32 1e-05, %v5417_v46 }
 0xa14   : > { %5689 = vmatmul.mubr.bf16.gmra.mrb[92].mxu1 %v5514_v34 }
 0xa15   : > { %v5434_v32 = vadd.f32 1e-05, %v5418_v23  ;;  %5698 = vmatprep.mubr.bf16.mxu1 %v8794_v29 }
 0xa17   : > { %8350 = vrsqrt.f32 %v5434_v32 }
 0xa18   : > { %8352 = vrsqrt.f32 %v5433_v45 }
 0xa1b   : > { %v8347_v26 = vpop.eup %8346 }
 0xa1c   : > { %5699 = vmatmul.mubr.bf16.gmra.mrb[96].mxu1 %v5515_v51  ;;  %v5463_v19 = vmul.f32 %v8347_v26, %v11419_v38 }
 0xa1d   : > { %v8349_v17 = vpop.eup %8348  ;;  %5708 = vmatprep.mubr.bf16.mxu1 %v8794_v29 }
 0xa1e   : > { %v5464_v18 = vmul.f32 %v8349_v17, %v11422_v62  ;;  %v5485_v24 = vmul.f32 %v11445_v50, %v5463_v19 }
 0xa20   : > { %v5486_v35 = vmul.f32 %v11445_v50, %v5464_v18  ;;  %v5507_v62 = vadd.f32 %v11455_v2, %v5485_v24 }
 0xa21   : > { %v8351_v60 = vpop.eup %8350 }
 0xa22   : > { %v8353_v21 = vpop.eup %8352  ;;  %v5508_v55 = vadd.f32 %v11455_v2, %v5486_v35  ;;  %v5466_v30 = vmul.f32 %v8351_v60, %v11433_v7 }
 0xa23   : > { %v5465_v38 = vmul.f32 %v8353_v21, %v11428_v31  ;;  %v8027_v31 = vld [vmem:[%s9402_s15 + $0x20] sm:$0xff]  }
 0xa24   : > { %5709 = vmatmul.mubr.bf16.gmra.mrb[100].mxu1 %v5516_v33  ;;  %v5517_v47 = vpack.c.bf16 %v5508_v55, %v5507_v62  ;;  %v5488_v3 = vmul.f32 %v11445_v50, %v5466_v30 }
 0xa25   : > { %5718 = vmatprep.mubr.bf16.mxu1 %v8794_v29  ;;  %v5487_v61 = vmul.f32 %v11445_v50, %v5465_v38  ;;  %7254 = vmatpush3.bf16.msra.mxu1 %v8027_v31  ;;  %v8030_v50 = vld [vmem:[%s9402_s15 + $0x70] sm:$0xff]  }
 0xa26   : > { %v5510_v15 = vadd.f32 %v11455_v2, %v5488_v3  ;;  %7255 = vmatprep.subr.bf16.mxu1 %v8028_v14 }
 0xa27   : > { %v5509_v7 = vadd.f32 %v11455_v2, %v5487_v61  ;;  %v12420_v2 = vld [vmem:[#allocation48_spill] sm:$0xff] }
 0xa28   : > { %v5538_v10 = vsub.s32 0, %v12420_v2  ;;  %v5542_v49 = vsub.s32 1, %v12420_v2 }
 0xa29   : > { %v5518_v8 = vpack.c.bf16 %v5510_v15, %v5509_v7  ;;  %7256 = vmatpush3.bf16.msra.mxu1 %v8029_v0 }
 0xa2a   : > { %7257 = vmatprep.subr.bf16.mxu1 %v8030_v50  ;;  %v11527_v34 = vrot.slane %v1081_v5, %v5538_v10  ;;  %v11529_v58 = vrot.slane %v1081_v5, %v5542_v49 }
 0xa2c   : > { %5719 = vmatmul.mubr.bf16.gmra.mrb[104].mxu1 %v5517_v47 }
 0xa2d   : > { %5728 = vmatprep.mubr.bf16.mxu1 %v8794_v29  ;;  %7258 = vmatpush3.bf16.msra.mxu1 %v8031_v9  ;;  %v8032_v29 = vld [vmem:[%s9402_s15 + $0x78] sm:$0xff]  }
 0xa2e   : > { %7259 = vmatprep.subr.bf16.mxu1 %v8032_v29 }
 0xa31   : > { %7260 = vmatpush3.bf16.msra.mxu1 %v8033_v28 }
 0xa34   : > { %5729 = vmatmul.mubr.bf16.gmra.mrb[108].mxu1 %v5518_v8 }
 0xacf   : > { %v5660_v63 = vpop.f32.mrb[80].mxu1 }
 0xad0   : > { %v11532_v42 = vadd.f32 %v5660_v63, %v11527_v34  ;;  %v5662_v46 = vpop.f32.mrb[81].mxu1 }
 0xad1   : > { %v11535_v23 = vadd.f32 %v5662_v46, %v11529_v58  ;;  %v5664_v32 = vpop.f32.mrb[82].mxu1 }
 0xad2   : > { %v5739_v57 = vmul.f32 %v11532_v42, %v11532_v42  ;;  %v11540_v4 = vadd.f32 %v5664_v32, %v11527_v34  ;;  %v5666_v52 = vpop.f32.mrb[83].mxu1 }
 0xad3   : > { %v5740_v48 = vmul.f32 %v11535_v23, %v11535_v23  ;;  %v11545_v45 = vadd.f32 %v5666_v52, %v11529_v58 }
 0xad4   : > { %v5771_v51 = vmul.f32 %v5739_v57, %v11532_v42  ;;  %v5741_v37 = vmul.f32 %v11540_v4, %v11540_v4 }
 0xad5   : > { %v5772_v53 = vmul.f32 %v5740_v48, %v11535_v23  ;;  %v5742_v26 = vmul.f32 %v11545_v45, %v11545_v45 }
 0xad6   : > { %v5803_v17 = vmul.f32 0.044715, %v5771_v51  ;;  %v5773_v44 = vmul.f32 %v5741_v37, %v11540_v4 }
 0xad7   : > { %v5804_v39 = vmul.f32 0.044715, %v5772_v53  ;;  %v5774_v18 = vmul.f32 %v5742_v26, %v11545_v45  ;;  %v5670_v19 = vpop.f32.mrb[84].mxu1 }
 0xad8   : > { %v5835_v33 = vadd.f32 %v5803_v17, %v11532_v42  ;;  %v5805_v35 = vmul.f32 0.044715, %v5773_v44  ;;  %v11557_v60 = vadd.f32 %v5670_v19, %v11527_v34  ;;  %v5672_v24 = vpop.f32.mrb[85].mxu1 }
 0xad9   : > { %v5836_v21 = vadd.f32 %v5804_v39, %v11535_v23  ;;  %v5806_v55 = vmul.f32 0.044715, %v5774_v18  ;;  %v11561_v30 = vadd.f32 %v5672_v24, %v11529_v58  ;;  %v5674_v62 = vpop.f32.mrb[86].mxu1 }
 0xada   : > { %v5867_v38 = vmul.f32 0.7978846, %v5835_v33  ;;  %v5837_v47 = vadd.f32 %v5805_v35, %v11540_v4  ;;  %v5743_v3 = vmul.f32 %v11557_v60, %v11557_v60  ;;  %v11567_v61 = vadd.f32 %v5674_v62, %v11527_v34  ;;  %v5676_v15 = vpop.f32.mrb[87].mxu1 }
 0xadb   : > { %v5868_v7 = vmul.f32 0.7978846, %v5836_v21  ;;  %v5838_v8 = vadd.f32 %v5806_v55, %v11545_v45  ;;  %v5744_v6 = vmul.f32 %v11561_v30, %v11561_v30  ;;  %v11573_v31 = vadd.f32 %v5676_v15, %v11529_v58 }
 0xadc   : > { %8354 = vtanh.f32 %v5867_v38  ;;  %v5869_v14 = vmul.f32 0.7978846, %v5837_v47  ;;  %v5775_v0 = vmul.f32 %v5743_v3, %v11557_v60  ;;  %v5745_v50 = vmul.f32 %v11567_v61, %v11567_v61 }
 0xadd   : > { %8356 = vtanh.f32 %v5868_v7  ;;  %v5870_v9 = vmul.f32 0.7978846, %v5838_v8  ;;  %v5776_v29 = vmul.f32 %v5744_v6, %v11561_v30  ;;  %v5746_v28 = vmul.f32 %v11573_v31, %v11573_v31 }
 0xade   : > { %8358 = vtanh.f32 %v5869_v14  ;;  %v5807_v2 = vmul.f32 0.044715, %v5775_v0  ;;  %v5777_v10 = vmul.f32 %v5745_v50, %v11567_v61 }
 0xadf   : > { %v5808_v5 = vmul.f32 0.044715, %v5776_v29  ;;  %v5778_v49 = vmul.f32 %v5746_v28, %v11573_v31  ;;  %v5680_v63 = vpop.f32.mrb[88].mxu1  ;;  %8360 = vtanh.f32 %v5870_v9 }
 0xae0   : > { %v5839_v46 = vadd.f32 %v5807_v2, %v11557_v60  ;;  %v5809_v32 = vmul.f32 0.044715, %v5777_v10  ;;  %v11585_v57 = vadd.f32 %v5680_v63, %v11527_v34  ;;  %v5682_v52 = vpop.f32.mrb[89].mxu1 }
 0xae1   : > { %v5840_v48 = vadd.f32 %v5808_v5, %v11561_v30  ;;  %v5810_v51 = vmul.f32 0.044715, %v5778_v49  ;;  %v11589_v37 = vadd.f32 %v5682_v52, %v11529_v58  ;;  %v5684_v53 = vpop.f32.mrb[90].mxu1 }
 0xae2   : > { %v5871_v26 = vmul.f32 0.7978846, %v5839_v46  ;;  %v5841_v17 = vadd.f32 %v5809_v32, %v11567_v61  ;;  %v5747_v44 = vmul.f32 %v11585_v57, %v11585_v57  ;;  %v11595_v39 = vadd.f32 %v5684_v53, %v11527_v34  ;;  %v5686_v18 = vpop.f32.mrb[91].mxu1 }
 0xae3   : > { %v5872_v19 = vmul.f32 0.7978846, %v5840_v48  ;;  %v5842_v33 = vadd.f32 %v5810_v51, %v11573_v31  ;;  %v5748_v35 = vmul.f32 %v11589_v37, %v11589_v37  ;;  %v11601_v24 = vadd.f32 %v5686_v18, %v11529_v58 }
 0xae4   : > { %8362 = vtanh.f32 %v5871_v26  ;;  %v5873_v21 = vmul.f32 0.7978846, %v5841_v17  ;;  %v5779_v55 = vmul.f32 %v5747_v44, %v11585_v57  ;;  %v5749_v62 = vmul.f32 %v11595_v39, %v11595_v39 }
 0xae5   : > { %8364 = vtanh.f32 %v5872_v19  ;;  %v5874_v38 = vmul.f32 0.7978846, %v5842_v33  ;;  %v5780_v47 = vmul.f32 %v5748_v35, %v11589_v37  ;;  %v5750_v3 = vmul.f32 %v11601_v24, %v11601_v24 }
 0xae6   : > { %v8355_v15 = vpop.eup %8354  ;;  %8366 = vtanh.f32 %v5873_v21  ;;  %v5811_v7 = vmul.f32 0.044715, %v5779_v55  ;;  %v5781_v8 = vmul.f32 %v5749_v62, %v11595_v39 }
 0xae7   : > { %v8357_v6 = vpop.eup %8356  ;;  %v5931_v14 = vadd.f32 1.0, %v8355_v15  ;;  %8368 = vtanh.f32 %v5874_v38  ;;  %v5812_v0 = vmul.f32 0.044715, %v5780_v47  ;;  %v5782_v50 = vmul.f32 %v5750_v3, %v11601_v24  ;;  %v5690_v9 = vpop.f32.mrb[92].mxu1 }
 0xae8   : > { %v8359_v29 = vpop.eup %8358  ;;  %v5843_v28 = vadd.f32 %v5811_v7, %v11585_v57  ;;  %v5813_v2 = vmul.f32 0.044715, %v5781_v8  ;;  %v11613_v10 = vadd.f32 %v5690_v9, %v11527_v34  ;;  %v5692_v5 = vpop.f32.mrb[93].mxu1  ;;  %v5932_v49 = vadd.f32 1.0, %v8357_v6 }
 0xae9   : > { %v5963_v63 = vmul.f32 0.5, %v5931_v14  ;;  %v5933_v46 = vadd.f32 1.0, %v8359_v29  ;;  %v5844_v32 = vadd.f32 %v5812_v0, %v11589_v37  ;;  %v5814_v52 = vmul.f32 0.044715, %v5782_v50  ;;  %v5694_v48 = vpop.f32.mrb[94].mxu1  ;;  %v8361_v18 = vpop.eup %8360 }
 0xaea   : > { %v5875_v51 = vmul.f32 0.7978846, %v5843_v28  ;;  %v5845_v53 = vadd.f32 %v5813_v2, %v11595_v39  ;;  %v5751_v26 = vmul.f32 %v11613_v10, %v11613_v10  ;;  %v11620_v17 = vadd.f32 %v5692_v5, %v11529_v58  ;;  %v5696_v44 = vpop.f32.mrb[95].mxu1 }
 0xaeb   : > { %v11623_v19 = vmul.f32 %v5963_v63, %v11532_v42  ;;  %v5965_v33 = vmul.f32 0.5, %v5933_v46  ;;  %v5876_v35 = vmul.f32 0.7978846, %v5844_v32  ;;  %v5846_v21 = vadd.f32 %v5814_v52, %v11601_v24 }
 0xaec   : > { %8370 = vtanh.f32 %v5875_v51  ;;  %v5877_v55 = vmul.f32 0.7978846, %v5845_v53  ;;  %v5783_v62 = vmul.f32 %v5751_v26, %v11613_v10  ;;  %v5752_v38 = vmul.f32 %v11620_v17, %v11620_v17 }
 0xaed   : > { %v11630_v47 = vmul.f32 %v5965_v33, %v11540_v4  ;;  %8372 = vtanh.f32 %v5876_v35  ;;  %v5878_v3 = vmul.f32 0.7978846, %v5846_v21  ;;  %v11633_v15 = vadd.f32 %v5694_v48, %v11527_v34 }
 0xaee   : > { %v11635_v42 = vpop.eup %8362  ;;  %8374 = vtanh.f32 %v5877_v55  ;;  %v5815_v7 = vmul.f32 0.044715, %v5783_v62  ;;  %v5784_v8 = vmul.f32 %v5752_v38, %v11620_v17  ;;  %v11639_v6 = vadd.f32 %v5696_v44, %v11529_v58 }
 0xaef   : > { %v11641_v14 = vpop.eup %8364  ;;  %8376 = vtanh.f32 %v5878_v3  ;;  %v5753_v0 = vmul.f32 %v11633_v15, %v11633_v15  ;;  %v5700_v50 = vpop.f32.mrb[96].mxu1  ;;  %v5934_v9 = vadd.f32 1.0, %v8361_v18  ;;  %v5964_v53 = vmul.f32 0.5, %v5932_v49 }
 0xaf0   : > { %v11647_v29 = vpop.eup %8366  ;;  %v5847_v28 = vadd.f32 %v5815_v7, %v11613_v10  ;;  %v5816_v2 = vmul.f32 0.044715, %v5784_v8  ;;  %v5754_v5 = vmul.f32 %v11639_v6, %v11639_v6  ;;  %v11653_v63 = vadd.f32 %v5700_v50, %v11527_v34  ;;  %v5702_v46 = vpop.f32.mrb[97].mxu1 }
 0xaf1   : > { %v11655_v32 = vpop.eup %8368  ;;  %v5785_v52 = vmul.f32 %v5753_v0, %v11633_v15  ;;  %v11659_v48 = vadd.f32 %v5702_v46, %v11529_v58  ;;  %v5704_v51 = vpop.f32.mrb[98].mxu1  ;;  %v5966_v26 = vmul.f32 0.5, %v5934_v9 }
 0xaf2   : > { %v5879_v44 = vmul.f32 0.7978846, %v5847_v28  ;;  %v5848_v18 = vadd.f32 %v5816_v2, %v11620_v17  ;;  %v5786_v33 = vmul.f32 %v5754_v5, %v11639_v6  ;;  %v5755_v35 = vmul.f32 %v11653_v63, %v11653_v63  ;;  %v5706_v21 = vpop.f32.mrb[99].mxu1 }
 0xaf3   : > { %v5817_v55 = vmul.f32 0.044715, %v5785_v52  ;;  %v5756_v62 = vmul.f32 %v11659_v48, %v11659_v48  ;;  %v11668_v38 = vadd.f32 %v5704_v51, %v11527_v34  ;;  %v11671_v3 = vadd.f32 %v5706_v21, %v11529_v58 }
 0xaf4   : > { %8378 = vtanh.f32 %v5879_v44  ;;  %v5880_v49 = vmul.f32 0.7978846, %v5848_v18  ;;  %v5818_v7 = vmul.f32 0.044715, %v5786_v33  ;;  %v5787_v8 = vmul.f32 %v5755_v35, %v11653_v63 }
 0xaf5   : > { %v5849_v0 = vadd.f32 %v5817_v55, %v11633_v15  ;;  %v5788_v50 = vmul.f32 %v5756_v62, %v11659_v48  ;;  %v5757_v9 = vmul.f32 %v11668_v38, %v11668_v38  ;;  %v5758_v28 = vmul.f32 %v11671_v3, %v11671_v3 }
 0xaf6   : > { %v11680_v2 = vpop.eup %8370  ;;  %8380 = vtanh.f32 %v5880_v49  ;;  %v5850_v5 = vadd.f32 %v5818_v7, %v11639_v6  ;;  %v5819_v46 = vmul.f32 0.044715, %v5787_v8  ;;  %v5996_v52 = vmul.f32 %v5964_v53, %v11535_v23 }
 0xaf7   : > { %v11684_v51 = vpop.eup %8372  ;;  %v5881_v44 = vmul.f32 0.7978846, %v5849_v0  ;;  %v5820_v18 = vmul.f32 0.044715, %v5788_v50  ;;  %v5789_v33 = vmul.f32 %v5757_v9, %v11668_v38  ;;  %v5790_v35 = vmul.f32 %v5758_v28, %v11671_v3  ;;  %v5710_v21 = vpop.f32.mrb[100].mxu1 }
 0xaf8   : > { %v11688_v55 = vpop.eup %8374  ;;  %v5882_v62 = vmul.f32 0.7978846, %v5850_v5  ;;  %v5851_v4 = vadd.f32 %v5819_v46, %v11653_v63  ;;  %v5998_v49 = vmul.f32 %v5966_v26, %v11545_v45  ;;  %v11693_v7 = vadd.f32 %v5710_v21, %v11527_v34  ;;  %v5712_v23 = vpop.f32.mrb[101].mxu1 }
 0xaf9   : > { %v11695_v53 = vpop.eup %8376  ;;  %8382 = vtanh.f32 %v5881_v44  ;;  %v5852_v8 = vadd.f32 %v5820_v18, %v11659_v48  ;;  %v5821_v0 = vmul.f32 0.044715, %v5789_v33  ;;  %v5822_v50 = vmul.f32 0.044715, %v5790_v35  ;;  %v5714_v9 = vpop.f32.mrb[102].mxu1 }
 0xafa   : > { %8384 = vtanh.f32 %v5882_v62  ;;  %v5883_v28 = vmul.f32 0.7978846, %v5851_v4  ;;  %v6028_v25 = vpack.c.bf16 %v5998_v49, %v5996_v52  ;;  %v5759_v5 = vmul.f32 %v11693_v7, %v11693_v7  ;;  %v5716_v46 = vpop.f32.mrb[103].mxu1 }
 0xafb   : > { %v5884_v45 = vmul.f32 0.7978846, %v5852_v8  ;;  %v5853_v26 = vadd.f32 %v5821_v0, %v11668_v38  ;;  %v5854_v21 = vadd.f32 %v5822_v50, %v11671_v3  ;;  %v11703_v16 = vadd.f32 %v5712_v23, %v11529_v58 }
 0xafc   : > { %8386 = vtanh.f32 %v5883_v28  ;;  %6203 = vmatprep.mubr.bf16.mxu1 %v6028_v25  ;;  %v5791_v44 = vmul.f32 %v5759_v5, %v11693_v7  ;;  %v11707_v18 = vadd.f32 %v5714_v9, %v11527_v34  ;;  %v11710_v4 = vadd.f32 %v5716_v46, %v11529_v58 }
 0xafd   : > { %8388 = vtanh.f32 %v5884_v45  ;;  %v5885_v52 = vmul.f32 0.7978846, %v5853_v26  ;;  %v5886_v33 = vmul.f32 0.7978846, %v5854_v21  ;;  %v12421_v35 = vpack.c.bf16 %v11630_v47, %v11623_v19 }
 0xafe   : > { %v5760_v62 = vmul.f32 %v11703_v16, %v11703_v16  ;;  %v11717_v49 = vpop.eup %8378  ;;  %v5823_v25 = vmul.f32 0.044715, %v5791_v44  ;;  %v5761_v23 = vmul.f32 %v11707_v18, %v11707_v18  ;;  %v5762_v8 = vmul.f32 %v11710_v4, %v11710_v4 }
 0xaff   : > { %6204 = vmatmul.mubr.bf16.vlgmr.msra.gmra.mrb[112].mxu1 %v12421_v35  ;;  %v5936_v0 = vadd.f32 1.0, %v11641_v14  ;;  %8390 = vtanh.f32 %v5885_v52  ;;  %v5938_v19 = vadd.f32 1.0, %v11655_v32  ;;  %v5935_v47 = vadd.f32 1.0, %v11635_v42  ;;  %v5720_v9 = vpop.f32.mrb[104].mxu1 }
 0xb00   : > { %v5792_v50 = vmul.f32 %v5760_v62, %v11703_v16  ;;  %v11727_v28 = vpop.eup %8380  ;;  %8392 = vtanh.f32 %v5886_v33  ;;  %v5855_v5 = vadd.f32 %v5823_v25, %v11693_v7  ;;  %v5793_v46 = vmul.f32 %v5761_v23, %v11707_v18  ;;  %v5722_v26 = vpop.f32.mrb[105].mxu1 }
 0xb01   : > { %v5794_v45 = vmul.f32 %v5762_v8, %v11710_v4  ;;  %v5968_v14 = vmul.f32 0.5, %v5936_v0  ;;  %v5970_v44 = vmul.f32 0.5, %v5938_v19  ;;  %v5937_v52 = vadd.f32 1.0, %v11647_v29  ;;  %v5724_v35 = vpop.f32.mrb[106].mxu1 }
 0xb02   : > { %v5824_v21 = vmul.f32 0.044715, %v5792_v50  ;;  %v5887_v32 = vmul.f32 0.7978846, %v5855_v5  ;;  %v5825_v62 = vmul.f32 0.044715, %v5793_v46  ;;  %v11734_v43 = vadd.f32 %v5720_v9, %v11527_v34 }
 0xb03   : > { %v5826_v42 = vmul.f32 0.044715, %v5794_v45  ;;  %v11736_v33 = vpop.eup %8382  ;;  %v6000_v23 = vmul.f32 %v5968_v14, %v11561_v30  ;;  %v6002_v8 = vmul.f32 %v5970_v44, %v11573_v31  ;;  %v5967_v50 = vmul.f32 0.5, %v5935_v47  ;;  %v5726_v0 = vpop.f32.mrb[107].mxu1 }
 0xb04   : > { %v5856_v25 = vadd.f32 %v5824_v21, %v11703_v16  ;;  %v11741_v19 = vpop.eup %8384  ;;  %8394 = vtanh.f32 %v5887_v32  ;;  %v5857_v29 = vadd.f32 %v5825_v62, %v11707_v18  ;;  %v5969_v46 = vmul.f32 0.5, %v5937_v52 }
 0xb05   : > { %v5858_v5 = vadd.f32 %v5826_v42, %v11710_v4  ;;  %v6030_v45 = vpack.c.bf16 %v6002_v8, %v6000_v23  ;;  %v5999_v54 = vmul.f32 %v5967_v50, %v11557_v60  ;;  %v5763_v21 = vmul.f32 %v11734_v43, %v11734_v43 }
 0xb06   : > { %v5888_v9 = vmul.f32 0.7978846, %v5856_v25  ;;  %v11748_v30 = vpop.eup %8386  ;;  %v5889_v31 = vmul.f32 0.7978846, %v5857_v29  ;;  %v6001_v14 = vmul.f32 %v5969_v46, %v11567_v61  ;;  %v11752_v44 = vadd.f32 %v5722_v26, %v11529_v58 }
 0xb07   : > { %v5890_v47 = vmul.f32 0.7978846, %v5858_v5  ;;  %v11754_v32 = vpop.eup %8388  ;;  %6211 = vmatprep.mubr.bf16.mxu1 %v6030_v45  ;;  %v5795_v52 = vmul.f32 %v5763_v21, %v11734_v43  ;;  %v11758_v60 = vadd.f32 %v5724_v35, %v11527_v34  ;;  %v11761_v62 = vadd.f32 %v5726_v0, %v11529_v58  ;;  %v5730_v42 = vpop.f32.mrb[108].mxu1 }
 0xb08   : > { %8396 = vtanh.f32 %v5888_v9  ;;  %v6029_v25 = vpack.c.bf16 %v6001_v14, %v5999_v54  ;;  %v5764_v61 = vmul.f32 %v11752_v44, %v11752_v44  ;;  %v5940_v26 = vadd.f32 1.0, %v11684_v51  ;;  %v5732_v23 = vpop.f32.mrb[109].mxu1 }
 0xb09   : > { %8398 = vtanh.f32 %v5889_v31  ;;  %v11766_v8 = vpop.eup %8390  ;;  %v5827_v50 = vmul.f32 0.044715, %v5795_v52  ;;  %v5765_v35 = vmul.f32 %v11758_v60, %v11758_v60  ;;  %v5766_v0 = vmul.f32 %v11761_v62, %v11761_v62  ;;  %v5734_v29 = vpop.f32.mrb[110].mxu1 }
 0xb0a   : > { %8400 = vtanh.f32 %v5890_v47  ;;  %v11772_v5 = vpop.eup %8392  ;;  %6212 = vmatmul.mubr.bf16.gmra.mrb[116].mxu1 %v6029_v25  ;;  %v5796_v54 = vmul.f32 %v5764_v61, %v11752_v44  ;;  %v5942_v46 = vadd.f32 1.0, %v11695_v53  ;;  %v5972_v51 = vmul.f32 0.5, %v5940_v26  ;;  %v5736_v45 = vpop.f32.mrb[111].mxu1 }
 0xb0b   : > { %v5939_v9 = vadd.f32 1.0, %v11680_v2  ;;  %v5859_v21 = vadd.f32 %v5827_v50, %v11734_v43  ;;  %v5797_v31 = vmul.f32 %v5765_v35, %v11758_v60  ;;  %v5798_v47 = vmul.f32 %v5766_v0, %v11761_v62 }
 0xb0c   : > { %v5941_v14 = vadd.f32 1.0, %v11688_v55  ;;  %v5828_v52 = vmul.f32 0.044715, %v5796_v54  ;;  %v5974_v40 = vmul.f32 0.5, %v5942_v46  ;;  %v6004_v25 = vmul.f32 %v5972_v51, %v11589_v37 }
 0xb0d   : > { %v5971_v41 = vmul.f32 0.5, %v5939_v9  ;;  %v5891_v61 = vmul.f32 0.7978846, %v5859_v21  ;;  %v5829_v1 = vmul.f32 0.044715, %v5797_v31  ;;  %v11783_v26 = vadd.f32 %v5730_v42, %v11527_v34 }
 0xb0e   : > { %v5830_v53 = vmul.f32 0.044715, %v5798_v47  ;;  %v11785_v2 = vpop.eup %8394  ;;  %v5860_v50 = vadd.f32 %v5828_v52, %v11752_v44  ;;  %v6006_v35 = vmul.f32 %v5974_v40, %v11601_v24  ;;  %v5973_v0 = vmul.f32 0.5, %v5941_v14 }
 0xb0f   : > { %v6003_v55 = vmul.f32 %v5971_v41, %v11585_v57  ;;  %8402 = vtanh.f32 %v5891_v61  ;;  %v5861_v54 = vadd.f32 %v5829_v1, %v11758_v60  ;;  %v5767_v46 = vmul.f32 %v11783_v26, %v11783_v26 }
 0xb10   : > { %v5862_v37 = vadd.f32 %v5830_v53, %v11761_v62  ;;  %v5892_v51 = vmul.f32 0.7978846, %v5860_v50  ;;  %v6032_v42 = vpack.c.bf16 %v6006_v35, %v6004_v25  ;;  %v6005_v9 = vmul.f32 %v5973_v0, %v11595_v39 }
 0xb11   : > { %v11796_v21 = vadd.f32 %v5732_v23, %v11529_v58  ;;  %v5893_v40 = vmul.f32 0.7978846, %v5861_v54  ;;  %v5799_v41 = vmul.f32 %v5767_v46, %v11783_v26  ;;  %v11802_v1 = vadd.f32 %v5734_v29, %v11527_v34 }
 0xb12   : > { %v11798_v31 = vpop.eup %8396  ;;  %v5894_v24 = vmul.f32 0.7978846, %v5862_v37  ;;  %8404 = vtanh.f32 %v5892_v51  ;;  %6219 = vmatprep.mubr.bf16.mxu1 %v6032_v42  ;;  %v6031_v47 = vpack.c.bf16 %v6005_v9, %v6003_v55  ;;  %v11809_v23 = vadd.f32 %v5736_v45, %v11529_v58 }
 0xb13   : > { %v11804_v57 = vpop.eup %8398  ;;  %v5768_v39 = vmul.f32 %v11796_v21, %v11796_v21  ;;  %8406 = vtanh.f32 %v5893_v40  ;;  %v5831_v52 = vmul.f32 0.044715, %v5799_v41  ;;  %v5769_v25 = vmul.f32 %v11802_v1, %v11802_v1 }
 0xb14   : > { %v8401_v14 = vpop.eup %8400  ;;  %v5944_v34 = vadd.f32 1.0, %v11727_v28  ;;  %8408 = vtanh.f32 %v5894_v24  ;;  %6220 = vmatmul.mubr.bf16.gmra.mrb[120].mxu1 %v6031_v47  ;;  %v5770_v61 = vmul.f32 %v11809_v23, %v11809_v23  ;;  %v5946_v53 = vadd.f32 1.0, %v11741_v19 }
 0xb15   : > { %v5800_v29 = vmul.f32 %v5768_v39, %v11796_v21  ;;  %v5863_v58 = vadd.f32 %v5831_v52, %v11783_v26  ;;  %v5801_v45 = vmul.f32 %v5769_v25, %v11802_v1  ;;  %v5943_v35 = vadd.f32 1.0, %v11717_v49 }
 0xb16   : > { %v5976_v50 = vmul.f32 0.5, %v5944_v34  ;;  %v5802_v55 = vmul.f32 %v5770_v61, %v11809_v23  ;;  %v5978_v28 = vmul.f32 0.5, %v5946_v53  ;;  %v5945_v54 = vadd.f32 1.0, %v11736_v33 }
 0xb17   : > { %v5832_v0 = vmul.f32 0.044715, %v5800_v29  ;;  %v5895_v37 = vmul.f32 0.7978846, %v5863_v58  ;;  %v5833_v46 = vmul.f32 0.044715, %v5801_v45 }
 0xb18   : > { %v6008_v51 = vmul.f32 %v5976_v50, %v11620_v17  ;;  %v5975_v42 = vmul.f32 0.5, %v5943_v35  ;;  %v5834_v9 = vmul.f32 0.044715, %v5802_v55  ;;  %v6010_v40 = vmul.f32 %v5978_v28, %v11639_v6 }
 0xb19   : > { %v5864_v19 = vadd.f32 %v5832_v0, %v11796_v21  ;;  %v5977_v24 = vmul.f32 0.5, %v5945_v54  ;;  %v8403_v41 = vpop.eup %8402  ;;  %8410 = vtanh.f32 %v5895_v37  ;;  %v5865_v49 = vadd.f32 %v5833_v46, %v11802_v1 }
 0xb1a   : > { %v6007_v47 = vmul.f32 %v5975_v42, %v11613_v10  ;;  %v5948_v39 = vadd.f32 1.0, %v11754_v32  ;;  %v5866_v52 = vadd.f32 %v5834_v9, %v11809_v23  ;;  %v6034_v25 = vpack.c.bf16 %v6010_v40, %v6008_v51 }
 0xb1b   : > { %v5896_v33 = vmul.f32 0.7978846, %v5864_v19  ;;  %v6009_v17 = vmul.f32 %v5977_v24, %v11633_v15  ;;  %v5897_v34 = vmul.f32 0.7978846, %v5865_v49  ;;  %v5950_v29 = vadd.f32 1.0, %v11772_v5 }
 0xb1c   : > { %v5980_v61 = vmul.f32 0.5, %v5948_v39  ;;  %v5947_v6 = vadd.f32 1.0, %v11748_v30  ;;  %v8405_v53 = vpop.eup %8404  ;;  %v5898_v58 = vmul.f32 0.7978846, %v5866_v52  ;;  %6227 = vmatprep.mubr.bf16.mxu1 %v6034_v25  ;;  %v5949_v10 = vadd.f32 1.0, %v11766_v8 }
 0xb1d   : > { %8412 = vtanh.f32 %v5896_v33  ;;  %v6033_v45 = vpack.c.bf16 %v6009_v17, %v6007_v47  ;;  %v8407_v32 = vpop.eup %8406  ;;  %v5982_v50 = vmul.f32 0.5, %v5950_v29  ;;  %v5952_v55 = vadd.f32 1.0, %v11798_v31 }
 0xb1e   : > { %8414 = vtanh.f32 %v5897_v34  ;;  %v6012_v35 = vmul.f32 %v5980_v61, %v11659_v48  ;;  %v5979_v0 = vmul.f32 0.5, %v5947_v6  ;;  %v8409_v15 = vpop.eup %8408  ;;  %v5981_v5 = vmul.f32 0.5, %v5949_v10 }
 0xb1f   : > { %8416 = vtanh.f32 %v5898_v58  ;;  %6228 = vmatmul.mubr.bf16.gmra.mrb[124].mxu1 %v6033_v45  ;;  %v5954_v30 = vadd.f32 1.0, %v8401_v14  ;;  %v6014_v28 = vmul.f32 %v5982_v50, %v11671_v3  ;;  %v5951_v37 = vadd.f32 1.0, %v11785_v2 }
 0xb20   : > { %v6011_v54 = vmul.f32 %v5979_v0, %v11653_v63  ;;  %v5953_v8 = vadd.f32 1.0, %v11804_v57  ;;  %v6013_v46 = vmul.f32 %v5981_v5, %v11668_v38  ;;  %v5984_v51 = vmul.f32 0.5, %v5952_v55 }
 0xb21   : > { %v5986_v48 = vmul.f32 0.5, %v5954_v30  ;;  %v5956_v42 = vadd.f32 1.0, %v8405_v53  ;;  %v6036_v19 = vpack.c.bf16 %v6014_v28, %v6012_v35  ;;  %v5983_v9 = vmul.f32 0.5, %v5951_v37 }
 0xb22   : > { %v5985_v40 = vmul.f32 0.5, %v5953_v8  ;;  %v5958_v24 = vadd.f32 1.0, %v8409_v15  ;;  %v6035_v49 = vpack.c.bf16 %v6013_v46, %v6011_v54  ;;  %v6016_v31 = vmul.f32 %v5984_v51, %v11703_v16 }
 0xb23   : > { %v6018_v3 = vmul.f32 %v5986_v48, %v11710_v4  ;;  %v5988_v14 = vmul.f32 0.5, %v5956_v42  ;;  %v8411_v63 = vpop.eup %8410  ;;  %6235 = vmatprep.mubr.bf16.mxu1 %v6036_v19  ;;  %v6015_v2 = vmul.f32 %v5983_v9, %v11693_v7  ;;  %v5955_v47 = vadd.f32 1.0, %v8403_v41 }
 0xb24   : > { %v6017_v57 = vmul.f32 %v5985_v40, %v11707_v18  ;;  %v5990_v38 = vmul.f32 0.5, %v5958_v24  ;;  %v5957_v33 = vadd.f32 1.0, %v8407_v32  ;;  %v5959_v52 = vadd.f32 1.0, %v8411_v63 }
 0xb25   : > { %v6038_v39 = vpack.c.bf16 %v6018_v3, %v6016_v31  ;;  %v6020_v17 = vmul.f32 %v5988_v14, %v11752_v44  ;;  %v5987_v16 = vmul.f32 0.5, %v5955_v47 }
 0xb26   : > { %v6037_v25 = vpack.c.bf16 %v6017_v57, %v6015_v2  ;;  %v6022_v34 = vmul.f32 %v5990_v38, %v11761_v62  ;;  %v5989_v4 = vmul.f32 0.5, %v5957_v33  ;;  %v5991_v45 = vmul.f32 0.5, %v5959_v52 }
 0xb27   : > { %v8413_v29 = vpop.eup %8412  ;;  %6236 = vmatmul.mubr.bf16.gmra.mrb[128].mxu1 %v6035_v49  ;;  %v6019_v18 = vmul.f32 %v5987_v16, %v11734_v43 }
 0xb28   : > { %v8415_v61 = vpop.eup %8414  ;;  %6243 = vmatprep.mubr.bf16.mxu1 %v6038_v39  ;;  %v6040_v6 = vpack.c.bf16 %v6022_v34, %v6020_v17  ;;  %v5960_v7 = vadd.f32 1.0, %v8413_v29  ;;  %v6021_v41 = vmul.f32 %v5989_v4, %v11758_v60  ;;  %v6023_v35 = vmul.f32 %v5991_v45, %v11783_v26  ;;  %v11858_v26 = vld [vmem:[%s954_s26] ss:$0 sm:$0xff] }
 0xb29   : > { %v8417_v53 = vpop.eup %8416  ;;  %v5961_v58 = vadd.f32 1.0, %v8415_v61 }
 0xb2a   : > { %v5962_v10 = vadd.f32 1.0, %v8417_v53  ;;  %v5992_v32 = vmul.f32 0.5, %v5960_v7  ;;  %v6039_v44 = vpack.c.bf16 %v6021_v41, %v6019_v18 }
 0xb2b   : > { %v5993_v50 = vmul.f32 0.5, %v5961_v58  ;;  %v12423_v58 = vld [vmem:[#allocation82_spill] sm:$0xff] }
 0xb2c   : > { %v5994_v62 = vmul.f32 0.5, %v5962_v10  ;;  %v6024_v15 = vmul.f32 %v5992_v32, %v11796_v21 }
 0xb2d   : > { %v6025_v0 = vmul.f32 %v5993_v50, %v11802_v1 }
 0xb2e   : > { %v6026_v5 = vmul.f32 %v5994_v62, %v11809_v23 }
 0xb2f   : > { %6244 = vmatmul.mubr.bf16.gmra.mrb[132].mxu1 %v6037_v25  ;;  %v6041_v43 = vpack.c.bf16 %v6025_v0, %v6023_v35  ;;  %v12424_v35 = vld [vmem:[#allocation87_spill] sm:$0xff] }
 0xb30   : > { %6251 = vmatprep.mubr.bf16.mxu1 %v6040_v6  ;;  %v6042_v60 = vpack.c.bf16 %v6026_v5, %v6024_v15 }
 0xb37   : > { %6252 = vmatmul.mubr.bf16.gmra.mrb[136].mxu1 %v6039_v44 }
 0xb38   : > { %6259 = vmatprep.mubr.bf16.mxu1 %v6042_v60 }
 0xb3f   : > { %6260 = vmatmul.mubr.bf16.gmra.mrb[140].mxu1 %v6041_v43 }
 0xbd2   : > { %v7261_v55 = vpop.f32.mrb[112].mxu1 }
 0xbd3   : > { %v7262_v30 = vpop.f32.mrb[113].mxu1 }
 0xbd4   : > { %v7263_v28 = vadd.f32 %v7262_v30, %v7261_v55  ;;  %v7264_v54 = vpop.f32.mrb[114].mxu1 }
 0xbd5   : > { %v7265_v21 = vpop.f32.mrb[115].mxu1 }
 0xbd6   : > { %v6268_v1 = vadd.f32 %v7263_v28, %v11279_v12  ;;  %v7266_v23 = vadd.f32 %v7265_v21, %v7264_v54 }
 0xbd8   : > { %v11862_v37 = vadd.f32 %v11858_v26, %v6268_v1  ;;  %v6269_v8 = vadd.f32 %v7266_v23, %v11282_v59  ;;  %v12426_v1 = vld [vmem:[#allocation89_spill] sm:$0xff] }
 0xbda   : > { %6306 = vst [vmem:[#allocation2] sm:$0xff] %v11862_v37  ;;  %v11867_v46 = vadd.f32 %v11858_v26, %v6269_v8 }
 0xbdc   : > { %6307 = vst [vmem:[#allocation2 + $0x8] sm:$0xff] %v11867_v46 }
 0xbdd   : > { %v7267_v51 = vpop.f32.mrb[116].mxu1 }
 0xbde   : > { %v7268_v48 = vpop.f32.mrb[117].mxu1 }
 0xbdf   : > { %v7269_v42 = vadd.f32 %v7268_v48, %v7267_v51  ;;  %v7270_v19 = vpop.f32.mrb[118].mxu1  ;;  %v12427_v48 = vld [vmem:[#allocation86_spill] sm:$0xff] }
 0xbe0   : > { %v7271_v9 = vpop.f32.mrb[119].mxu1 }
 0xbe1   : > { %v6270_v12 = vadd.f32 %v7269_v42, %v11290_v22  ;;  %v7272_v40 = vadd.f32 %v7271_v9, %v7270_v19 }
 0xbe3   : > { %v11872_v24 = vadd.f32 %v11858_v26, %v6270_v12  ;;  %v6271_v59 = vadd.f32 %v7272_v40, %v11286_v27 }
 0xbe5   : > { %6308 = vst [vmem:[#allocation2 + $0x10] sm:$0xff] %v11872_v24  ;;  %v11877_v49 = vadd.f32 %v11858_v26, %v6271_v59 }
 0xbe7   : > { %6309 = vst [vmem:[#allocation2 + $0x18] sm:$0xff] %v11877_v49  ;;  %v7273_v31 = vpop.f32.mrb[120].mxu1 }
 0xbe8   : > { %v7274_v3 = vpop.f32.mrb[121].mxu1 }
 0xbe9   : > { %v7275_v14 = vadd.f32 %v7274_v3, %v7273_v31  ;;  %v7276_v63 = vpop.f32.mrb[122].mxu1  ;;  %v12428_v3 = vld [vmem:[#allocation90_spill] sm:$0xff] }
 0xbea   : > { %v7277_v2 = vpop.f32.mrb[123].mxu1 }
 0xbeb   : > { %v6272_v22 = vadd.f32 %v7275_v14, %v11295_v36  ;;  %v7278_v57 = vadd.f32 %v7277_v2, %v7276_v63 }
 0xbed   : > { %v11882_v38 = vadd.f32 %v11858_v26, %v6272_v22  ;;  %v6273_v27 = vadd.f32 %v7278_v57, %v11298_v20  ;;  %v12429_v22 = vld [vmem:[#allocation88_spill] sm:$0xff] }
 0xbef   : > { %6310 = vst [vmem:[#allocation2 + $0x20] sm:$0xff] %v11882_v38  ;;  %v11887_v47 = vadd.f32 %v11858_v26, %v6273_v27 }
 0xbf1   : > { %6311 = vst [vmem:[#allocation2 + $0x28] sm:$0xff] %v11887_v47 }
 0xbf2   : > { %v7279_v39 = vpop.f32.mrb[124].mxu1 }
 0xbf3   : > { %v7280_v33 = vpop.f32.mrb[125].mxu1 }
 0xbf4   : > { %v7281_v52 = vadd.f32 %v7280_v33, %v7279_v39  ;;  %v7282_v25 = vpop.f32.mrb[126].mxu1  ;;  %v6985_v39 = vpack.c.bf16 (!%p6933_p1), %v11867_v46, %v11862_v37  ;;  %v6990_v33 = vpack.c.bf16 (!%p6933_p1), %v11877_v49, %v11872_v24 }
 0xbf5   : > { %v7283_v17 = vpop.f32.mrb[127].mxu1 }
 0xbf6   : > { %v6274_v36 = vadd.f32 %v7281_v52, %v11303_v56  ;;  %v7284_v34 = vadd.f32 %v7283_v17, %v7282_v25  ;;  %6986 = vst [vmem:[%s9404_s28] sm:$0xff] (!%p6933_p1), %v6985_v39   ;;  %7022 = vst [vmem:[%s9404_s28 + $0x8] sm:$0xff] (!%p6933_p1), %v6990_v33  }
 0xbf8   : > { %v11892_v16 = vadd.f32 %v11858_v26, %v6274_v36  ;;  %v6275_v20 = vadd.f32 %v7284_v34, %v11306_v13 }
 0xbfa   : > { %6312 = vst [vmem:[#allocation2 + $0x30] sm:$0xff] %v11892_v16  ;;  %v11897_v29 = vadd.f32 %v11858_v26, %v6275_v20  ;;  %v7285_v4 = vpop.f32.mrb[128].mxu1 }
 0xbfb   : > { %v7286_v61 = vpop.f32.mrb[129].mxu1 }
 0xbfc   : > { %6313 = vst [vmem:[#allocation2 + $0x38] sm:$0xff] %v11897_v29  ;;  %v7287_v6 = vadd.f32 %v7286_v61, %v7285_v4  ;;  %v7288_v7 = vpop.f32.mrb[130].mxu1  ;;  %v7000_v52 = vpack.c.bf16 (!%p6933_p1), %v11897_v29, %v11892_v16 }
 0xbfd   : > { %v7289_v53 = vpop.f32.mrb[131].mxu1 }
 0xbfe   : > { %v6276_v56 = vadd.f32 %v7287_v6, %v11311_v11  ;;  %v7290_v18 = vadd.f32 %v7289_v53, %v7288_v7  ;;  %v12425_v11 = vld [vmem:[#allocation85_spill] sm:$0xff]  ;;  %7024 = vst [vmem:[%s9404_s28 + $0x18] sm:$0xff] (!%p6933_p1), %v7000_v52  }
 0xc00   : > { %v6298_v41 = vadd.f32 %v11858_v26, %v6276_v56  ;;  %v6277_v45 = vadd.f32 %v7290_v18, %v12423_v58 }
 0xc02   : > { %6314 = vst [vmem:[#allocation2 + $0x40] sm:$0xff] %v6298_v41  ;;  %v6299_v13 = vadd.f32 %v11858_v26, %v6277_v45  ;;  %v7291_v10 = vpop.f32.mrb[132].mxu1 }
 0xc03   : > { %v7292_v32 = vpop.f32.mrb[133].mxu1 }
 0xc04   : > { %6315 = vst [vmem:[#allocation2 + $0x48] sm:$0xff] %v6299_v13  ;;  %v7293_v44 = vadd.f32 %v7292_v32, %v7291_v10  ;;  %v7294_v50 = vpop.f32.mrb[134].mxu1  ;;  %v7005_v25 = vpack.c.bf16 (!%p6933_p1), %v6299_v13, %v6298_v41 }
 0xc05   : > { %v7295_v62 = vpop.f32.mrb[135].mxu1 }
 0xc06   : > { %v6278_v0 = vadd.f32 %v7293_v44, %v12424_v35  ;;  %v7296_v15 = vadd.f32 %v7295_v62, %v7294_v50  ;;  %7025 = vst [vmem:[%s9404_s28 + $0x20] sm:$0xff] (!%p6933_p1), %v7005_v25  }
 0xc08   : > { %v6300_v5 = vadd.f32 %v11858_v26, %v6278_v0  ;;  %v6279_v43 = vadd.f32 %v7296_v15, %v12425_v11 }
 0xc0a   : > { %6316 = vst [vmem:[#allocation2 + $0x50] sm:$0xff] %v6300_v5  ;;  %v6301_v60 = vadd.f32 %v11858_v26, %v6279_v43  ;;  %v7297_v55 = vpop.f32.mrb[136].mxu1 }
 0xc0b   : > { %v7298_v30 = vpop.f32.mrb[137].mxu1 }
 0xc0c   : > { %6317 = vst [vmem:[#allocation2 + $0x58] sm:$0xff] %v6301_v60  ;;  %v7299_v28 = vadd.f32 %v7298_v30, %v7297_v55  ;;  %v7300_v54 = vpop.f32.mrb[138].mxu1  ;;  %v7010_v17 = vpack.c.bf16 (!%p6933_p1), %v6301_v60, %v6300_v5 }
 0xc0d   : > { %v7301_v21 = vpop.f32.mrb[139].mxu1 }
 0xc0e   : > { %v6280_v23 = vadd.f32 %v7299_v28, %v12426_v1  ;;  %v7302_v8 = vadd.f32 %v7301_v21, %v7300_v54  ;;  %7026 = vst [vmem:[%s9404_s28 + $0x28] sm:$0xff] (!%p6933_p1), %v7010_v17  }
 0xc10   : > { %v6302_v51 = vadd.f32 %v11858_v26, %v6280_v23  ;;  %v6281_v42 = vadd.f32 %v7302_v8, %v12427_v48 }
 0xc12   : > { %6318 = vst [vmem:[#allocation2 + $0x60] sm:$0xff] %v6302_v51  ;;  %v6303_v19 = vadd.f32 %v11858_v26, %v6281_v42  ;;  %v7303_v9 = vpop.f32.mrb[140].mxu1 }
 0xc13   : > { %v7304_v12 = vpop.f32.mrb[141].mxu1 }
 0xc14   : > { %6319 = vst [vmem:[#allocation2 + $0x68] sm:$0xff] %v6303_v19  ;;  %v7305_v40 = vadd.f32 %v7304_v12, %v7303_v9  ;;  %v7306_v59 = vpop.f32.mrb[142].mxu1  ;;  %v7015_v36 = vpack.c.bf16 (!%p6933_p1), %v6303_v19, %v6302_v51 }
 0xc15   : > { %v7307_v31 = vpop.f32.mrb[143].mxu1 }
 0xc16   : > { %v6282_v14 = vadd.f32 %v7305_v40, %v12428_v3  ;;  %v7308_v63 = vadd.f32 %v7307_v31, %v7306_v59  ;;  %6325 = sbr.rel (%p6933_p1) target bundleno = 3103 (0xc1f), region = 124  ;;  %7027 = vst [vmem:[%s9404_s28 + $0x30] sm:$0xff] (!%p6933_p1), %v7015_v36  }
 0xc18   : > { %v6304_v2 = vadd.f32 %v11858_v26, %v6282_v14  ;;  %v6283_v57 = vadd.f32 %v7308_v63, %v12429_v22 }
 0xc1a   : > { %6320 = vst [vmem:[#allocation2 + $0x70] sm:$0xff] %v6304_v2  ;;  %v6305_v27 = vadd.f32 %v11858_v26, %v6283_v57  ;;  %v6995_v26 = vpack.c.bf16 (!%p6933_p1), %v11887_v47, %v11882_v38 }
 0xc1c   : > { %6321 = vst [vmem:[#allocation2 + $0x78] sm:$0xff] %v6305_v27  ;;  %v7020_v34 = vpack.c.bf16 (!%p6933_p1), %v6305_v27, %v6304_v2  ;;  %7023 = vst [vmem:[%s9404_s28 + $0x10] sm:$0xff] (!%p6933_p1), %v6995_v26  }
 0xc1e   : > { %7028 = vst [vmem:[%s9404_s28 + $0x38] sm:$0xff] %v7020_v34  }
 0xc1f PF: > { %s12431_s26 = sld [smem:[#allocation27_spill]]  ;;  %s12432_s15 = sld [smem:[#allocation40_spill]] }
 0xc20   : > { %s12433_s1 = sld [smem:[#allocation37_spill]]  ;;  %s12434_s23 = sld [smem:[#allocation111_spill]] }
 0xc21   : > { %s6421_s14 = sshll.u32 %s9404_s28, 4  ;;  %s8795_s11 = smov [#allocation15]   ;;  %s11940_s14 = int_to_ptr.vmem [resolvable:$true] %s6421_s14 }
 0xc22   : > { %s8644_s13 = scalar_lea.vmem %s11940_s14, 1024  ;;  %s8648_s16 = sshll.u32 %s8795_s11, 4  ;;  %s8649_s16 = int_to_ptr.vmem [resolvable:$false] %s8648_s16 }
 0xc23   : > { %p8645_p0 = scmp.ne.s32.totalorder %s11940_s14, %s8644_s13  ;;  %s8650_s18 = scalar_lea.vmem %s8649_s16, 2048 }
 0xc24   : > { %p8651_p9 = scmp.lt.s32.totalorder %s11940_s14, %s8649_s16  ;;  %p8652_p3 = scmp.lt.s32.totalorder %s8650_s18, %s8644_s13 }
 0xc25   : > { %s6981_s30 = sshll.u32 %s12431_s26, 10  ;;  %s6407_s10 = scalar_lea.sflag [#allocation5], %s12432_s15 }
 0xc26   : > { %s11937_s7 = scalar_lea.hbm %s12434_s23, %s6981_s30  ;;  %p12435_p5 = scmp.ne.s32.totalorder %s12433_s1, 0 }
 0xc27   : > { %p8653_p12 = por %p8652_p3, %p8651_p9 }
 0xc28   : > { %p8646_p7 = pnand %p8645_p0, %p12435_p5 }
 0xc2a   : > { %p8647_p10 = pneg %p8646_p7 }
 0xc2c   : > { %p8654_p13 = pnand %p8653_p12, %p8647_p10 }
 0xc2e   : > { %8657 = shalt.err (!%p8654_p13)
}
 0xc2f   : > { %s8658_s28 = scalar_lea.hbm %s11937_s7, 1024  ;;  %s8662_s3 = scalar_lea.hbm %s12434_s23, 2048 }
 0xc30   : > { %p8659_p8 = scmp.ne.s32.totalorder %s11937_s7, %s8658_s28  ;;  %p8663_p6 = scmp.lt.u32.totalorder %s11937_s7, %s12434_s23 }
 0xc31   : > { %p8664_p4 = scmp.lt.u32.totalorder %s8662_s3, %s8658_s28  ;;  %p8666_p0 = scmp.lt.u32.totalorder %s8658_s28, %s11937_s7 }
 0xc32   : > { %p8660_p11 = pnand %p8659_p8, %p12435_p5 }
 0xc33   : > { %p8665_p1 = por %p8664_p4, %p8663_p6 }
 0xc34   : > { %p8661_p2 = pneg %p8660_p11 }
 0xc35   : > { %p8667_p7 = por %p8666_p0, %p8665_p1 }
 0xc37   : > { %p8668_p10 = pnand %p8667_p7, %p8661_p2 }
 0xc39   : > { %8671 = shalt.err (!%p8668_p10)
}
 0xc3a   : > { %s8796_s24 = smov 4  }
 0xc3b   : > { %7835 = dma.vmem_to_hbm [thread:$0]  (%p12435_p5), %s11940_s14, 1024, %s11937_s7, %s6407_s10, %s8793_s19, %s8793_s19, %s8796_s24  }
 0xc3c PF: > { %s12436_s4 = sld [smem:[#allocation30_spill]]  ;;  %s12437_s29 = sld [smem:[#allocation23_spill]] }
 0xc3d   : > { %s12438_s12 = sld [smem:[#allocation39_spill]] }
 0xc42   : > { %p7864_p9 = scmp.ge.s32.totalorder %s12436_s4, 2  ;;  %s6436_s21 = sand.u32 1, %s12437_s29  }
 0xc43   : > { %p12439_p3 = scmp.ne.s32.totalorder %s12438_s12, 0  ;;  %s6437_s8 = scalar_lea.sflag [#allocation5], %s6436_s21 }
 0xc45   : > { %p7860_p12 = pnand %p7864_p9, %p12439_p3 }
 0xc47   : > { %8733 = dma.done.wait (!%p7860_p12), %s6437_s8, 1024  }
 0xc48   : > { %8735 = vsyncadd (!%p7860_p12), %s6437_s8, 4294966272  ;;  %s42_s1 = sadd.s32 1, %s12436_s4   ;;  %s12440_s24 = sld [smem:[#allocation21_spill]] }
 0xc49   : > { %p39_p13 = scmp.ge.s32.totalorder %s42_s1, 6   ;;  %s12441_s25 = sld [smem:[#allocation22_spill]] }
 0xc4a   : > { %s12442_s26 = sld [smem:[#allocation32_spill]]  ;;  %s12443_s27 = sld [smem:[#allocation24_spill]] }
 0xc4b   : > { %s12444_s28 = sld [smem:[#allocation25_spill]]  ;;  %s12445_s29 = sld [smem:[#allocation38_spill]] }
 0xc4c   : > { %s12446_s0 = sld [smem:[#allocation28_spill]]  ;;  %s12447_s30 = sld [smem:[#allocation29_spill]] }
 0xc4d   : > { %s12448_s18 = sld [smem:[#allocation31_spill]]  ;;  %s12449_s19 = sld [smem:[#allocation35_spill]] }
 0xc4e   :  { %41 = sbr.rel (!%p39_p13) target bundleno = 34 (0x22), region = 243 }
 0xc55   :  { %6442 = vsyncpa [#allocation4], 1 }
 0xc56   :  { %6444 = vsyncpa [#allocation4 + $0x1], 1 }
 0xc57   :  { %6445 = vsyncpa [#allocation7], 1 }
 0xc58   :  { %6447 = vsyncpa [#allocation7 + $0x1], 1 }
 0xc59   :  { %6448 = vsyncpa [#allocation10], 1 }
 0xc5a   :  { %6450 = vsyncpa [#allocation10 + $0x1], 1 }
 0xc5b   :  { %6451 = vsyncpa [#allocation13], 1 }
 0xc5c   :  { %6453 = vsyncpa [#allocation13 + $0x1], 1 }
 0xc5d   :  { %6454 = vsyncpa [#allocation5], 1 }
 0xc5e   :  { %6456 = vsyncpa [#allocation5 + $0x1], 1 }

</bundles_post_ra>
